<compile_context>
chip_gen: v7x
topology: tpu7x:2x2x1
jax: 0.10.0
libtpu: 0.0.40
codegen_flags: <defaults>
</compile_context>

<pallas_src>
import functools

import jax
import jax.numpy as jnp
import numpy as np
from jax.experimental import pallas as pl
from jax.experimental.pallas import tpu as pltpu

EPS = 1e-5
VMEM_LIMIT_BYTES = 32 * 1024 * 1024


# ------------------------------ kernels -------------------------------------

def stage1_kernel(x_ref, w1_ref, y1_ref, s1_ref):
    """conv1 (1x1, no bias): y1 = x @ w1, plus per-tile bn1 partial stats."""
    y = jnp.dot(x_ref[...].astype(w1_ref.dtype), w1_ref[...],
                preferred_element_type=jnp.float32)
    y1_ref[...] = y
    s1_ref[0, 0:1, :] = jnp.sum(y, axis=0, keepdims=True)
    s1_ref[0, 1:2, :] = jnp.sum(y * y, axis=0, keepdims=True)


def stage2_kernel(y1p_ref, mask_ref, w2_ref, sc1_ref, sh1_ref,
                  y2_ref, s2_ref, act_scr, tap_scr):
    """bn1+relu fused into the 3x3 conv (per-image halo block).

    The 9 shifted taps are packed into a (H*W, 9*C) VMEM scratch and the conv
    is a single folded MXU matmul against the (9*C, C) weight.  Also emits the
    per-image bn2 partial statistics.
    """
    _, hp, wp, c = y1p_ref.shape
    h, w = hp - 2, wp - 2
    # bn1 + relu once over the whole padded block; the halo border (conv zero
    # padding) is re-zeroed with the precomputed {0,1} mask.
    act_scr[...] = (jnp.maximum(y1p_ref[0] * sc1_ref[...] + sh1_ref[...], 0.0)
                    * mask_ref[...])
    # pack the 9 shifted taps -> (h, w, 9*c)
    for t in range(9):
        ky, kx = t // 3, t % 3
        tap_scr[:, :, t * c:(t + 1) * c] = act_scr[ky:ky + h, kx:kx + w, :]
    a = tap_scr[...].reshape(h * w, 9 * c).astype(w2_ref.dtype)
    y = jnp.dot(a, w2_ref[...], preferred_element_type=jnp.float32)  # (h*w, c)
    y2_ref[0] = y.reshape(h, w, c)
    s2_ref[0, 0:1, :] = jnp.sum(y, axis=0, keepdims=True)
    s2_ref[0, 1:2, :] = jnp.sum(y * y, axis=0, keepdims=True)


def stage3_kernel(y2_ref, sc2_ref, sh2_ref, w3_ref, s3_ref):
    """bn2+relu fused into conv3 (1x1); emits only the bn3 partial stats."""
    h = jnp.maximum(y2_ref[...] * sc2_ref[...] + sh2_ref[...], 0.0)
    y = jnp.dot(h.astype(w3_ref.dtype), w3_ref[...],
                preferred_element_type=jnp.float32)
    s3_ref[0, 0:1, :] = jnp.sum(y, axis=0, keepdims=True)
    s3_ref[0, 1:2, :] = jnp.sum(y * y, axis=0, keepdims=True)


def stage4_kernel(y2_ref, x_ref, sc2_ref, sh2_ref, w3_ref, sc3_ref, sh3_ref,
                  o_ref):
    """Recompute bn2+relu+conv3, apply bn3, add identity, final relu."""
    h = jnp.maximum(y2_ref[...] * sc2_ref[...] + sh2_ref[...], 0.0)
    y = jnp.dot(h.astype(w3_ref.dtype), w3_ref[...],
                preferred_element_type=jnp.float32)
    o_ref[...] = jnp.maximum(y * sc3_ref[...] + sh3_ref[...] + x_ref[...], 0.0)


# ------------------------------ helpers --------------------------------------

def _compiler_params():
    return pltpu.CompilerParams(
        dimension_semantics=("parallel",),   # shard grid across TCs on v7x
        vmem_limit_bytes=VMEM_LIMIT_BYTES)


def _bn_affine(partials, count, gamma, beta):
    """Fold (sum, sumsq) partials + gamma/beta into y_hat = y*scale + shift."""
    s = jnp.sum(partials, axis=0)                 # (2, C)
    mean = s[0] / count
    var = s[1] / count - mean * mean              # biased batch variance
    scale = gamma.reshape(-1) * jax.lax.rsqrt(var + EPS)
    shift = beta.reshape(-1) - mean * scale
    return scale.reshape(1, -1), shift.reshape(1, -1)


def _pick_tile_m(m, target):
    """Largest multiple of 8 that divides m and is <= target (fallback: m)."""
    for cand in range(min(target, m), 7, -1):
        if m % cand == 0 and cand % 8 == 0:
            return cand
    return m


# --------------------------- params / wrapper --------------------------------

def init_bottleneck_params(key, inplanes, planes, groups=1, base_width=64):
    width = int(planes * (base_width / 64.0)) * groups
    out_planes = planes * 4  # Bottleneck.expansion = 4
    ks = jax.random.split(key, 9)

    def conv_init(k, shape, fan_in):
        bound = 1.0 / np.sqrt(fan_in)
        return jax.random.uniform(k, shape, jnp.float32, -bound, bound)

    return {
        # conv weights stored channels-last: (Cin, Cout) / (KH, KW, Cin, Cout)
        "w1": conv_init(ks[0], (inplanes, width), inplanes),
        "g1": jax.random.uniform(ks[1], (1, width), jnp.float32, 0.5, 1.5),
        "b1": jax.random.uniform(ks[2], (1, width), jnp.float32, -0.5, 0.5),
        "w2": conv_init(ks[3], (3, 3, width, width), 9 * width),
        "g2": jax.random.uniform(ks[4], (1, width), jnp.float32, 0.5, 1.5),
        "b2": jax.random.uniform(ks[5], (1, width), jnp.float32, -0.5, 0.5),
        "w3": conv_init(ks[6], (width, out_planes), width),
        "g3": jax.random.uniform(ks[7], (1, out_planes), jnp.float32, 0.5, 1.5),
        "b3": jax.random.uniform(ks[8], (1, out_planes), jnp.float32, -0.5, 0.5),
    }


@functools.partial(jax.jit, static_argnames=("row_tile",))
def bottleneck_forward(x_nchw, params, *, row_tile=1024):
    n, cin, h, w = x_nchw.shape
    width = params["w1"].shape[1]
    cout = params["w3"].shape[1]
    assert cin == cout, "identity residual requires inplanes == planes*4"

    # NCHW -> NHWC once at entry / exit (the module interface is NCHW).
    x_nhwc = jnp.transpose(x_nchw, (0, 2, 3, 1))
    m = n * h * w
    x_flat = x_nhwc.reshape(m, cin)

    tm = _pick_tile_m(m, row_tile)
    mt = m // tm
    cparams = _compiler_params()

    # bf16 MXU operands (f32 accumulation inside the kernels).
    w1 = params["w1"].astype(jnp.bfloat16)                          # (cin, width)
    w2f = params["w2"].reshape(9 * width, width).astype(jnp.bfloat16)
    w3 = params["w3"].astype(jnp.bfloat16)                          # (width, cout)

    # ---- stage 1: conv1 (1x1) + bn1 partial statistics ----------------------
    y1_flat, s1p = pl.pallas_call(
        stage1_kernel,
        grid=(mt,),
        in_specs=[pl.BlockSpec((tm, cin), lambda i: (i, 0)),
                  pl.BlockSpec((cin, width), lambda i: (0, 0))],
        out_specs=(pl.BlockSpec((tm, width), lambda i: (i, 0)),
                   pl.BlockSpec((1, 2, width), lambda i: (i, 0, 0))),
        out_shape=(jax.ShapeDtypeStruct((m, width), jnp.float32),
                   jax.ShapeDtypeStruct((mt, 2, width), jnp.float32)),
        compiler_params=cparams,
    )(x_flat, w1)
    sc1, sh1 = _bn_affine(s1p, m, params["g1"], params["b1"])

    # ---- stage 2: bn1+relu fused into the 3x3 conv (per-image halo block) ---
    y1p = jnp.pad(y1_flat.reshape(n, h, w, width),
                  ((0, 0), (1, 1), (1, 1), (0, 0)))
    # {0,1} mask for the halo border (the conv zero-pads *after* bn1+relu).
    border = jnp.zeros((h + 2, w + 2, 1), jnp.float32)
    border = border.at[1:h + 1, 1:w + 1, :].set(1.0)

    y2_img, s2p = pl.pallas_call(
        stage2_kernel,
        grid=(n,),
        in_specs=[pl.BlockSpec((1, h + 2, w + 2, width), lambda b: (b, 0, 0, 0)),
                  pl.BlockSpec((h + 2, w + 2, 1), lambda b: (0, 0, 0)),
                  pl.BlockSpec((9 * width, width), lambda b: (0, 0)),
                  pl.BlockSpec((1, width), lambda b: (0, 0)),
                  pl.BlockSpec((1, width), lambda b: (0, 0))],
        out_specs=(pl.BlockSpec((1, h, w, width), lambda b: (b, 0, 0, 0)),
                   pl.BlockSpec((1, 2, width), lambda b: (b, 0, 0))),
        out_shape=(jax.ShapeDtypeStruct((n, h, w, width), jnp.float32),
                   jax.ShapeDtypeStruct((n, 2, width), jnp.float32)),
        scratch_shapes=[pltpu.VMEM((h + 2, w + 2, width), jnp.float32),
                        pltpu.VMEM((h, w, 9 * width), jnp.float32)],
        compiler_params=cparams,
    )(y1p, border, w2f, sc1, sh1)
    sc2, sh2 = _bn_affine(s2p, m, params["g2"], params["b2"])

    y2_flat = y2_img.reshape(m, width)

    # ---- stage 3: bn2+relu fused into conv3 (1x1); bn3 partial stats only ---
    s3p = pl.pallas_call(
        stage3_kernel,
        grid=(mt,),
        in_specs=[pl.BlockSpec((tm, width), lambda i: (i, 0)),
                  pl.BlockSpec((1, width), lambda i: (0, 0)),
                  pl.BlockSpec((1, width), lambda i: (0, 0)),
                  pl.BlockSpec((width, cout), lambda i: (0, 0))],
        out_specs=pl.BlockSpec((1, 2, cout), lambda i: (i, 0, 0)),
        out_shape=jax.ShapeDtypeStruct((mt, 2, cout), jnp.float32),
        compiler_params=cparams,
    )(y2_flat, sc2, sh2, w3)
    sc3, sh3 = _bn_affine(s3p, m, params["g3"], params["b3"])

    # ---- stage 4: recompute conv3, apply bn3 + identity add + final relu ----
    out_flat = pl.pallas_call(
        stage4_kernel,
        grid=(mt,),
        in_specs=[pl.BlockSpec((tm, width), lambda i: (i, 0)),
                  pl.BlockSpec((tm, cout), lambda i: (i, 0)),
                  pl.BlockSpec((1, width), lambda i: (0, 0)),
                  pl.BlockSpec((1, width), lambda i: (0, 0)),
                  pl.BlockSpec((width, cout), lambda i: (0, 0)),
                  pl.BlockSpec((1, cout), lambda i: (0, 0)),
                  pl.BlockSpec((1, cout), lambda i: (0, 0))],
        out_specs=pl.BlockSpec((tm, cout), lambda i: (i, 0)),
        out_shape=jax.ShapeDtypeStruct((m, cout), jnp.float32),
        compiler_params=cparams,
    )(y2_flat, x_flat, sc2, sh2, w3, sc3, sh3)

    out = out_flat.reshape(n, h, w, cout)
    return jnp.transpose(out, (0, 3, 1, 2))   # back to NCHW


# ------------------------------ reference ------------------------------------

def reference_forward(x_nchw, params):
    """Pure-JAX reference using the same compute dtype (bf16 MXU, f32 accum/BN)."""
    x = jnp.transpose(x_nchw, (0, 2, 3, 1)).astype(jnp.float32)    # NHWC
    dn = ("NHWC", "HWIO", "NHWC")

    def conv(a, w, padding):
        return jax.lax.conv_general_dilated(
            a.astype(jnp.bfloat16), w.astype(jnp.bfloat16), (1, 1), padding,
            dimension_numbers=dn, preferred_element_type=jnp.float32)

    def bn(y, gamma, beta):
        mean = jnp.mean(y, axis=(0, 1, 2), keepdims=True)
        var = jnp.mean((y - mean) ** 2, axis=(0, 1, 2), keepdims=True)
        return ((y - mean) * jax.lax.rsqrt(var + EPS)
                * gamma.reshape(1, 1, 1, -1) + beta.reshape(1, 1, 1, -1))

    w1 = params["w1"].reshape(1, 1, *params["w1"].shape)
    w3 = params["w3"].reshape(1, 1, *params["w3"].shape)

    t = jax.nn.relu(bn(conv(x, w1, "VALID"), params["g1"], params["b1"]))
    t = jax.nn.relu(bn(conv(t, params["w2"], ((1, 1), (1, 1))),
                       params["g2"], params["b2"]))
    t = jax.nn.relu(bn(conv(t, w3, "VALID"), params["g3"], params["b3"]) + x)
    return jnp.transpose(t, (0, 3, 1, 2))


# -------------------------------- main ----------------------------------------

if __name__ == "__main__":
    key = jax.random.PRNGKey(0)
    kx, kp = jax.random.split(key)

    # batch=2, inplanes=16, planes=4 (=> width=4, out=16 == inplanes), 16x16 spatial
    N, inplanes, H, W = 2, 16, 16, 16
    planes = 4

    x = jax.random.normal(kx, (N, inplanes, H, W), jnp.float32)
    params = init_bottleneck_params(kp, inplanes, planes)

    # row_tile=128 exercises a 4-step M grid at this toy size (use 1024+ for
    # real ResNet shapes).
    out = jax.block_until_ready(bottleneck_forward(x, params, row_tile=128))

    ref = reference_forward(x, params)
    np.testing.assert_allclose(np.asarray(out), np.asarray(ref),
                               rtol=5e-3, atol=5e-3)

    print("KERNEL_OK")
</pallas_src>

<mosaic_0001>
module attributes {stable_mosaic.version = 11 : i64} {
  func.func @stage1_kernel(%arg0: i32, %arg1: memref<128x16xf32, #tpu.memory_space<vmem>>, %arg2: memref<16x4xbf16, #tpu.memory_space<vmem>>, %arg3: memref<128x4xf32, #tpu.memory_space<vmem>>, %arg4: memref<1x2x4xf32, #tpu.memory_space<vmem>>) attributes {dimension_semantics = [#tpu.dimension_semantics<parallel>], iteration_bounds = array<i64: 4>, scalar_prefetch = 0 : i64, scratch_operands = 0 : i64, tpu.core_type = #tpu.core_type<tc>, window_params = [{transform_indices = @transform_0, window_bounds = array<i64: 128, 16>}, {pipeline_mode = #tpu.pipeline_mode<synchronous>, transform_indices = @transform_1, window_bounds = array<i64: 16, 4>}, {transform_indices = @transform_2, window_bounds = array<i64: 128, 4>}, {transform_indices = @transform_3, window_bounds = array<i64: 1, 2, 4>}]} {
    %c0 = arith.constant 0 : index
    %c0_0 = arith.constant 0 : index
    %0 = vector.load %arg1[%c0, %c0_0] : memref<128x16xf32, #tpu.memory_space<vmem>>, vector<128x16xf32>
    %1 = arith.truncf %0 : vector<128x16xf32> to vector<128x16xbf16>
    %c0_1 = arith.constant 0 : index
    %c0_2 = arith.constant 0 : index
    %2 = vector.load %arg2[%c0_1, %c0_2] : memref<16x4xbf16, #tpu.memory_space<vmem>>, vector<16x4xbf16>
    %cst = arith.constant dense<0.000000e+00> : vector<128x4xf32>
    %3 = tpu.matmul %1, %2, %cst {dimension_numbers = #tpu.dot_dimension_numbers<[1], [0], [0], [1], [0, 0, 1, 1], [], []>} : vector<128x16xbf16>, vector<16x4xbf16>, vector<128x4xf32> -> vector<128x4xf32>
    %c0_3 = arith.constant 0 : index
    %c0_4 = arith.constant 0 : index
    %4 = vector.load %arg3[%c0_3, %c0_4] : memref<128x4xf32, #tpu.memory_space<vmem>>, vector<128x4xf32>
    tpu.vector_store %arg3[%c0_3, %c0_4], %3 {strides = array<i32>} : memref<128x4xf32, #tpu.memory_space<vmem>>, vector<128x4xf32>,
    %cst_5 = arith.constant dense<0.000000e+00> : vector<4xf32>
    %5 = vector.multi_reduction <add>, %3, %cst_5 [0] : vector<128x4xf32> to vector<4xf32>
    %6 = vector.shape_cast %5 : vector<4xf32> to vector<1x4xf32>
    %c0_6 = arith.constant 0 : index
    %c0_7 = arith.constant 0 : index
    %c0_8 = arith.constant 0 : index
    %7 = vector.load %arg4[%c0_6, %c0_7, %c0_8] : memref<1x2x4xf32, #tpu.memory_space<vmem>>, vector<1x1x4xf32>
    %8 = vector.shape_cast %7 : vector<1x1x4xf32> to vector<1x4xf32>
    %9 = vector.shape_cast %6 : vector<1x4xf32> to vector<1x1x4xf32>
    tpu.vector_store %arg4[%c0_6, %c0_7, %c0_8], %9 {strides = array<i32>} : memref<1x2x4xf32, #tpu.memory_space<vmem>>, vector<1x1x4xf32>,
    %10 = arith.mulf %3, %3 : vector<128x4xf32>
    %cst_9 = arith.constant dense<0.000000e+00> : vector<4xf32>
    %11 = vector.multi_reduction <add>, %10, %cst_9 [0] : vector<128x4xf32> to vector<4xf32>
    %12 = vector.shape_cast %11 : vector<4xf32> to vector<1x4xf32>
    %c0_10 = arith.constant 0 : index
    %c1 = arith.constant 1 : index
    %c0_11 = arith.constant 0 : index
    %13 = vector.load %arg4[%c0_10, %c1, %c0_11] : memref<1x2x4xf32, #tpu.memory_space<vmem>>, vector<1x1x4xf32>
    %14 = vector.shape_cast %13 : vector<1x1x4xf32> to vector<1x4xf32>
    %15 = vector.shape_cast %12 : vector<1x4xf32> to vector<1x1x4xf32>
    tpu.vector_store %arg4[%c0_10, %c1, %c0_11], %15 {strides = array<i32>} : memref<1x2x4xf32, #tpu.memory_space<vmem>>, vector<1x1x4xf32>,
    return
  }
  func.func @transform_0(%arg0: i32) -> (i32, i32) {
    %c0_i32 = arith.constant 0 : i32
    %c0_i32_0 = arith.constant 0 : i32
    return %arg0, %c0_i32 : i32, i32
  }
  func.func @transform_1(%arg0: i32) -> (i32, i32) {
    %c0_i32 = arith.constant 0 : i32
    %c0_i32_0 = arith.constant 0 : i32
    %c0_i32_1 = arith.constant 0 : i32
    return %c0_i32, %c0_i32_0 : i32, i32
  }
  func.func @transform_2(%arg0: i32) -> (i32, i32) {
    %c0_i32 = arith.constant 0 : i32
    %c0_i32_0 = arith.constant 0 : i32
    return %arg0, %c0_i32 : i32, i32
  }
  func.func @transform_3(%arg0: i32) -> (i32, i32, i32) {
    %c0_i32 = arith.constant 0 : i32
    %c0_i32_0 = arith.constant 0 : i32
    %c0_i32_1 = arith.constant 0 : i32
    return %arg0, %c0_i32, %c0_i32_0 : i32, i32, i32
  }
}

module attributes {stable_mosaic.version = 11 : i64} {
  func.func @stage3_kernel(%arg0: i32, %arg1: memref<128x4xf32, #tpu.memory_space<vmem>>, %arg2: memref<1x4xf32, #tpu.memory_space<vmem>>, %arg3: memref<1x4xf32, #tpu.memory_space<vmem>>, %arg4: memref<4x16xbf16, #tpu.memory_space<vmem>>, %arg5: memref<1x2x16xf32, #tpu.memory_space<vmem>>) attributes {dimension_semantics = [#tpu.dimension_semantics<parallel>], iteration_bounds = array<i64: 4>, scalar_prefetch = 0 : i64, scratch_operands = 0 : i64, tpu.core_type = #tpu.core_type<tc>, window_params = [{transform_indices = @transform_0, window_bounds = array<i64: 128, 4>}, {pipeline_mode = #tpu.pipeline_mode<synchronous>, transform_indices = @transform_1, window_bounds = array<i64: 1, 4>}, {pipeline_mode = #tpu.pipeline_mode<synchronous>, transform_indices = @transform_2, window_bounds = array<i64: 1, 4>}, {pipeline_mode = #tpu.pipeline_mode<synchronous>, transform_indices = @transform_3, window_bounds = array<i64: 4, 16>}, {transform_indices = @transform_4, window_bounds = array<i64: 1, 2, 16>}]} {
    %c0 = arith.constant 0 : index
    %c0_0 = arith.constant 0 : index
    %0 = vector.load %arg1[%c0, %c0_0] : memref<128x4xf32, #tpu.memory_space<vmem>>, vector<128x4xf32>
    %c0_1 = arith.constant 0 : index
    %c0_2 = arith.constant 0 : index
    %1 = vector.load %arg2[%c0_1, %c0_2] : memref<1x4xf32, #tpu.memory_space<vmem>>, vector<1x4xf32>
    %2 = vector.broadcast %1 : vector<1x4xf32> to vector<128x4xf32>
    %3 = arith.mulf %0, %2 : vector<128x4xf32>
    %c0_3 = arith.constant 0 : index
    %c0_4 = arith.constant 0 : index
    %4 = vector.load %arg3[%c0_3, %c0_4] : memref<1x4xf32, #tpu.memory_space<vmem>>, vector<1x4xf32>
    %5 = vector.broadcast %4 : vector<1x4xf32> to vector<128x4xf32>
    %6 = arith.addf %3, %5 : vector<128x4xf32>
    %cst = arith.constant 0.000000e+00 : f32
    %7 = vector.broadcast %cst : f32 to vector<128x4xf32>
    %8 = arith.maximumf %6, %7 : vector<128x4xf32>
    %9 = arith.truncf %8 : vector<128x4xf32> to vector<128x4xbf16>
    %c0_5 = arith.constant 0 : index
    %c0_6 = arith.constant 0 : index
    %10 = vector.load %arg4[%c0_5, %c0_6] : memref<4x16xbf16, #tpu.memory_space<vmem>>, vector<4x16xbf16>
    %cst_7 = arith.constant dense<0.000000e+00> : vector<128x16xf32>
    %11 = tpu.matmul %9, %10, %cst_7 {dimension_numbers = #tpu.dot_dimension_numbers<[1], [0], [0], [1], [0, 0, 1, 1], [], []>} : vector<128x4xbf16>, vector<4x16xbf16>, vector<128x16xf32> -> vector<128x16xf32>
    %cst_8 = arith.constant dense<0.000000e+00> : vector<16xf32>
    %12 = vector.multi_reduction <add>, %11, %cst_8 [0] : vector<128x16xf32> to vector<16xf32>
    %13 = vector.shape_cast %12 : vector<16xf32> to vector<1x16xf32>
    %c0_9 = arith.constant 0 : index
    %c0_10 = arith.constant 0 : index
    %c0_11 = arith.constant 0 : index
    %14 = vector.load %arg5[%c0_9, %c0_10, %c0_11] : memref<1x2x16xf32, #tpu.memory_space<vmem>>, vector<1x1x16xf32>
    %15 = vector.shape_cast %14 : vector<1x1x16xf32> to vector<1x16xf32>
    %16 = vector.shape_cast %13 : vector<1x16xf32> to vector<1x1x16xf32>
    tpu.vector_store %arg5[%c0_9, %c0_10, %c0_11], %16 {strides = array<i32>} : memref<1x2x16xf32, #tpu.memory_space<vmem>>, vector<1x1x16xf32>,
    %17 = arith.mulf %11, %11 : vector<128x16xf32>
    %cst_12 = arith.constant dense<0.000000e+00> : vector<16xf32>
    %18 = vector.multi_reduction <add>, %17, %cst_12 [0] : vector<128x16xf32> to vector<16xf32>
    %19 = vector.shape_cast %18 : vector<16xf32> to vector<1x16xf32>
    %c0_13 = arith.constant 0 : index
    %c1 = arith.constant 1 : index
    %c0_14 = arith.constant 0 : index
    %20 = vector.load %arg5[%c0_13, %c1, %c0_14] : memref<1x2x16xf32, #tpu.memory_space<vmem>>, vector<1x1x16xf32>
    %21 = vector.shape_cast %20 : vector<1x1x16xf32> to vector<1x16xf32>
    %22 = vector.shape_cast %19 : vector<1x16xf32> to vector<1x1x16xf32>
    tpu.vector_store %arg5[%c0_13, %c1, %c0_14], %22 {strides = array<i32>} : memref<1x2x16xf32, #tpu.memory_space<vmem>>, vector<1x1x16xf32>,
    return
  }
  func.func @transform_0(%arg0: i32) -> (i32, i32) {
    %c0_i32 = arith.constant 0 : i32
    %c0_i32_0 = arith.constant 0 : i32
    return %arg0, %c0_i32 : i32, i32
  }
  func.func @transform_1(%arg0: i32) -> (i32, i32) {
    %c0_i32 = arith.constant 0 : i32
    %c0_i32_0 = arith.constant 0 : i32
    %c0_i32_1 = arith.constant 0 : i32
    return %c0_i32, %c0_i32_0 : i32, i32
  }
  func.func @transform_2(%arg0: i32) -> (i32, i32) {
    %c0_i32 = arith.constant 0 : i32
    %c0_i32_0 = arith.constant 0 : i32
    %c0_i32_1 = arith.constant 0 : i32
    return %c0_i32, %c0_i32_0 : i32, i32
  }
  func.func @transform_3(%arg0: i32) -> (i32, i32) {
    %c0_i32 = arith.constant 0 : i32
    %c0_i32_0 = arith.constant 0 : i32
    %c0_i32_1 = arith.constant 0 : i32
    return %c0_i32, %c0_i32_0 : i32, i32
  }
  func.func @transform_4(%arg0: i32) -> (i32, i32, i32) {
    %c0_i32 = arith.constant 0 : i32
    %c0_i32_0 = arith.constant 0 : i32
    %c0_i32_1 = arith.constant 0 : i32
    return %arg0, %c0_i32, %c0_i32_0 : i32, i32, i32
  }
}

module attributes {stable_mosaic.version = 11 : i64} {
  func.func @stage2_kernel(%arg0: i32, %arg1: memref<1x18x18x4xf32, #tpu.memory_space<vmem>>, %arg2: memref<18x18x1xf32, #tpu.memory_space<vmem>>, %arg3: memref<36x4xbf16, #tpu.memory_space<vmem>>, %arg4: memref<1x4xf32, #tpu.memory_space<vmem>>, %arg5: memref<1x4xf32, #tpu.memory_space<vmem>>, %arg6: memref<1x16x16x4xf32, #tpu.memory_space<vmem>>, %arg7: memref<1x2x4xf32, #tpu.memory_space<vmem>>, %arg8: memref<18x18x4xf32, #tpu.memory_space<vmem>>, %arg9: memref<16x16x36xf32, #tpu.memory_space<vmem>>) attributes {dimension_semantics = [#tpu.dimension_semantics<parallel>], iteration_bounds = array<i64: 2>, scalar_prefetch = 0 : i64, scratch_operands = 2 : i64, tpu.core_type = #tpu.core_type<tc>, window_params = [{transform_indices = @transform_0, window_bounds = array<i64: 1, 18, 18, 4>}, {pipeline_mode = #tpu.pipeline_mode<synchronous>, transform_indices = @transform_1, window_bounds = array<i64: 18, 18, 1>}, {pipeline_mode = #tpu.pipeline_mode<synchronous>, transform_indices = @transform_2, window_bounds = array<i64: 36, 4>}, {pipeline_mode = #tpu.pipeline_mode<synchronous>, transform_indices = @transform_3, window_bounds = array<i64: 1, 4>}, {pipeline_mode = #tpu.pipeline_mode<synchronous>, transform_indices = @transform_4, window_bounds = array<i64: 1, 4>}, {transform_indices = @transform_5, window_bounds = array<i64: 1, 16, 16, 4>}, {transform_indices = @transform_6, window_bounds = array<i64: 1, 2, 4>}]} {
    %c0 = arith.constant 0 : index
    %c0_0 = arith.constant 0 : index
    %c0_1 = arith.constant 0 : index
    %c0_2 = arith.constant 0 : index
    %0 = vector.load %arg1[%c0, %c0_0, %c0_1, %c0_2] : memref<1x18x18x4xf32, #tpu.memory_space<vmem>>, vector<1x18x18x4xf32>
    %1 = vector.shape_cast %0 : vector<1x18x18x4xf32> to vector<18x18x4xf32>
    %c0_3 = arith.constant 0 : index
    %c0_4 = arith.constant 0 : index
    %2 = vector.load %arg4[%c0_3, %c0_4] : memref<1x4xf32, #tpu.memory_space<vmem>>, vector<1x4xf32>
    %3 = vector.shape_cast %2 : vector<1x4xf32> to vector<1x1x4xf32>
    %4 = vector.broadcast %3 : vector<1x1x4xf32> to vector<18x18x4xf32>
    %5 = arith.mulf %1, %4 : vector<18x18x4xf32>
    %c0_5 = arith.constant 0 : index
    %c0_6 = arith.constant 0 : index
    %6 = vector.load %arg5[%c0_5, %c0_6] : memref<1x4xf32, #tpu.memory_space<vmem>>, vector<1x4xf32>
    %7 = vector.shape_cast %6 : vector<1x4xf32> to vector<1x1x4xf32>
    %8 = vector.broadcast %7 : vector<1x1x4xf32> to vector<18x18x4xf32>
    %9 = arith.addf %5, %8 : vector<18x18x4xf32>
    %cst = arith.constant 0.000000e+00 : f32
    %10 = vector.broadcast %cst : f32 to vector<18x18x4xf32>
    %11 = arith.maximumf %9, %10 : vector<18x18x4xf32>
    %c0_7 = arith.constant 0 : index
    %c0_8 = arith.constant 0 : index
    %c0_9 = arith.constant 0 : index
    %12 = vector.load %arg2[%c0_7, %c0_8, %c0_9] : memref<18x18x1xf32, #tpu.memory_space<vmem>>, vector<18x18x1xf32>
    %13 = vector.broadcast %12 : vector<18x18x1xf32> to vector<18x18x4xf32>
    %14 = arith.mulf %11, %13 : vector<18x18x4xf32>
    %c0_10 = arith.constant 0 : index
    %c0_11 = arith.constant 0 : index
    %c0_12 = arith.constant 0 : index
    %15 = vector.load %arg8[%c0_10, %c0_11, %c0_12] : memref<18x18x4xf32, #tpu.memory_space<vmem>>, vector<18x18x4xf32>
    tpu.vector_store %arg8[%c0_10, %c0_11, %c0_12], %14 {strides = array<i32>} : memref<18x18x4xf32, #tpu.memory_space<vmem>>, vector<18x18x4xf32>,
    %c0_13 = arith.constant 0 : index
    %c0_14 = arith.constant 0 : index
    %c0_15 = arith.constant 0 : index
    %16 = vector.load %arg8[%c0_13, %c0_14, %c0_15] : memref<18x18x4xf32, #tpu.memory_space<vmem>>, vector<16x16x4xf32>
    %c0_16 = arith.constant 0 : index
    %c0_17 = arith.constant 0 : index
    %c0_18 = arith.constant 0 : index
    %17 = vector.load %arg9[%c0_16, %c0_17, %c0_18] : memref<16x16x36xf32, #tpu.memory_space<vmem>>, vector<16x16x4xf32>
    tpu.vector_store %arg9[%c0_16, %c0_17, %c0_18], %16 {strides = array<i32>} : memref<16x16x36xf32, #tpu.memory_space<vmem>>, vector<16x16x4xf32>,
    %c0_19 = arith.constant 0 : index
    %c1 = arith.constant 1 : index
    %c0_20 = arith.constant 0 : index
    %18 = vector.load %arg8[%c0_19, %c1, %c0_20] : memref<18x18x4xf32, #tpu.memory_space<vmem>>, vector<16x16x4xf32>
    %c0_21 = arith.constant 0 : index
    %c0_22 = arith.constant 0 : index
    %c4 = arith.constant 4 : index
    %19 = vector.load %arg9[%c0_21, %c0_22, %c4] : memref<16x16x36xf32, #tpu.memory_space<vmem>>, vector<16x16x4xf32>
    tpu.vector_store %arg9[%c0_21, %c0_22, %c4], %18 {strides = array<i32>} : memref<16x16x36xf32, #tpu.memory_space<vmem>>, vector<16x16x4xf32>,
    %c0_23 = arith.constant 0 : index
    %c2 = arith.constant 2 : index
    %c0_24 = arith.constant 0 : index
    %20 = vector.load %arg8[%c0_23, %c2, %c0_24] : memref<18x18x4xf32, #tpu.memory_space<vmem>>, vector<16x16x4xf32>
    %c0_25 = arith.constant 0 : index
    %c0_26 = arith.constant 0 : index
    %c8 = arith.constant 8 : index
    %21 = vector.load %arg9[%c0_25, %c0_26, %c8] : memref<16x16x36xf32, #tpu.memory_space<vmem>>, vector<16x16x4xf32>
    tpu.vector_store %arg9[%c0_25, %c0_26, %c8], %20 {strides = array<i32>} : memref<16x16x36xf32, #tpu.memory_space<vmem>>, vector<16x16x4xf32>,
    %c1_27 = arith.constant 1 : index
    %c0_28 = arith.constant 0 : index
    %c0_29 = arith.constant 0 : index
    %22 = vector.load %arg8[%c1_27, %c0_28, %c0_29] : memref<18x18x4xf32, #tpu.memory_space<vmem>>, vector<16x16x4xf32>
    %c0_30 = arith.constant 0 : index
    %c0_31 = arith.constant 0 : index
    %c12 = arith.constant 12 : index
    %23 = vector.load %arg9[%c0_30, %c0_31, %c12] : memref<16x16x36xf32, #tpu.memory_space<vmem>>, vector<16x16x4xf32>
    tpu.vector_store %arg9[%c0_30, %c0_31, %c12], %22 {strides = array<i32>} : memref<16x16x36xf32, #tpu.memory_space<vmem>>, vector<16x16x4xf32>,
    %c1_32 = arith.constant 1 : index
    %c1_33 = arith.constant 1 : index
    %c0_34 = arith.constant 0 : index
    %24 = vector.load %arg8[%c1_32, %c1_33, %c0_34] : memref<18x18x4xf32, #tpu.memory_space<vmem>>, vector<16x16x4xf32>
    %c0_35 = arith.constant 0 : index
    %c0_36 = arith.constant 0 : index
    %c16 = arith.constant 16 : index
    %25 = vector.load %arg9[%c0_35, %c0_36, %c16] : memref<16x16x36xf32, #tpu.memory_space<vmem>>, vector<16x16x4xf32>
    tpu.vector_store %arg9[%c0_35, %c0_36, %c16], %24 {strides = array<i32>} : memref<16x16x36xf32, #tpu.memory_space<vmem>>, vector<16x16x4xf32>,
    %c1_37 = arith.constant 1 : index
    %c2_38 = arith.constant 2 : index
    %c0_39 = arith.constant 0 : index
    %26 = vector.load %arg8[%c1_37, %c2_38, %c0_39] : memref<18x18x4xf32, #tpu.memory_space<vmem>>, vector<16x16x4xf32>
    %c0_40 = arith.constant 0 : index
    %c0_41 = arith.constant 0 : index
    %c20 = arith.constant 20 : index
    %27 = vector.load %arg9[%c0_40, %c0_41, %c20] : memref<16x16x36xf32, #tpu.memory_space<vmem>>, vector<16x16x4xf32>
    tpu.vector_store %arg9[%c0_40, %c0_41, %c20], %26 {strides = array<i32>} : memref<16x16x36xf32, #tpu.memory_space<vmem>>, vector<16x16x4xf32>,
    %c2_42 = arith.constant 2 : index
    %c0_43 = arith.constant 0 : index
    %c0_44 = arith.constant 0 : index
    %28 = vector.load %arg8[%c2_42, %c0_43, %c0_44] : memref<18x18x4xf32, #tpu.memory_space<vmem>>, vector<16x16x4xf32>
    %c0_45 = arith.constant 0 : index
    %c0_46 = arith.constant 0 : index
    %c24 = arith.constant 24 : index
    %29 = vector.load %arg9[%c0_45, %c0_46, %c24] : memref<16x16x36xf32, #tpu.memory_space<vmem>>, vector<16x16x4xf32>
    tpu.vector_store %arg9[%c0_45, %c0_46, %c24], %28 {strides = array<i32>} : memref<16x16x36xf32, #tpu.memory_space<vmem>>, vector<16x16x4xf32>,
    %c2_47 = arith.constant 2 : index
    %c1_48 = arith.constant 1 : index
    %c0_49 = arith.constant 0 : index
    %30 = vector.load %arg8[%c2_47, %c1_48, %c0_49] : memref<18x18x4xf32, #tpu.memory_space<vmem>>, vector<16x16x4xf32>
    %c0_50 = arith.constant 0 : index
    %c0_51 = arith.constant 0 : index
    %c28 = arith.constant 28 : index
    %31 = vector.load %arg9[%c0_50, %c0_51, %c28] : memref<16x16x36xf32, #tpu.memory_space<vmem>>, vector<16x16x4xf32>
    tpu.vector_store %arg9[%c0_50, %c0_51, %c28], %30 {strides = array<i32>} : memref<16x16x36xf32, #tpu.memory_space<vmem>>, vector<16x16x4xf32>,
    %c2_52 = arith.constant 2 : index
    %c2_53 = arith.constant 2 : index
    %c0_54 = arith.constant 0 : index
    %32 = vector.load %arg8[%c2_52, %c2_53, %c0_54] : memref<18x18x4xf32, #tpu.memory_space<vmem>>, vector<16x16x4xf32>
    %c0_55 = arith.constant 0 : index
    %c0_56 = arith.constant 0 : index
    %c32 = arith.constant 32 : index
    %33 = vector.load %arg9[%c0_55, %c0_56, %c32] : memref<16x16x36xf32, #tpu.memory_space<vmem>>, vector<16x16x4xf32>
    tpu.vector_store %arg9[%c0_55, %c0_56, %c32], %32 {strides = array<i32>} : memref<16x16x36xf32, #tpu.memory_space<vmem>>, vector<16x16x4xf32>,
    %c0_57 = arith.constant 0 : index
    %c0_58 = arith.constant 0 : index
    %c0_59 = arith.constant 0 : index
    %34 = vector.load %arg9[%c0_57, %c0_58, %c0_59] : memref<16x16x36xf32, #tpu.memory_space<vmem>>, vector<16x16x36xf32>
    %35 = vector.shape_cast %34 : vector<16x16x36xf32> to vector<256x36xf32>
    %36 = arith.truncf %35 : vector<256x36xf32> to vector<256x36xbf16>
    %c0_60 = arith.constant 0 : index
    %c0_61 = arith.constant 0 : index
    %37 = vector.load %arg3[%c0_60, %c0_61] : memref<36x4xbf16, #tpu.memory_space<vmem>>, vector<36x4xbf16>
    %cst_62 = arith.constant dense<0.000000e+00> : vector<256x4xf32>
    %38 = tpu.matmul %36, %37, %cst_62 {dimension_numbers = #tpu.dot_dimension_numbers<[1], [0], [0], [1], [0, 0, 1, 1], [], []>} : vector<256x36xbf16>, vector<36x4xbf16>, vector<256x4xf32> -> vector<256x4xf32>
    %39 = vector.shape_cast %38 : vector<256x4xf32> to vector<16x16x4xf32>
    %c0_63 = arith.constant 0 : index
    %c0_64 = arith.constant 0 : index
    %c0_65 = arith.constant 0 : index
    %c0_66 = arith.constant 0 : index
    %40 = vector.load %arg6[%c0_63, %c0_64, %c0_65, %c0_66] : memref<1x16x16x4xf32, #tpu.memory_space<vmem>>, vector<1x16x16x4xf32>
    %41 = vector.shape_cast %40 : vector<1x16x16x4xf32> to vector<16x16x4xf32>
    %42 = vector.shape_cast %39 : vector<16x16x4xf32> to vector<1x16x16x4xf32>
    tpu.vector_store %arg6[%c0_63, %c0_64, %c0_65, %c0_66], %42 {strides = array<i32>} : memref<1x16x16x4xf32, #tpu.memory_space<vmem>>, vector<1x16x16x4xf32>,
    %cst_67 = arith.constant dense<0.000000e+00> : vector<4xf32>
    %43 = vector.multi_reduction <add>, %38, %cst_67 [0] : vector<256x4xf32> to vector<4xf32>
    %44 = vector.shape_cast %43 : vector<4xf32> to vector<1x4xf32>
    %c0_68 = arith.constant 0 : index
    %c0_69 = arith.constant 0 : index
    %c0_70 = arith.constant 0 : index
    %45 = vector.load %arg7[%c0_68, %c0_69, %c0_70] : memref<1x2x4xf32, #tpu.memory_space<vmem>>, vector<1x1x4xf32>
    %46 = vector.shape_cast %45 : vector<1x1x4xf32> to vector<1x4xf32>
    %47 = vector.shape_cast %44 : vector<1x4xf32> to vector<1x1x4xf32>
    tpu.vector_store %arg7[%c0_68, %c0_69, %c0_70], %47 {strides = array<i32>} : memref<1x2x4xf32, #tpu.memory_space<vmem>>, vector<1x1x4xf32>,
    %48 = arith.mulf %38, %38 : vector<256x4xf32>
    %cst_71 = arith.constant dense<0.000000e+00> : vector<4xf32>
    %49 = vector.multi_reduction <add>, %48, %cst_71 [0] : vector<256x4xf32> to vector<4xf32>
    %50 = vector.shape_cast %49 : vector<4xf32> to vector<1x4xf32>
    %c0_72 = arith.constant 0 : index
    %c1_73 = arith.constant 1 : index
    %c0_74 = arith.constant 0 : index
    %51 = vector.load %arg7[%c0_72, %c1_73, %c0_74] : memref<1x2x4xf32, #tpu.memory_space<vmem>>, vector<1x1x4xf32>
    %52 = vector.shape_cast %51 : vector<1x1x4xf32> to vector<1x4xf32>
    %53 = vector.shape_cast %50 : vector<1x4xf32> to vector<1x1x4xf32>
    tpu.vector_store %arg7[%c0_72, %c1_73, %c0_74], %53 {strides = array<i32>} : memref<1x2x4xf32, #tpu.memory_space<vmem>>, vector<1x1x4xf32>,
    return
  }
  func.func @transform_0(%arg0: i32) -> (i32, i32, i32, i32) {
    %c0_i32 = arith.constant 0 : i32
    %c0_i32_0 = arith.constant 0 : i32
    %c0_i32_1 = arith.constant 0 : i32
    %c0_i32_2 = arith.constant 0 : i32
    return %arg0, %c0_i32, %c0_i32_0, %c0_i32_1 : i32, i32, i32, i32
  }
  func.func @transform_1(%arg0: i32) -> (i32, i32, i32) {
    %c0_i32 = arith.constant 0 : i32
    %c0_i32_0 = arith.constant 0 : i32
    %c0_i32_1 = arith.constant 0 : i32
    %c0_i32_2 = arith.constant 0 : i32
    return %c0_i32, %c0_i32_0, %c0_i32_1 : i32, i32, i32
  }
  func.func @transform_2(%arg0: i32) -> (i32, i32) {
    %c0_i32 = arith.constant 0 : i32
    %c0_i32_0 = arith.constant 0 : i32
    %c0_i32_1 = arith.constant 0 : i32
    return %c0_i32, %c0_i32_0 : i32, i32
  }
  func.func @transform_3(%arg0: i32) -> (i32, i32) {
    %c0_i32 = arith.constant 0 : i32
    %c0_i32_0 = arith.constant 0 : i32
    %c0_i32_1 = arith.constant 0 : i32
    return %c0_i32, %c0_i32_0 : i32, i32
  }
  func.func @transform_4(%arg0: i32) -> (i32, i32) {
    %c0_i32 = arith.constant 0 : i32
    %c0_i32_0 = arith.constant 0 : i32
    %c0_i32_1 = arith.constant 0 : i32
    return %c0_i32, %c0_i32_0 : i32, i32
  }
  func.func @transform_5(%arg0: i32) -> (i32, i32, i32, i32) {
    %c0_i32 = arith.constant 0 : i32
    %c0_i32_0 = arith.constant 0 : i32
    %c0_i32_1 = arith.constant 0 : i32
    %c0_i32_2 = arith.constant 0 : i32
    return %arg0, %c0_i32, %c0_i32_0, %c0_i32_1 : i32, i32, i32, i32
  }
  func.func @transform_6(%arg0: i32) -> (i32, i32, i32) {
    %c0_i32 = arith.constant 0 : i32
    %c0_i32_0 = arith.constant 0 : i32
    %c0_i32_1 = arith.constant 0 : i32
    return %arg0, %c0_i32, %c0_i32_0 : i32, i32, i32
  }
}

module attributes {stable_mosaic.version = 11 : i64} {
  func.func @stage4_kernel(%arg0: i32, %arg1: memref<128x4xf32, #tpu.memory_space<vmem>>, %arg2: memref<128x16xf32, #tpu.memory_space<vmem>>, %arg3: memref<1x4xf32, #tpu.memory_space<vmem>>, %arg4: memref<1x4xf32, #tpu.memory_space<vmem>>, %arg5: memref<4x16xbf16, #tpu.memory_space<vmem>>, %arg6: memref<1x16xf32, #tpu.memory_space<vmem>>, %arg7: memref<1x16xf32, #tpu.memory_space<vmem>>, %arg8: memref<128x16xf32, #tpu.memory_space<vmem>>) attributes {dimension_semantics = [#tpu.dimension_semantics<parallel>], iteration_bounds = array<i64: 4>, scalar_prefetch = 0 : i64, scratch_operands = 0 : i64, tpu.core_type = #tpu.core_type<tc>, window_params = [{transform_indices = @transform_0, window_bounds = array<i64: 128, 4>}, {transform_indices = @transform_1, window_bounds = array<i64: 128, 16>}, {pipeline_mode = #tpu.pipeline_mode<synchronous>, transform_indices = @transform_2, window_bounds = array<i64: 1, 4>}, {pipeline_mode = #tpu.pipeline_mode<synchronous>, transform_indices = @transform_3, window_bounds = array<i64: 1, 4>}, {pipeline_mode = #tpu.pipeline_mode<synchronous>, transform_indices = @transform_4, window_bounds = array<i64: 4, 16>}, {pipeline_mode = #tpu.pipeline_mode<synchronous>, transform_indices = @transform_5, window_bounds = array<i64: 1, 16>}, {pipeline_mode = #tpu.pipeline_mode<synchronous>, transform_indices = @transform_6, window_bounds = array<i64: 1, 16>}, {transform_indices = @transform_7, window_bounds = array<i64: 128, 16>}]} {
    %c0 = arith.constant 0 : index
    %c0_0 = arith.constant 0 : index
    %0 = vector.load %arg1[%c0, %c0_0] : memref<128x4xf32, #tpu.memory_space<vmem>>, vector<128x4xf32>
    %c0_1 = arith.constant 0 : index
    %c0_2 = arith.constant 0 : index
    %1 = vector.load %arg3[%c0_1, %c0_2] : memref<1x4xf32, #tpu.memory_space<vmem>>, vector<1x4xf32>
    %2 = vector.broadcast %1 : vector<1x4xf32> to vector<128x4xf32>
    %3 = arith.mulf %0, %2 : vector<128x4xf32>
    %c0_3 = arith.constant 0 : index
    %c0_4 = arith.constant 0 : index
    %4 = vector.load %arg4[%c0_3, %c0_4] : memref<1x4xf32, #tpu.memory_space<vmem>>, vector<1x4xf32>
    %5 = vector.broadcast %4 : vector<1x4xf32> to vector<128x4xf32>
    %6 = arith.addf %3, %5 : vector<128x4xf32>
    %cst = arith.constant 0.000000e+00 : f32
    %7 = vector.broadcast %cst : f32 to vector<128x4xf32>
    %8 = arith.maximumf %6, %7 : vector<128x4xf32>
    %9 = arith.truncf %8 : vector<128x4xf32> to vector<128x4xbf16>
    %c0_5 = arith.constant 0 : index
    %c0_6 = arith.constant 0 : index
    %10 = vector.load %arg5[%c0_5, %c0_6] : memref<4x16xbf16, #tpu.memory_space<vmem>>, vector<4x16xbf16>
    %cst_7 = arith.constant dense<0.000000e+00> : vector<128x16xf32>
    %11 = tpu.matmul %9, %10, %cst_7 {dimension_numbers = #tpu.dot_dimension_numbers<[1], [0], [0], [1], [0, 0, 1, 1], [], []>} : vector<128x4xbf16>, vector<4x16xbf16>, vector<128x16xf32> -> vector<128x16xf32>
    %c0_8 = arith.constant 0 : index
    %c0_9 = arith.constant 0 : index
    %12 = vector.load %arg6[%c0_8, %c0_9] : memref<1x16xf32, #tpu.memory_space<vmem>>, vector<1x16xf32>
    %13 = vector.broadcast %12 : vector<1x16xf32> to vector<128x16xf32>
    %14 = arith.mulf %11, %13 : vector<128x16xf32>
    %c0_10 = arith.constant 0 : index
    %c0_11 = arith.constant 0 : index
    %15 = vector.load %arg7[%c0_10, %c0_11] : memref<1x16xf32, #tpu.memory_space<vmem>>, vector<1x16xf32>
    %16 = vector.broadcast %15 : vector<1x16xf32> to vector<128x16xf32>
    %17 = arith.addf %14, %16 : vector<128x16xf32>
    %c0_12 = arith.constant 0 : index
    %c0_13 = arith.constant 0 : index
    %18 = vector.load %arg2[%c0_12, %c0_13] : memref<128x16xf32, #tpu.memory_space<vmem>>, vector<128x16xf32>
    %19 = arith.addf %17, %18 : vector<128x16xf32>
    %cst_14 = arith.constant 0.000000e+00 : f32
    %20 = vector.broadcast %cst_14 : f32 to vector<128x16xf32>
    %21 = arith.maximumf %19, %20 : vector<128x16xf32>
    %c0_15 = arith.constant 0 : index
    %c0_16 = arith.constant 0 : index
    %22 = vector.load %arg8[%c0_15, %c0_16] : memref<128x16xf32, #tpu.memory_space<vmem>>, vector<128x16xf32>
    tpu.vector_store %arg8[%c0_15, %c0_16], %21 {strides = array<i32>} : memref<128x16xf32, #tpu.memory_space<vmem>>, vector<128x16xf32>,
    return
  }
  func.func @transform_0(%arg0: i32) -> (i32, i32) {
    %c0_i32 = arith.constant 0 : i32
    %c0_i32_0 = arith.constant 0 : i32
    return %arg0, %c0_i32 : i32, i32
  }
  func.func @transform_1(%arg0: i32) -> (i32, i32) {
    %c0_i32 = arith.constant 0 : i32
    %c0_i32_0 = arith.constant 0 : i32
    return %arg0, %c0_i32 : i32, i32
  }
  func.func @transform_2(%arg0: i32) -> (i32, i32) {
    %c0_i32 = arith.constant 0 : i32
    %c0_i32_0 = arith.constant 0 : i32
    %c0_i32_1 = arith.constant 0 : i32
    return %c0_i32, %c0_i32_0 : i32, i32
  }
  func.func @transform_3(%arg0: i32) -> (i32, i32) {
    %c0_i32 = arith.constant 0 : i32
    %c0_i32_0 = arith.constant 0 : i32
    %c0_i32_1 = arith.constant 0 : i32
    return %c0_i32, %c0_i32_0 : i32, i32
  }
  func.func @transform_4(%arg0: i32) -> (i32, i32) {
    %c0_i32 = arith.constant 0 : i32
    %c0_i32_0 = arith.constant 0 : i32
    %c0_i32_1 = arith.constant 0 : i32
    return %c0_i32, %c0_i32_0 : i32, i32
  }
  func.func @transform_5(%arg0: i32) -> (i32, i32) {
    %c0_i32 = arith.constant 0 : i32
    %c0_i32_0 = arith.constant 0 : i32
    %c0_i32_1 = arith.constant 0 : i32
    return %c0_i32, %c0_i32_0 : i32, i32
  }
  func.func @transform_6(%arg0: i32) -> (i32, i32) {
    %c0_i32 = arith.constant 0 : i32
    %c0_i32_0 = arith.constant 0 : i32
    %c0_i32_1 = arith.constant 0 : i32
    return %c0_i32, %c0_i32_0 : i32, i32
  }
  func.func @transform_7(%arg0: i32) -> (i32, i32) {
    %c0_i32 = arith.constant 0 : i32
    %c0_i32_0 = arith.constant 0 : i32
    return %arg0, %c0_i32 : i32, i32
  }
}

</mosaic_0001>

<bundles_post_ra>
// kernel: bottleneck_forward.4
= control target key start
LH: loop header
LB: loop body
LE: loop exit
PB: predicated region body
PF: predicated region fallthrough
CT: control target
= control target key end

     0   :  { %s624_s12 = smov 0   ;;  %s745_s0 = inlined_call_operand.vmem [shape: f32[512,16], index: 0, kind: input, shape index: {}]   ;;  %s746_s1 = inlined_call_operand.vmem [shape: bf16[16,4], index: 1, kind: input, shape index: {}]   ;;  %s747_s2 = inlined_call_operand.vmem [shape: f32[512,4], index: 2, kind: output, shape index: {0}]   ;;  %s748_s3 = inlined_call_operand.vmem [shape: f32[4,2,4], index: 3, kind: output, shape index: {1}]  }
   0x1 LB: > { %s630_s13 = sadd.s32 4294967295, %s602_s12   ;;  %p541_p0 = scmp.ge.s32.totalorder %s602_s12, 1  ;;  %s602_s12 = sphi %s624_s12, %s14_s12  }
   0x2   : > { %p141_p1 = scmp.lt.s32.totalorder %s602_s12, 5 }
   0x4   : > { %p142_p2 = pnand %p541_p0, %p141_p1 }
   0x5   : > { %v595_v0 = vld [vmem:[%s746_s1] sm:$0xff] (!%p142_p2)   ;;  %s542_s16 = sshll.u32 (!%p142_p2), %s630_s13, 4  ;;  %vm218_vm0 = vcmask (!%p142_p2), 130048   ;;  %vm340_vm1 = vcmask (!%p142_p2), 31744   ;;  %p181_p4 = scmp.lt.s32.totalorder (!%p142_p2), %s630_s13, 3  ;;  %vm394_vm2 = vcmask (!%p142_p2), 24576  }
   0x6   : > { %145 = sbr.rel (%p142_p2) target bundleno = 281 (0x119), region = 28  ;;  %p170_p3 = scmp.lt.s32.totalorder (!%p142_p2), %s542_s16, 63  ;;  %567 = vmatprep.subr.bf16.mxu0 (!%p142_p2), %v595_v0  ;;  %585 = vmatprep.subr.bf16.mxu1 (!%p142_p2), %v595_v0 }
   0x7   : > { %568 = vmatpush3.bf16.msra.mxu0 (!%p142_p2), %v595_v0  ;;  %586 = vmatpush3.bf16.msra.mxu1 (!%p142_p2), %v595_v0 }
   0xd   : > { %s750_s16 = smov (!%p170_p3, %s542_s16), 63  ;;  %s752_s13 = smov (!%p181_p4, %s630_s13), 3 }
   0xe   : > { %s543_s17 = sshll.u32 %s750_s16, 3  ;;  %s546_s24 = sshll.u32 %s752_s13, 1 }
   0xf   : > { %s173_s20 = scalar_lea.vmem %s745_s0, %s543_s17  ;;  %s659_s23 = scalar_lea.vmem %s747_s2, %s543_s17 }
  0x10   : > { %v186_v1 = vld [vmem:[%s173_s20] sm:$0xff]  ;;  %v187_v2 = vld [vmem:[%s173_s20 + $0x8] sm:$0xff]  ;;  %v188_v3 = vld [vmem:[%s173_s20 + $0x10] sm:$0xff]  ;;  %s184_s27 = scalar_lea.vmem %s748_s3, %s546_s24 }
  0x11   : > { %v202_v4 = vpack.c.bf16 %v187_v2, %v186_v1  ;;  %v189_v5 = vld [vmem:[%s173_s20 + $0x18] sm:$0xff]  ;;  %v190_v6 = vld [vmem:[%s173_s20 + $0x20] sm:$0xff]  ;;  %v191_v7 = vld [vmem:[%s173_s20 + $0x28] sm:$0xff] }
  0x12   : > { %v203_v8 = vpack.c.bf16 %v189_v5, %v188_v3  ;;  %v204_v9 = vpack.c.bf16 %v191_v7, %v190_v6  ;;  %v194_v10 = vld [vmem:[%s173_s20 + $0x40] sm:$0xff]  ;;  %v195_v11 = vld [vmem:[%s173_s20 + $0x48] sm:$0xff]  ;;  %v196_v12 = vld [vmem:[%s173_s20 + $0x50] sm:$0xff] }
  0x13   : > { %569 = vmatprep.mubr.msk.bf16.mxu0 %vm218_vm0, %v202_v4  ;;  %v197_v13 = vld [vmem:[%s173_s20 + $0x58] sm:$0xff]  ;;  %v206_v14 = vpack.c.bf16 %v195_v11, %v194_v10  ;;  %v198_v16 = vld [vmem:[%s173_s20 + $0x60] sm:$0xff]  ;;  %v199_v17 = vld [vmem:[%s173_s20 + $0x68] sm:$0xff] }
  0x14   : > { %570 = vmatmul.mubr.msk.bf16.vlgmr.msra.gmra.mrb[0].mxu0 %vm218_vm0, %v203_v8  ;;  %v207_v15 = vpack.c.bf16 %v197_v13, %v196_v12  ;;  %v192_v18 = vld [vmem:[%s173_s20 + $0x30] sm:$0xff]  ;;  %v193_v19 = vld [vmem:[%s173_s20 + $0x38] sm:$0xff]  ;;  %v208_v20 = vpack.c.bf16 %v199_v17, %v198_v16 }
  0x15   : > { %573 = vmatprep.mubr.msk.bf16.mxu0 %vm218_vm0, %v204_v9  ;;  %577 = vmatprep.mubr.msk.bf16.mxu1 %vm218_vm0, %v206_v14  ;;  %v205_v21 = vpack.c.bf16 %v193_v19, %v192_v18  ;;  %v200_v22 = vld [vmem:[%s173_s20 + $0x70] sm:$0xff]  ;;  %v201_v23 = vld [vmem:[%s173_s20 + $0x78] sm:$0xff] }
  0x16   : > { %578 = vmatmul.mubr.msk.bf16.vlgmr.msra.gmra.mrb[0].mxu1 %vm218_vm0, %v207_v15  ;;  %v209_v24 = vpack.c.bf16 %v201_v23, %v200_v22 }
  0x17   : > { %581 = vmatprep.mubr.msk.bf16.mxu1 %vm218_vm0, %v208_v20 }
  0x1c   : > { %574 = vmatmul.mubr.msk.bf16.gmra.mrb[4].mxu0 %vm218_vm0, %v205_v21 }
  0x1e   : > { %582 = vmatmul.mubr.msk.bf16.gmra.mrb[4].mxu1 %vm218_vm0, %v209_v24 }
  0xe7   : > { %v571_v25 = vpop.f32.mrb[0].mxu0 }
  0xe8   : > { %343 = vst.msk [vmem:[%s659_s23 + $0x10] sm:$0xff] %vm340_vm1, %v571_v25  ;;  %v277_v26 = vpop.f32.mrb[1].mxu0  ;;  %v398_v31 = vmul.f32 %v571_v25, %v571_v25  ;;  %v360_v38 = vsel %vm340_vm1, %v571_v25, 0.0 }
  0xe9   : > { %341 = vst.msk [vmem:[%s659_s23] sm:$0xff] %vm340_vm1, %v277_v26  ;;  %v396_v27 = vmul.f32 %v277_v26, %v277_v26  ;;  %v572_v28 = vpop.f32.mrb[2].mxu0  ;;  %v667_v30 = vpop.f32.mrb[0].mxu1  ;;  %v357_v32 = vsel %vm340_vm1, %v277_v26, 0.0 }
  0xea   : > { %344 = vst.msk [vmem:[%s659_s23 + $0x18] sm:$0xff] %vm340_vm1, %v572_v28  ;;  %v280_v29 = vpop.f32.mrb[3].mxu0  ;;  %351 = vst.msk [vmem:[%s659_s23 + $0x50] sm:$0xff] %vm340_vm1, %v667_v30  ;;  %v309_v35 = vpop.f32.mrb[1].mxu1  ;;  %v399_v40 = vmul.f32 %v572_v28, %v572_v28  ;;  %v415_v45 = vsel %vm340_vm1, %v398_v31, 0.0  ;;  %v362_v46 = vsel %vm340_vm1, %v572_v28, 0.0  ;;  %v406_v20 = vmul.f32 %v667_v30, %v667_v30 }
  0xeb   : > { %342 = vst.msk [vmem:[%s659_s23 + $0x8] sm:$0xff] %vm340_vm1, %v280_v29  ;;  %v358_v33 = vsel %vm340_vm1, %v280_v29, 0.0  ;;  %v397_v34 = vmul.f32 %v280_v29, %v280_v29  ;;  %349 = vst.msk [vmem:[%s659_s23 + $0x40] sm:$0xff] %vm340_vm1, %v309_v35  ;;  %v678_v37 = vpop.f32.mrb[2].mxu1  ;;  %v412_v39 = vsel %vm340_vm1, %v396_v27, 0.0  ;;  %v404_v6 = vmul.f32 %v309_v35, %v309_v35 }
  0xec   : > { %v359_v36 = vadd.f32 %v358_v33, %v357_v32  ;;  %352 = vst.msk [vmem:[%s659_s23 + $0x58] sm:$0xff] %vm340_vm1, %v678_v37  ;;  %v312_v42 = vpop.f32.mrb[3].mxu1  ;;  %v417_v51 = vsel %vm340_vm1, %v399_v40, 0.0  ;;  %v372_v12 = vsel %vm340_vm1, %v309_v35, 0.0  ;;  %v376_v24 = vsel %vm340_vm1, %v667_v30, 0.0 }
  0xed   : > { %v413_v41 = vsel %vm340_vm1, %v397_v34, 0.0  ;;  %350 = vst.msk [vmem:[%s659_s23 + $0x48] sm:$0xff] %vm340_vm1, %v312_v42  ;;  %v427_v16 = vsel %vm340_vm1, %v404_v6, 0.0  ;;  %v405_v17 = vmul.f32 %v312_v42, %v312_v42  ;;  %v374_v21 = vsel %vm340_vm1, %v312_v42, 0.0 }
  0xee   : > { %v361_v43 = vadd.f32 %v360_v38, %v359_v36  ;;  %v414_v44 = vadd.f32 %v413_v41, %v412_v39  ;;  %v407_v25 = vmul.f32 %v678_v37, %v678_v37  ;;  %v431_v31 = vsel %vm340_vm1, %v406_v20, 0.0 }
  0xef   : > { %v575_v47 = vpop.f32.mrb[4].mxu0  ;;  %v429_v26 = vsel %vm340_vm1, %v405_v17, 0.0  ;;  %v378_v32 = vsel %vm340_vm1, %v678_v37, 0.0 }
  0xf0   : > { %v416_v48 = vadd.f32 %v415_v45, %v414_v44  ;;  %347 = vst.msk [vmem:[%s659_s23 + $0x30] sm:$0xff] %vm340_vm1, %v575_v47  ;;  %v293_v49 = vpop.f32.mrb[5].mxu0  ;;  %v363_v50 = vadd.f32 %v362_v46, %v361_v43  ;;  %v402_v59 = vmul.f32 %v575_v47, %v575_v47  ;;  %v368_v3 = vsel %vm340_vm1, %v575_v47, 0.0 }
  0xf1   : > { %345 = vst.msk [vmem:[%s659_s23 + $0x20] sm:$0xff] %vm340_vm1, %v293_v49  ;;  %v364_v52 = vsel %vm340_vm1, %v293_v49, 0.0  ;;  %v400_v53 = vmul.f32 %v293_v49, %v293_v49  ;;  %v576_v54 = vpop.f32.mrb[6].mxu0  ;;  %v583_v58 = vpop.f32.mrb[4].mxu1  ;;  %v433_v36 = vsel %vm340_vm1, %v407_v25, 0.0 }
  0xf2   : > { %v365_v55 = vadd.f32 %v364_v52, %v363_v50  ;;  %v418_v56 = vadd.f32 %v417_v51, %v416_v48  ;;  %348 = vst.msk [vmem:[%s659_s23 + $0x38] sm:$0xff] %vm340_vm1, %v576_v54  ;;  %v296_v57 = vpop.f32.mrb[7].mxu0  ;;  %355 = vst.msk [vmem:[%s659_s23 + $0x70] sm:$0xff] %vm340_vm1, %v583_v58  ;;  %v325_v63 = vpop.f32.mrb[5].mxu1  ;;  %v403_v4 = vmul.f32 %v576_v54, %v576_v54  ;;  %v423_v10 = vsel %vm340_vm1, %v402_v59, 0.0 }
  0xf3   : > { %v419_v60 = vsel %vm340_vm1, %v400_v53, 0.0  ;;  %346 = vst.msk [vmem:[%s659_s23 + $0x28] sm:$0xff] %vm340_vm1, %v296_v57  ;;  %v366_v61 = vsel %vm340_vm1, %v296_v57, 0.0  ;;  %v401_v62 = vmul.f32 %v296_v57, %v296_v57  ;;  %353 = vst.msk [vmem:[%s659_s23 + $0x60] sm:$0xff] %vm340_vm1, %v325_v63  ;;  %v584_v2 = vpop.f32.mrb[6].mxu1  ;;  %v370_v11 = vsel %vm340_vm1, %v576_v54, 0.0 }
  0xf4   : > { %v420_v0 = vadd.f32 %v419_v60, %v418_v56  ;;  %v367_v1 = vadd.f32 %v366_v61, %v365_v55  ;;  %356 = vst.msk [vmem:[%s659_s23 + $0x78] sm:$0xff] %vm340_vm1, %v584_v2  ;;  %v328_v7 = vpop.f32.mrb[7].mxu1  ;;  %v425_v15 = vsel %vm340_vm1, %v403_v4, 0.0  ;;  %v408_v27 = vmul.f32 %v325_v63, %v325_v63 }
  0xf5   : > { %v421_v5 = vsel %vm340_vm1, %v401_v62, 0.0  ;;  %354 = vst.msk [vmem:[%s659_s23 + $0x68] sm:$0xff] %vm340_vm1, %v328_v7  ;;  %v380_v33 = vsel %vm340_vm1, %v325_v63, 0.0  ;;  %v409_v38 = vmul.f32 %v328_v7, %v328_v7  ;;  %v410_v41 = vmul.f32 %v583_v58, %v583_v58 }
  0xf6   : > { %v369_v8 = vadd.f32 %v368_v3, %v367_v1  ;;  %v422_v9 = vadd.f32 %v421_v5, %v420_v0  ;;  %v435_v30 = vsel %vm340_vm1, %v408_v27, 0.0  ;;  %v382_v42 = vsel %vm340_vm1, %v328_v7, 0.0 }
  0xf7   : > { %v384_v37 = vsel %vm340_vm1, %v583_v58, 0.0  ;;  %v411_v45 = vmul.f32 %v584_v2, %v584_v2  ;;  %v437_v46 = vsel %vm340_vm1, %v409_v38, 0.0  ;;  %v439_v49 = vsel %vm340_vm1, %v410_v41, 0.0 }
  0xf8   : > { %v424_v13 = vadd.f32 %v423_v10, %v422_v9  ;;  %v371_v14 = vadd.f32 %v370_v11, %v369_v8  ;;  %v386_v50 = vsel %vm340_vm1, %v584_v2, 0.0 }
  0xf9   : > { %v441_v53 = vsel %vm340_vm1, %v411_v45, 0.0 }
  0xfa   : > { %v373_v18 = vadd.f32 %v372_v12, %v371_v14  ;;  %v426_v19 = vadd.f32 %v425_v15, %v424_v13 }
  0xfc   : > { %v428_v22 = vadd.f32 %v427_v16, %v426_v19  ;;  %v375_v23 = vadd.f32 %v374_v21, %v373_v18 }
  0xfe   : > { %v377_v28 = vadd.f32 %v376_v24, %v375_v23  ;;  %v430_v29 = vadd.f32 %v429_v26, %v428_v22 }
 0x100   : > { %v432_v34 = vadd.f32 %v431_v31, %v430_v29  ;;  %v379_v35 = vadd.f32 %v378_v32, %v377_v28 }
 0x102   : > { %v381_v39 = vadd.f32 %v380_v33, %v379_v35  ;;  %v434_v40 = vadd.f32 %v433_v36, %v432_v34 }
 0x104   : > { %v436_v43 = vadd.f32 %v435_v30, %v434_v40  ;;  %v383_v44 = vadd.f32 %v382_v42, %v381_v39 }
 0x106   : > { %v385_v47 = vadd.f32 %v384_v37, %v383_v44  ;;  %v438_v48 = vadd.f32 %v437_v46, %v436_v43 }
 0x108   : > { %v387_v51 = vadd.f32 %v386_v50, %v385_v47  ;;  %v440_v52 = vadd.f32 %v439_v49, %v438_v48 }
 0x10a   : > { %v388_v54 = vrot.slane %v387_v51, 4  ;;  %v442_v55 = vadd.f32 %v441_v53, %v440_v52 }
 0x10c   : > { %v389_v56 = vadd.f32 %v388_v54, %v387_v51  ;;  %v443_v57 = vrot.slane %v442_v55, 4 }
 0x10e   : > { %v390_v58 = vrot.slane %v389_v56, 2  ;;  %v444_v59 = vadd.f32 %v443_v57, %v442_v55 }
 0x110   : > { %v391_v60 = vadd.f32 %v390_v58, %v389_v56  ;;  %v445_v61 = vrot.slane %v444_v59, 2 }
 0x112   : > { %v392_v62 = vrot.slane %v391_v60, 1  ;;  %v446_v63 = vadd.f32 %v445_v61, %v444_v59 }
 0x114   : > { %v393_v0 = vadd.f32 %v392_v62, %v391_v60  ;;  %v447_v1 = vrot.slane %v446_v63, 1 }
 0x116   : > { %395 = vst.msk [vmem:[%s184_s27] sm:$0x1] %vm394_vm2, %v393_v0  ;;  %v448_v2 = vadd.f32 %v447_v1, %v446_v63 }
 0x118   : > { %449 = vst.msk [vmem:[%s184_s27 + $0x1] sm:$0x1] %vm394_vm2, %v448_v2 }
 0x119 PF: > { %s14_s12 = sadd.s32 1, %s602_s12  }
 0x11a   : > { %p11_p5 = scmp.ge.s32.totalorder %s14_s12, 6  }
 0x11c   :  { %13 = sbr.rel (!%p11_p5) target bundleno = 1 (0x1), region = 70 }

// kernel: bottleneck_forward.6
= control target key start
LH: loop header
LB: loop body
LE: loop exit
PB: predicated region body
PF: predicated region fallthrough
CT: control target
= control target key end

     0   :  { %s651_s15 = smov 0   ;;  %s776_s0 = inlined_call_operand.vmem [shape: f32[512,4], index: 0, kind: input, shape index: {}]   ;;  %s777_s1 = inlined_call_operand.vmem [shape: f32[1,4], index: 1, kind: input, shape index: {}]   ;;  %s778_s2 = inlined_call_operand.vmem [shape: f32[1,4], index: 2, kind: input, shape index: {}]   ;;  %s779_s3 = inlined_call_operand.vmem [shape: bf16[4,16], index: 3, kind: input, shape index: {}]   ;;  %s780_s4 = inlined_call_operand.vmem [shape: f32[4,2,16], index: 4, kind: output, shape index: {}]  }
   0x1 LB: > { %s657_s16 = sadd.s32 4294967295, %s624_s15   ;;  %p563_p0 = scmp.ge.s32.totalorder %s624_s15, 1  ;;  %s624_s15 = sphi %s651_s15, %s14_s15  }
   0x2   : > { %p163_p1 = scmp.lt.s32.totalorder %s624_s15, 5 }
   0x4   : > { %p164_p2 = pnand %p563_p0, %p163_p1 }
   0x5   : > { %v285_v0 = vld [vmem:[%s779_s3] sm:$0x3] (!%p164_p2)  ;;  %vm311_vm0 = vcmask (!%p164_p2), 1041408   ;;  %s564_s19 = sshll.u32 (!%p164_p2), %s657_s16, 4  ;;  %vm286_vm1 = vcmask (!%p164_p2), 31744   ;;  %vm412_vm2 = vcmask (!%p164_p2), 130048  }
   0x6   : > { %167 = sbr.rel (%p164_p2) target bundleno = 287 (0x11f), region = 36  ;;  %608 = vmatprep.subr.msk.bf16.mxu0 (!%p164_p2), %vm311_vm0, %v285_v0  ;;  %v313_v1 = vsel (!%p164_p2), %vm311_vm0, %v285_v0, 0  ;;  %p189_p3 = scmp.lt.s32.totalorder (!%p164_p2), %s564_s19, 63  ;;  %609 = vmatprep.subr.msk.bf16.mxu1 (!%p164_p2), %vm311_vm0, %v285_v0  ;;  %v668_v2 = vld [vmem:[%s777_s1] ss:$0 sm:$0xff] (!%p164_p2)  ;;  %vm450_vm3 = vcmask (!%p164_p2), 122880  }
   0x7   : > { %589 = vmatpush3.bf16.msra.mxu0 (!%p164_p2), %v313_v1  ;;  %607 = vmatpush3.bf16.msra.mxu1 (!%p164_p2), %v313_v1  ;;  %v678_v3 = vld [vmem:[%s778_s2] ss:$0 sm:$0xff] (!%p164_p2)  ;;  %p194_p4 = scmp.lt.s32.totalorder (!%p164_p2), %s657_s16, 3 }
   0xd   : > { %s782_s19 = smov (!%p189_p3, %s564_s19), 63  ;;  %s784_s16 = smov (!%p194_p4, %s657_s16), 3 }
   0xe   : > { %s565_s20 = sshll.u32 %s782_s19, 3  ;;  %s566_s28 = sshll.u32 %s784_s16, 1 }
   0xf   : > { %s673_s25 = scalar_lea.vmem %s776_s0, %s565_s20  ;;  %s197_s5 = scalar_lea.vmem %s780_s4, %s566_s28 }
  0x10   : > { %v199_v4 = vld [vmem:[%s673_s25] sm:$0xff]  ;;  %v200_v5 = vld [vmem:[%s673_s25 + $0x8] sm:$0xff]  ;;  %v201_v6 = vld [vmem:[%s673_s25 + $0x10] sm:$0xff] }
  0x11   : > { %v222_v7 = vmul.f32 %v668_v2, %v199_v4  ;;  %v223_v8 = vmul.f32 %v668_v2, %v200_v5  ;;  %v202_v9 = vld [vmem:[%s673_s25 + $0x18] sm:$0xff]  ;;  %v224_v10 = vmul.f32 %v668_v2, %v201_v6  ;;  %v203_v11 = vld [vmem:[%s673_s25 + $0x20] sm:$0xff]  ;;  %v204_v12 = vld [vmem:[%s673_s25 + $0x28] sm:$0xff] }
  0x12   : > { %v225_v13 = vmul.f32 %v668_v2, %v202_v9  ;;  %v226_v14 = vmul.f32 %v668_v2, %v203_v11  ;;  %v227_v15 = vmul.f32 %v668_v2, %v204_v12  ;;  %v205_v16 = vld [vmem:[%s673_s25 + $0x30] sm:$0xff]  ;;  %v206_v17 = vld [vmem:[%s673_s25 + $0x38] sm:$0xff]  ;;  %v207_v26 = vld [vmem:[%s673_s25 + $0x40] sm:$0xff] }
  0x13   : > { %v245_v18 = vadd.f32 %v678_v3, %v222_v7  ;;  %v246_v19 = vadd.f32 %v678_v3, %v223_v8  ;;  %v247_v20 = vadd.f32 %v678_v3, %v224_v10  ;;  %v228_v21 = vmul.f32 %v668_v2, %v205_v16  ;;  %v208_v27 = vld [vmem:[%s673_s25 + $0x48] sm:$0xff]  ;;  %v209_v32 = vld [vmem:[%s673_s25 + $0x50] sm:$0xff]  ;;  %v210_v37 = vld [vmem:[%s673_s25 + $0x58] sm:$0xff] }
  0x14   : > { %v248_v22 = vadd.f32 %v678_v3, %v225_v13  ;;  %v249_v23 = vadd.f32 %v678_v3, %v226_v14  ;;  %v250_v24 = vadd.f32 %v678_v3, %v227_v15  ;;  %v229_v25 = vmul.f32 %v668_v2, %v206_v17  ;;  %v211_v38 = vld [vmem:[%s673_s25 + $0x60] sm:$0xff]  ;;  %v212_v42 = vld [vmem:[%s673_s25 + $0x68] sm:$0xff]  ;;  %v213_v43 = vld [vmem:[%s673_s25 + $0x70] sm:$0xff] }
  0x15   : > { %v261_v28 = vmax.f32 %v245_v18, 0.0  ;;  %v262_v29 = vmax.f32 %v246_v19, 0.0  ;;  %v263_v30 = vmax.f32 %v247_v20, 0.0  ;;  %v251_v31 = vadd.f32 %v678_v3, %v228_v21  ;;  %v214_v52 = vld [vmem:[%s673_s25 + $0x78] sm:$0xff] }
  0x16   : > { %v264_v33 = vmax.f32 %v248_v22, 0.0  ;;  %v265_v34 = vmax.f32 %v249_v23, 0.0  ;;  %v266_v35 = vmax.f32 %v250_v24, 0.0  ;;  %v252_v36 = vadd.f32 %v678_v3, %v229_v25 }
  0x17   : > { %v277_v39 = vpack.c.bf16 %v262_v29, %v261_v28  ;;  %v230_v40 = vmul.f32 %v668_v2, %v207_v26  ;;  %v231_v41 = vmul.f32 %v668_v2, %v208_v27  ;;  %v267_v46 = vmax.f32 %v251_v31, 0.0 }
  0x18   : > { %v278_v44 = vpack.c.bf16 %v264_v33, %v263_v30  ;;  %v279_v45 = vpack.c.bf16 %v266_v35, %v265_v34  ;;  %v232_v47 = vmul.f32 %v668_v2, %v209_v32  ;;  %v233_v50 = vmul.f32 %v668_v2, %v210_v37 }
  0x19   : > { %590 = vmatprep.mubr.msk.bf16.mxu0 %vm286_vm1, %v277_v39  ;;  %v253_v48 = vadd.f32 %v678_v3, %v230_v40  ;;  %v254_v49 = vadd.f32 %v678_v3, %v231_v41  ;;  %v234_v51 = vmul.f32 %v668_v2, %v211_v38  ;;  %v268_v53 = vmax.f32 %v252_v36, 0.0 }
  0x1a   : > { %591 = vmatmul.mubr.msk.bf16.vlgmr.msra.gmra.mrb[0].mxu0 %vm286_vm1, %v278_v44  ;;  %v255_v54 = vadd.f32 %v678_v3, %v232_v47  ;;  %v235_v55 = vmul.f32 %v668_v2, %v212_v42  ;;  %v236_v56 = vmul.f32 %v668_v2, %v213_v43  ;;  %v256_v59 = vadd.f32 %v678_v3, %v233_v50 }
  0x1b   : > { %594 = vmatprep.mubr.msk.bf16.mxu0 %vm286_vm1, %v279_v45  ;;  %v269_v57 = vmax.f32 %v253_v48, 0.0  ;;  %v270_v58 = vmax.f32 %v254_v49, 0.0  ;;  %v257_v60 = vadd.f32 %v678_v3, %v234_v51  ;;  %v237_v63 = vmul.f32 %v668_v2, %v214_v52 }
  0x1c   : > { %v271_v61 = vmax.f32 %v255_v54, 0.0  ;;  %v258_v62 = vadd.f32 %v678_v3, %v235_v55  ;;  %v272_v1 = vmax.f32 %v256_v59, 0.0  ;;  %v259_v5 = vadd.f32 %v678_v3, %v236_v56 }
  0x1d   : > { %v281_v0 = vpack.c.bf16 %v270_v58, %v269_v57  ;;  %v273_v4 = vmax.f32 %v257_v60, 0.0  ;;  %v280_v6 = vpack.c.bf16 %v268_v53, %v267_v46  ;;  %v260_v8 = vadd.f32 %v678_v3, %v237_v63 }
  0x1e   : > { %v274_v7 = vmax.f32 %v258_v62, 0.0  ;;  %v282_v9 = vpack.c.bf16 %v272_v1, %v271_v61  ;;  %v275_v11 = vmax.f32 %v259_v5, 0.0 }
  0x1f   : > { %598 = vmatprep.mubr.msk.bf16.mxu1 %vm286_vm1, %v281_v0  ;;  %v276_v12 = vmax.f32 %v260_v8, 0.0 }
  0x20   : > { %v283_v10 = vpack.c.bf16 %v274_v7, %v273_v4  ;;  %599 = vmatmul.mubr.msk.bf16.vlgmr.msra.gmra.mrb[0].mxu1 %vm286_vm1, %v282_v9 }
  0x21   : > { %v284_v2 = vpack.c.bf16 %v276_v12, %v275_v11 }
  0x22   : > { %595 = vmatmul.mubr.msk.bf16.gmra.mrb[4].mxu0 %vm286_vm1, %v280_v6  ;;  %602 = vmatprep.mubr.msk.bf16.mxu1 %vm286_vm1, %v283_v10 }
  0x28   : > { %603 = vmatmul.mubr.msk.bf16.gmra.mrb[4].mxu1 %vm286_vm1, %v284_v2 }
  0xed   : > { %v592_v13 = vpop.f32.mrb[0].mxu0 }
  0xee   : > { %v349_v14 = vpop.f32.mrb[1].mxu0  ;;  %v454_v17 = vmul.f32 %v592_v13, %v592_v13  ;;  %v416_v22 = vsel %vm412_vm2, %v592_v13, 0.0 }
  0xef   : > { %v452_v15 = vmul.f32 %v349_v14, %v349_v14  ;;  %v593_v3 = vpop.f32.mrb[2].mxu0  ;;  %v413_v18 = vsel %vm412_vm2, %v349_v14, 0.0 }
  0xf0   : > { %v352_v16 = vpop.f32.mrb[3].mxu0  ;;  %v455_v24 = vmul.f32 %v593_v3, %v593_v3  ;;  %v471_v29 = vsel %vm412_vm2, %v454_v17, 0.0  ;;  %v418_v30 = vsel %vm412_vm2, %v593_v3, 0.0 }
  0xf1   : > { %v414_v19 = vsel %vm412_vm2, %v352_v16, 0.0  ;;  %v453_v20 = vmul.f32 %v352_v16, %v352_v16  ;;  %v468_v23 = vsel %vm412_vm2, %v452_v15, 0.0 }
  0xf2   : > { %v415_v21 = vadd.f32 %v414_v19, %v413_v18  ;;  %v473_v37 = vsel %vm412_vm2, %v455_v24, 0.0 }
  0xf3   : > { %v469_v25 = vsel %vm412_vm2, %v453_v20, 0.0  ;;  %v600_v28 = vpop.f32.mrb[0].mxu1 }
  0xf4   : > { %v417_v26 = vadd.f32 %v416_v22, %v415_v21  ;;  %v470_v27 = vadd.f32 %v469_v25, %v468_v23  ;;  %v381_v32 = vpop.f32.mrb[1].mxu1  ;;  %v462_v9 = vmul.f32 %v600_v28, %v600_v28  ;;  %v432_v2 = vsel %vm412_vm2, %v600_v28, 0.0 }
  0xf5   : > { %v596_v31 = vpop.f32.mrb[4].mxu0  ;;  %v601_v36 = vpop.f32.mrb[2].mxu1  ;;  %v460_v54 = vmul.f32 %v381_v32, %v381_v32  ;;  %v428_v60 = vsel %vm412_vm2, %v381_v32, 0.0 }
  0xf6   : > { %v472_v33 = vadd.f32 %v471_v29, %v470_v27  ;;  %v365_v34 = vpop.f32.mrb[5].mxu0  ;;  %v419_v35 = vadd.f32 %v418_v30, %v417_v26  ;;  %v384_v41 = vpop.f32.mrb[3].mxu1  ;;  %v458_v45 = vmul.f32 %v596_v31, %v596_v31  ;;  %v424_v51 = vsel %vm412_vm2, %v596_v31, 0.0 }
  0xf7   : > { %v420_v38 = vsel %vm412_vm2, %v365_v34, 0.0  ;;  %v456_v39 = vmul.f32 %v365_v34, %v365_v34  ;;  %v597_v40 = vpop.f32.mrb[6].mxu0  ;;  %v483_v4 = vsel %vm412_vm2, %v460_v54, 0.0  ;;  %v461_v5 = vmul.f32 %v384_v41, %v384_v41 }
  0xf8   : > { %v421_v42 = vadd.f32 %v420_v38, %v419_v35  ;;  %v474_v43 = vadd.f32 %v473_v37, %v472_v33  ;;  %v368_v44 = vpop.f32.mrb[7].mxu0  ;;  %v459_v52 = vmul.f32 %v597_v40, %v597_v40  ;;  %v479_v58 = vsel %vm412_vm2, %v458_v45, 0.0 }
  0xf9   : > { %v475_v46 = vsel %vm412_vm2, %v456_v39, 0.0  ;;  %v422_v47 = vsel %vm412_vm2, %v368_v44, 0.0  ;;  %v457_v48 = vmul.f32 %v368_v44, %v368_v44  ;;  %v426_v59 = vsel %vm412_vm2, %v597_v40, 0.0 }
  0xfa   : > { %v476_v49 = vadd.f32 %v475_v46, %v474_v43  ;;  %v423_v50 = vadd.f32 %v422_v47, %v421_v42  ;;  %v481_v1 = vsel %vm412_vm2, %v459_v52, 0.0  ;;  %v430_v10 = vsel %vm412_vm2, %v384_v41, 0.0 }
  0xfb   : > { %v477_v53 = vsel %vm412_vm2, %v457_v48, 0.0  ;;  %v604_v57 = vpop.f32.mrb[4].mxu1  ;;  %v463_v13 = vmul.f32 %v601_v36, %v601_v36  ;;  %v485_v14 = vsel %vm412_vm2, %v461_v5, 0.0  ;;  %v487_v17 = vsel %vm412_vm2, %v462_v9, 0.0 }
  0xfc   : > { %v425_v55 = vadd.f32 %v424_v51, %v423_v50  ;;  %v478_v56 = vadd.f32 %v477_v53, %v476_v49  ;;  %v397_v61 = vpop.f32.mrb[5].mxu1  ;;  %v434_v18 = vsel %vm412_vm2, %v601_v36, 0.0  ;;  %v466_v27 = vmul.f32 %v604_v57, %v604_v57 }
  0xfd   : > { %v605_v0 = vpop.f32.mrb[6].mxu1  ;;  %v464_v15 = vmul.f32 %v397_v61, %v397_v61  ;;  %v436_v19 = vsel %vm412_vm2, %v397_v61, 0.0  ;;  %v489_v22 = vsel %vm412_vm2, %v463_v13, 0.0  ;;  %v440_v31 = vsel %vm412_vm2, %v604_v57, 0.0 }
  0xfe   : > { %v480_v62 = vadd.f32 %v479_v58, %v478_v56  ;;  %v427_v63 = vadd.f32 %v426_v59, %v425_v55  ;;  %v400_v6 = vpop.f32.mrb[7].mxu1  ;;  %v467_v32 = vmul.f32 %v605_v0, %v605_v0  ;;  %v495_v36 = vsel %vm412_vm2, %v466_v27, 0.0 }
  0xff   : > { %v491_v23 = vsel %vm412_vm2, %v464_v15, 0.0  ;;  %v465_v24 = vmul.f32 %v400_v6, %v400_v6  ;;  %v438_v28 = vsel %vm412_vm2, %v400_v6, 0.0  ;;  %v442_v37 = vsel %vm412_vm2, %v605_v0, 0.0 }
 0x100   : > { %v429_v7 = vadd.f32 %v428_v60, %v427_v63  ;;  %v482_v8 = vadd.f32 %v481_v1, %v480_v62  ;;  %v497_v40 = vsel %vm412_vm2, %v467_v32, 0.0 }
 0x101   : > { %v493_v33 = vsel %vm412_vm2, %v465_v24, 0.0 }
 0x102   : > { %v484_v11 = vadd.f32 %v483_v4, %v482_v8  ;;  %v431_v12 = vadd.f32 %v430_v10, %v429_v7 }
 0x104   : > { %v433_v3 = vadd.f32 %v432_v2, %v431_v12  ;;  %v486_v16 = vadd.f32 %v485_v14, %v484_v11 }
 0x106   : > { %v488_v20 = vadd.f32 %v487_v17, %v486_v16  ;;  %v435_v21 = vadd.f32 %v434_v18, %v433_v3 }
 0x108   : > { %v437_v25 = vadd.f32 %v436_v19, %v435_v21  ;;  %v490_v26 = vadd.f32 %v489_v22, %v488_v20 }
 0x10a   : > { %v492_v29 = vadd.f32 %v491_v23, %v490_v26  ;;  %v439_v30 = vadd.f32 %v438_v28, %v437_v25 }
 0x10c   : > { %v441_v34 = vadd.f32 %v440_v31, %v439_v30  ;;  %v494_v35 = vadd.f32 %v493_v33, %v492_v29 }
 0x10e   : > { %v443_v38 = vadd.f32 %v442_v37, %v441_v34  ;;  %v496_v39 = vadd.f32 %v495_v36, %v494_v35 }
 0x110   : > { %v444_v41 = vrot.slane %v443_v38, 4  ;;  %v498_v42 = vadd.f32 %v497_v40, %v496_v39 }
 0x112   : > { %v445_v43 = vadd.f32 %v444_v41, %v443_v38  ;;  %v499_v44 = vrot.slane %v498_v42, 4 }
 0x114   : > { %v446_v45 = vrot.slane %v445_v43, 2  ;;  %v500_v46 = vadd.f32 %v499_v44, %v498_v42 }
 0x116   : > { %v447_v47 = vadd.f32 %v446_v45, %v445_v43  ;;  %v501_v48 = vrot.slane %v500_v46, 2 }
 0x118   : > { %v448_v49 = vrot.slane %v447_v47, 1  ;;  %v502_v50 = vadd.f32 %v501_v48, %v500_v46 }
 0x11a   : > { %v449_v51 = vadd.f32 %v448_v49, %v447_v47  ;;  %v503_v52 = vrot.slane %v502_v50, 1 }
 0x11c   : > { %451 = vst.msk [vmem:[%s197_s5] sm:$0x1] %vm450_vm3, %v449_v51  ;;  %v504_v53 = vadd.f32 %v503_v52, %v502_v50 }
 0x11e   : > { %505 = vst.msk [vmem:[%s197_s5 + $0x1] sm:$0x1] %vm450_vm3, %v504_v53 }
 0x11f PF: > { %s14_s15 = sadd.s32 1, %s624_s15  }
 0x120   : > { %p11_p5 = scmp.ge.s32.totalorder %s14_s15, 6  }
 0x122   :  { %13 = sbr.rel (!%p11_p5) target bundleno = 1 (0x1), region = 66 }

// kernel: bottleneck_forward.7
= control target key start
LH: loop header
LB: loop body
LE: loop exit
PB: predicated region body
PF: predicated region fallthrough
CT: control target
= control target key end

     0   :  { %s809_s24 = smov 0   ;;  %s999_s0 = inlined_call_operand.vmem [shape: f32[512,4], index: 0, kind: input, shape index: {}]   ;;  %s1000_s1 = inlined_call_operand.vmem [shape: f32[512,16], index: 1, kind: input, shape index: {}]   ;;  %s1001_s2 = inlined_call_operand.vmem [shape: f32[1,4], index: 2, kind: input, shape index: {}]   ;;  %s1002_s3 = inlined_call_operand.vmem [shape: f32[1,4], index: 3, kind: input, shape index: {}]   ;;  %s1003_s4 = inlined_call_operand.vmem [shape: bf16[4,16], index: 4, kind: input, shape index: {}]   ;;  %s1004_s5 = inlined_call_operand.vmem [shape: f32[1,16], index: 5, kind: input, shape index: {}]   ;;  %s1005_s6 = inlined_call_operand.vmem [shape: f32[1,16], index: 6, kind: input, shape index: {}]   ;;  %s1006_s7 = inlined_call_operand.vmem [shape: f32[512,16], index: 7, kind: output, shape index: {}]  }
   0x1 LB: > { %s697_s25 = sadd.s32 4294967295, %s767_s24   ;;  %p701_p0 = scmp.ge.s32.totalorder %s767_s24, 1  ;;  %s767_s24 = sphi %s809_s24, %s17_s24  }
   0x2   : > { %p249_p1 = scmp.lt.s32.totalorder %s767_s24, 5 }
   0x4   : > { %p250_p2 = pnand %p701_p0, %p249_p1 }
   0x5   : > { %v391_v0 = vld [vmem:[%s1003_s4] sm:$0x3] (!%p250_p2)  ;;  %vm417_vm0 = vcmask (!%p250_p2), 1041408   ;;  %s702_s28 = sshll.u32 (!%p250_p2), %s697_s25, 4  ;;  %vm392_vm1 = vcmask (!%p250_p2), 31744   ;;  %vm612_vm2 = vcmask (!%p250_p2), 130048  }
   0x6   : > { %253 = sbr.rel (%p250_p2) target bundleno = 260 (0x104), region = 48  ;;  %751 = vmatprep.subr.msk.bf16.mxu0 (!%p250_p2), %vm417_vm0, %v391_v0  ;;  %752 = vmatprep.subr.msk.bf16.mxu1 (!%p250_p2), %vm417_vm0, %v391_v0  ;;  %v419_v1 = vsel (!%p250_p2), %vm417_vm0, %v391_v0, 0  ;;  %p287_p3 = scmp.lt.s32.totalorder (!%p250_p2), %s702_s28, 63  ;;  %v825_v2 = vld [vmem:[%s1001_s2] ss:$0 sm:$0xff] (!%p250_p2) }
   0x7   : > { %732 = vmatpush3.bf16.msra.mxu0 (!%p250_p2), %v419_v1  ;;  %750 = vmatpush3.bf16.msra.mxu1 (!%p250_p2), %v419_v1  ;;  %v836_v3 = vld [vmem:[%s1002_s3] ss:$0 sm:$0xff] (!%p250_p2) }
   0xd   : > { %s1008_s28 = smov (!%p287_p3, %s702_s28), 63 }
   0xe   : > { %s820_s29 = sshll.u32 %s1008_s28, 3 }
   0xf   : > { %s831_s11 = scalar_lea.vmem %s999_s0, %s820_s29  ;;  %s903_s18 = scalar_lea.vmem %s1000_s1, %s820_s29 }
  0x10   : > { %v305_v4 = vld [vmem:[%s831_s11] sm:$0xff]  ;;  %v306_v5 = vld [vmem:[%s831_s11 + $0x8] sm:$0xff]  ;;  %v307_v11 = vld [vmem:[%s831_s11 + $0x10] sm:$0xff]  ;;  %s931_s23 = scalar_lea.vmem %s1006_s7, %s820_s29 }
  0x11   : > { %v313_v6 = vld [vmem:[%s831_s11 + $0x40] sm:$0xff]  ;;  %v328_v7 = vmul.f32 %v825_v2, %v305_v4  ;;  %v329_v8 = vmul.f32 %v825_v2, %v306_v5  ;;  %v314_v9 = vld [vmem:[%s831_s11 + $0x48] sm:$0xff]  ;;  %v308_v12 = vld [vmem:[%s831_s11 + $0x18] sm:$0xff]  ;;  %v330_v14 = vmul.f32 %v825_v2, %v307_v11 }
  0x12   : > { %v336_v10 = vmul.f32 %v825_v2, %v313_v6  ;;  %v337_v13 = vmul.f32 %v825_v2, %v314_v9  ;;  %v331_v15 = vmul.f32 %v825_v2, %v308_v12  ;;  %v315_v16 = vld [vmem:[%s831_s11 + $0x50] sm:$0xff]  ;;  %v316_v17 = vld [vmem:[%s831_s11 + $0x58] sm:$0xff]  ;;  %v309_v26 = vld [vmem:[%s831_s11 + $0x20] sm:$0xff] }
  0x13   : > { %v351_v18 = vadd.f32 %v836_v3, %v328_v7  ;;  %v352_v19 = vadd.f32 %v836_v3, %v329_v8  ;;  %v338_v21 = vmul.f32 %v825_v2, %v315_v16  ;;  %v353_v23 = vadd.f32 %v836_v3, %v330_v14  ;;  %v310_v27 = vld [vmem:[%s831_s11 + $0x28] sm:$0xff]  ;;  %v317_v32 = vld [vmem:[%s831_s11 + $0x60] sm:$0xff]  ;;  %v311_v38 = vld [vmem:[%s831_s11 + $0x30] sm:$0xff] }
  0x14   : > { %v359_v20 = vadd.f32 %v836_v3, %v336_v10  ;;  %v360_v22 = vadd.f32 %v836_v3, %v337_v13  ;;  %v354_v24 = vadd.f32 %v836_v3, %v331_v15  ;;  %v339_v25 = vmul.f32 %v825_v2, %v316_v17  ;;  %v318_v37 = vld [vmem:[%s831_s11 + $0x68] sm:$0xff]  ;;  %v312_v43 = vld [vmem:[%s831_s11 + $0x38] sm:$0xff]  ;;  %v319_v52 = vld [vmem:[%s831_s11 + $0x70] sm:$0xff] }
  0x15   : > { %v367_v28 = vmax.f32 %v351_v18, 0.0  ;;  %v368_v29 = vmax.f32 %v352_v19, 0.0  ;;  %v361_v31 = vadd.f32 %v836_v3, %v338_v21  ;;  %v369_v34 = vmax.f32 %v353_v23, 0.0  ;;  %v320_v53 = vld [vmem:[%s831_s11 + $0x78] sm:$0xff]  ;;  %v897_v13 = vld [vmem:[%s1004_s5] ss:$0 sm:$0xff] }
  0x16   : > { %v375_v30 = vmax.f32 %v359_v20, 0.0  ;;  %v376_v33 = vmax.f32 %v360_v22, 0.0  ;;  %v370_v35 = vmax.f32 %v354_v24, 0.0  ;;  %v362_v36 = vadd.f32 %v836_v3, %v339_v25  ;;  %v908_v14 = vld [vmem:[%s1005_s6] ss:$0 sm:$0xff]  ;;  %v566_v17 = vld [vmem:[%s903_s18 + $0x10] sm:$0xff] }
  0x17   : > { %v383_v39 = vpack.c.bf16 %v368_v29, %v367_v28  ;;  %v377_v40 = vmax.f32 %v361_v31, 0.0  ;;  %v332_v41 = vmul.f32 %v825_v2, %v309_v26  ;;  %v333_v42 = vmul.f32 %v825_v2, %v310_v27  ;;  %v564_v23 = vld [vmem:[%s903_s18] sm:$0xff]  ;;  %v574_v27 = vld [vmem:[%s903_s18 + $0x50] sm:$0xff] }
  0x18   : > { %v387_v44 = vpack.c.bf16 %v376_v33, %v375_v30  ;;  %v384_v45 = vpack.c.bf16 %v370_v35, %v369_v34  ;;  %v378_v46 = vmax.f32 %v362_v36, 0.0  ;;  %v340_v47 = vmul.f32 %v825_v2, %v317_v32  ;;  %v567_v30 = vld [vmem:[%s903_s18 + $0x18] sm:$0xff]  ;;  %v572_v35 = vld [vmem:[%s903_s18 + $0x40] sm:$0xff] }
  0x19   : > { %733 = vmatprep.mubr.msk.bf16.mxu0 %vm392_vm1, %v383_v39  ;;  %v355_v48 = vadd.f32 %v836_v3, %v332_v41  ;;  %v356_v49 = vadd.f32 %v836_v3, %v333_v42  ;;  %v341_v50 = vmul.f32 %v825_v2, %v318_v37  ;;  %v334_v51 = vmul.f32 %v825_v2, %v311_v38  ;;  %v565_v38 = vld [vmem:[%s903_s18 + $0x8] sm:$0xff]  ;;  %v575_v42 = vld [vmem:[%s903_s18 + $0x58] sm:$0xff] }
  0x1a   : > { %741 = vmatprep.mubr.msk.bf16.mxu1 %vm392_vm1, %v387_v44  ;;  %734 = vmatmul.mubr.msk.bf16.vlgmr.msra.gmra.mrb[0].mxu0 %vm392_vm1, %v384_v45  ;;  %v388_v54 = vpack.c.bf16 %v378_v46, %v377_v40  ;;  %v363_v55 = vadd.f32 %v836_v3, %v340_v47  ;;  %v335_v56 = vmul.f32 %v825_v2, %v312_v43 }
  0x1b   : > { %v371_v57 = vmax.f32 %v355_v48, 0.0  ;;  %v372_v58 = vmax.f32 %v356_v49, 0.0  ;;  %v364_v59 = vadd.f32 %v836_v3, %v341_v50  ;;  %v357_v60 = vadd.f32 %v836_v3, %v334_v51  ;;  %v573_v49 = vld [vmem:[%s903_s18 + $0x48] sm:$0xff] }
  0x1c   : > { %742 = vmatmul.mubr.msk.bf16.vlgmr.msra.gmra.mrb[0].mxu1 %vm392_vm1, %v388_v54  ;;  %v379_v61 = vmax.f32 %v363_v55, 0.0  ;;  %v358_v62 = vadd.f32 %v836_v3, %v335_v56  ;;  %v342_v63 = vmul.f32 %v825_v2, %v319_v52  ;;  %v343_v0 = vmul.f32 %v825_v2, %v320_v53 }
  0x1d   : > { %v385_v1 = vpack.c.bf16 %v372_v58, %v371_v57  ;;  %v380_v4 = vmax.f32 %v364_v59, 0.0  ;;  %v373_v5 = vmax.f32 %v357_v60, 0.0 }
  0x1e   : > { %v374_v6 = vmax.f32 %v358_v62, 0.0  ;;  %v365_v7 = vadd.f32 %v836_v3, %v342_v63  ;;  %v366_v8 = vadd.f32 %v836_v3, %v343_v0  ;;  %v570_v63 = vld [vmem:[%s903_s18 + $0x30] sm:$0xff] }
  0x1f   : > { %737 = vmatprep.mubr.msk.bf16.mxu0 %vm392_vm1, %v385_v1  ;;  %v389_v9 = vpack.c.bf16 %v380_v4, %v379_v61 }
  0x20   : > { %v386_v10 = vpack.c.bf16 %v374_v6, %v373_v5  ;;  %v381_v11 = vmax.f32 %v365_v7, 0.0  ;;  %v382_v12 = vmax.f32 %v366_v8, 0.0  ;;  %v568_v8 = vld [vmem:[%s903_s18 + $0x20] sm:$0xff] }
  0x21   : > { %745 = vmatprep.mubr.msk.bf16.mxu1 %vm392_vm1, %v389_v9 }
  0x22   : > { %738 = vmatmul.mubr.msk.bf16.gmra.mrb[4].mxu0 %vm392_vm1, %v386_v10  ;;  %v390_v2 = vpack.c.bf16 %v382_v12, %v381_v11 }
  0x24   : > { %746 = vmatmul.mubr.msk.bf16.gmra.mrb[4].mxu1 %vm392_vm1, %v390_v2  ;;  %v578_v2 = vld [vmem:[%s903_s18 + $0x70] sm:$0xff] }
  0xed   : > { %v735_v3 = vpop.f32.mrb[0].mxu0 }
  0xee   : > { %v527_v15 = vmul.f32 %v735_v3, %v897_v13  ;;  %v455_v16 = vpop.f32.mrb[1].mxu0 }
  0xef   : > { %v743_v18 = vpop.f32.mrb[0].mxu1  ;;  %v525_v19 = vmul.f32 %v897_v13, %v455_v16  ;;  %v736_v20 = vpop.f32.mrb[2].mxu0  ;;  %v571_v16 = vld [vmem:[%s903_s18 + $0x38] sm:$0xff] }
  0xf0   : > { %v550_v21 = vadd.f32 %v908_v14, %v527_v15  ;;  %v535_v22 = vmul.f32 %v743_v18, %v897_v13  ;;  %v487_v24 = vpop.f32.mrb[1].mxu1  ;;  %v528_v25 = vmul.f32 %v736_v20, %v897_v13  ;;  %v458_v26 = vpop.f32.mrb[3].mxu0 }
  0xf1   : > { %v548_v28 = vadd.f32 %v908_v14, %v525_v19  ;;  %v533_v29 = vmul.f32 %v897_v13, %v487_v24  ;;  %v744_v31 = vpop.f32.mrb[2].mxu1  ;;  %v526_v32 = vmul.f32 %v897_v13, %v458_v26  ;;  %v569_v24 = vld [vmem:[%s903_s18 + $0x28] sm:$0xff] }
  0xf2   : > { %v582_v33 = vadd.f32 %v566_v17, %v550_v21  ;;  %v558_v34 = vadd.f32 %v908_v14, %v535_v22  ;;  %v551_v36 = vadd.f32 %v908_v14, %v528_v25  ;;  %v536_v37 = vmul.f32 %v744_v31, %v897_v13  ;;  %v490_v39 = vpop.f32.mrb[3].mxu1  ;;  %v576_v21 = vld [vmem:[%s903_s18 + $0x60] sm:$0xff] }
  0xf3   : > { %v580_v40 = vadd.f32 %v564_v23, %v548_v28  ;;  %v556_v41 = vadd.f32 %v908_v14, %v533_v29  ;;  %v549_v43 = vadd.f32 %v908_v14, %v526_v32  ;;  %v534_v44 = vmul.f32 %v897_v13, %v490_v39  ;;  %v579_v28 = vld [vmem:[%s903_s18 + $0x78] sm:$0xff] }
  0xf4   : > { %v598_v45 = vmax.f32 %v582_v33, 0.0  ;;  %v590_v46 = vadd.f32 %v574_v27, %v558_v34  ;;  %v583_v47 = vadd.f32 %v567_v30, %v551_v36  ;;  %v559_v48 = vadd.f32 %v908_v14, %v536_v37 }
  0xf5   : > { %v596_v50 = vmax.f32 %v580_v40, 0.0  ;;  %v588_v51 = vadd.f32 %v572_v35, %v556_v41  ;;  %v581_v52 = vadd.f32 %v565_v38, %v549_v43  ;;  %v557_v53 = vadd.f32 %v908_v14, %v534_v44  ;;  %v739_v54 = vpop.f32.mrb[4].mxu0  ;;  %v577_v35 = vld [vmem:[%s903_s18 + $0x68] sm:$0xff] }
  0xf6   : > { %615 = vst.msk [vmem:[%s931_s23 + $0x10] sm:$0xff] %vm612_vm2, %v598_v45  ;;  %v606_v55 = vmax.f32 %v590_v46, 0.0  ;;  %v599_v56 = vmax.f32 %v583_v47, 0.0  ;;  %v591_v57 = vadd.f32 %v575_v42, %v559_v48  ;;  %v531_v58 = vmul.f32 %v739_v54, %v897_v13  ;;  %v471_v59 = vpop.f32.mrb[5].mxu0 }
  0xf7   : > { %613 = vst.msk [vmem:[%s931_s23] sm:$0xff] %vm612_vm2, %v596_v50  ;;  %v604_v60 = vmax.f32 %v588_v51, 0.0  ;;  %v597_v61 = vmax.f32 %v581_v52, 0.0  ;;  %v589_v62 = vadd.f32 %v573_v49, %v557_v53  ;;  %v747_v0 = vpop.f32.mrb[4].mxu1  ;;  %v529_v1 = vmul.f32 %v897_v13, %v471_v59  ;;  %v740_v4 = vpop.f32.mrb[6].mxu0 }
  0xf8   : > { %623 = vst.msk [vmem:[%s931_s23 + $0x50] sm:$0xff] %vm612_vm2, %v606_v55  ;;  %616 = vst.msk [vmem:[%s931_s23 + $0x18] sm:$0xff] %vm612_vm2, %v599_v56  ;;  %v607_v5 = vmax.f32 %v591_v57, 0.0  ;;  %v554_v6 = vadd.f32 %v908_v14, %v531_v58  ;;  %v539_v7 = vmul.f32 %v747_v0, %v897_v13  ;;  %v503_v9 = vpop.f32.mrb[5].mxu1  ;;  %v532_v10 = vmul.f32 %v740_v4, %v897_v13  ;;  %v474_v11 = vpop.f32.mrb[7].mxu0 }
  0xf9   : > { %621 = vst.msk [vmem:[%s931_s23 + $0x40] sm:$0xff] %vm612_vm2, %v604_v60  ;;  %614 = vst.msk [vmem:[%s931_s23 + $0x8] sm:$0xff] %vm612_vm2, %v597_v61  ;;  %v605_v12 = vmax.f32 %v589_v62, 0.0  ;;  %v552_v3 = vadd.f32 %v908_v14, %v529_v1  ;;  %v537_v15 = vmul.f32 %v897_v13, %v503_v9  ;;  %v748_v17 = vpop.f32.mrb[6].mxu1  ;;  %v530_v18 = vmul.f32 %v897_v13, %v474_v11 }
  0xfa   : > { %624 = vst.msk [vmem:[%s931_s23 + $0x58] sm:$0xff] %vm612_vm2, %v607_v5  ;;  %v586_v19 = vadd.f32 %v570_v63, %v554_v6  ;;  %v562_v20 = vadd.f32 %v908_v14, %v539_v7  ;;  %v555_v22 = vadd.f32 %v908_v14, %v532_v10  ;;  %v540_v23 = vmul.f32 %v748_v17, %v897_v13  ;;  %v506_v25 = vpop.f32.mrb[7].mxu1 }
  0xfb   : > { %622 = vst.msk [vmem:[%s931_s23 + $0x48] sm:$0xff] %vm612_vm2, %v605_v12  ;;  %v584_v26 = vadd.f32 %v568_v8, %v552_v3  ;;  %v560_v27 = vadd.f32 %v908_v14, %v537_v15  ;;  %v553_v29 = vadd.f32 %v908_v14, %v530_v18  ;;  %v538_v30 = vmul.f32 %v897_v13, %v506_v25 }
  0xfc   : > { %v602_v31 = vmax.f32 %v586_v19, 0.0  ;;  %v594_v32 = vadd.f32 %v578_v2, %v562_v20  ;;  %v587_v33 = vadd.f32 %v571_v16, %v555_v22  ;;  %v563_v34 = vadd.f32 %v908_v14, %v540_v23 }
  0xfd   : > { %v600_v36 = vmax.f32 %v584_v26, 0.0  ;;  %v592_v37 = vadd.f32 %v576_v21, %v560_v27  ;;  %v585_v38 = vadd.f32 %v569_v24, %v553_v29  ;;  %v561_v39 = vadd.f32 %v908_v14, %v538_v30 }
  0xfe   : > { %619 = vst.msk [vmem:[%s931_s23 + $0x30] sm:$0xff] %vm612_vm2, %v602_v31  ;;  %v610_v13 = vmax.f32 %v594_v32, 0.0  ;;  %v603_v40 = vmax.f32 %v587_v33, 0.0  ;;  %v595_v41 = vadd.f32 %v579_v28, %v563_v34 }
  0xff   : > { %617 = vst.msk [vmem:[%s931_s23 + $0x20] sm:$0xff] %vm612_vm2, %v600_v36  ;;  %v608_v42 = vmax.f32 %v592_v37, 0.0  ;;  %v601_v43 = vmax.f32 %v585_v38, 0.0  ;;  %v593_v44 = vadd.f32 %v577_v35, %v561_v39 }
 0x100   : > { %627 = vst.msk [vmem:[%s931_s23 + $0x70] sm:$0xff] %vm612_vm2, %v610_v13  ;;  %620 = vst.msk [vmem:[%s931_s23 + $0x38] sm:$0xff] %vm612_vm2, %v603_v40  ;;  %v611_v45 = vmax.f32 %v595_v41, 0.0 }
 0x101   : > { %625 = vst.msk [vmem:[%s931_s23 + $0x60] sm:$0xff] %vm612_vm2, %v608_v42  ;;  %618 = vst.msk [vmem:[%s931_s23 + $0x28] sm:$0xff] %vm612_vm2, %v601_v43  ;;  %v609_v14 = vmax.f32 %v593_v44, 0.0 }
 0x102   : > { %628 = vst.msk [vmem:[%s931_s23 + $0x78] sm:$0xff] %vm612_vm2, %v611_v45 }
 0x103   : > { %626 = vst.msk [vmem:[%s931_s23 + $0x68] sm:$0xff] %vm612_vm2, %v609_v14 }
 0x104 PF: > { %s17_s24 = sadd.s32 1, %s767_s24  }
 0x105   : > { %p14_p4 = scmp.ge.s32.totalorder %s17_s24, 6  }
 0x107   :  { %16 = sbr.rel (!%p14_p4) target bundleno = 1 (0x1), region = 81 }

// kernel: bottleneck_forward.5
= control target key start
LH: loop header
LB: loop body
LE: loop exit
PB: predicated region body
PF: predicated region fallthrough
CT: control target
= control target key end

     0   :  { %s3284_s21 = smov 0   ;;  %s4604_s0 = inlined_call_operand.vmem [shape: f32[2,18,18,4], index: 0, kind: input, shape index: {}]   ;;  %s4605_s1 = inlined_call_operand.vmem [shape: f32[18,18,1], index: 1, kind: input, shape index: {}]   ;;  %s4606_s2 = inlined_call_operand.vmem [shape: bf16[36,4], index: 2, kind: input, shape index: {}]   ;;  %s4607_s3 = inlined_call_operand.vmem [shape: f32[1,4], index: 3, kind: input, shape index: {}]   ;;  %s4608_s4 = inlined_call_operand.vmem [shape: f32[1,4], index: 4, kind: input, shape index: {}]   ;;  %s4609_s5 = inlined_call_operand.vmem [shape: f32[2,16,16,4], index: 5, kind: output, shape index: {0}]   ;;  %s4610_s6 = inlined_call_operand.vmem [shape: f32[2,2,4], index: 6, kind: output, shape index: {1}]  }
   0x1 LB: > { %s3111_s22 = sadd.s32 4294967295, %s3238_s21   ;;  %p3115_p0 = scmp.ge.s32.totalorder %s3238_s21, 1  ;;  %s3238_s21 = sphi %s3284_s21, %s17_s21  }
   0x2   : > { %p215_p1 = scmp.lt.s32.totalorder %s3238_s21, 3 }
   0x4   : > { %p216_p2 = pnand %p3115_p0, %p215_p1 }
   0x5   : > { %v496_v0 = vld [vmem:[%s4605_s1 + $0x10] sm:$0x3] (!%p216_p2)  ;;  %v494_v1 = vld [vmem:[%s4605_s1] sm:$0xff] (!%p216_p2)  ;;  %v3240_v2 = vmov (!%p216_p2), 0   ;;  %v497_v3 = vld [vmem:[%s4605_s1 + $0x18] sm:$0xff] (!%p216_p2)  ;;  %p249_p3 = scmp.lt.s32.totalorder (!%p216_p2), %s3111_s22, 1 }
   0x6   : > { %219 = sbr.rel (%p216_p2) target bundleno = 1048 (0x418), region = 40  ;;  %3228 = vset.pattern.permute.xlu1 (!%p216_p2), %v3240_v2  ;;  %3227 = vset.pattern.permute.xlu0 (!%p216_p2), %v3240_v2  ;;  %v495_v4 = vld [vmem:[%s4605_s1 + $0x8] sm:$0xff] (!%p216_p2)  ;;  %v498_v6 = vld [vmem:[%s4605_s1 + $0x20] sm:$0xff] (!%p216_p2)  ;;  %v501_v7 = vld [vmem:[%s4605_s1 + $0x38] sm:$0xff] (!%p216_p2)  ;;  %vm875_vm0 = vcmask (!%p216_p2), 25600   ;;  %vm872_vm1 = vcmask (!%p216_p2), 31744  }
   0x7   : > { %560 = vperm.xlu1 (!%p216_p2), %3228, %v496_v0   ;;  %550 = vperm.xlu0 (!%p216_p2), %3227, %v494_v1   ;;  %v499_v5 = vld [vmem:[%s4605_s1 + $0x28] sm:$0x3] (!%p216_p2)  ;;  %v500_v8 = vld [vmem:[%s4605_s1 + $0x30] sm:$0xff] (!%p216_p2)  ;;  %v502_v10 = vld [vmem:[%s4605_s1 + $0x40] sm:$0x3] (!%p216_p2)  ;;  %s3241_s29 = smov (!%p216_p2), 4  }
   0x8   : > { %v503_v9 = vld [vmem:[%s4605_s1 + $0x48] sm:$0xff] (!%p216_p2)  ;;  %v505_v11 = vld [vmem:[%s4605_s1 + $0x58] sm:$0x3] (!%p216_p2)  ;;  %v504_v12 = vld [vmem:[%s4605_s1 + $0x50] sm:$0xff] (!%p216_p2)  ;;  %s3242_s30 = smov (!%p216_p2), 8   ;;  %vm1152_vm2 = vcmask (!%p216_p2), 64544  }
   0x9   : > { %v507_v13 = vld [vmem:[%s4605_s1 + $0x68] sm:$0xff] (!%p216_p2)  ;;  %v506_v14 = vld [vmem:[%s4605_s1 + $0x60] sm:$0xff] (!%p216_p2)  ;;  %v509_v15 = vld [vmem:[%s4605_s1 + $0x78] sm:$0xff] (!%p216_p2)  ;;  %s3243_s7 = smov (!%p216_p2), 12   ;;  %s3244_s8 = smov (!%p216_p2), 16   ;;  %vm1345_vm3 = vcmask (!%p216_p2), 97344  }
   0xa   : > { %v508_v16 = vld [vmem:[%s4605_s1 + $0x70] sm:$0x3] (!%p216_p2)  ;;  %v511_v17 = vld [vmem:[%s4605_s1 + $0x88] sm:$0x3] (!%p216_p2)  ;;  %v510_v18 = vld [vmem:[%s4605_s1 + $0x80] sm:$0xff] (!%p216_p2)  ;;  %s3245_s9 = smov (!%p216_p2), 20  }
   0xb   : > { %565 = vperm.xlu1 (!%p216_p2), %3228, %v497_v3   ;;  %555 = vperm.xlu0 (!%p216_p2), %3227, %v495_v4   ;;  %v513_v19 = vld [vmem:[%s4605_s1 + $0x98] sm:$0xff] (!%p216_p2)  ;;  %v512_v20 = vld [vmem:[%s4605_s1 + $0x90] sm:$0xff] (!%p216_p2)  ;;  %v515_v21 = vld [vmem:[%s4605_s1 + $0xa8] sm:$0xff] (!%p216_p2)  ;;  %s3246_s10 = smov (!%p216_p2), 24   ;;  %s3247_s13 = smov (!%p216_p2), 28   ;;  %vm2655_vm4 = vcmask (!%p216_p2), 1041408  }
   0xc   : > { %v514_v22 = vld [vmem:[%s4605_s1 + $0xa0] sm:$0x3] (!%p216_p2)  ;;  %v517_v23 = vld [vmem:[%s4605_s1 + $0xb8] sm:$0x3] (!%p216_p2)  ;;  %v516_v24 = vld [vmem:[%s4605_s1 + $0xb0] sm:$0xff] (!%p216_p2)  ;;  %s3248_s18 = smov (!%p216_p2), 32  }
   0xd   : > { %v519_v25 = vld [vmem:[%s4605_s1 + $0xc8] sm:$0xff]  ;;  %v518_v26 = vld [vmem:[%s4605_s1 + $0xc0] sm:$0xff]  ;;  %v521_v27 = vld [vmem:[%s4605_s1 + $0xd8] sm:$0xff]  ;;  %s4612_s22 = smov (!%p249_p3, %s3111_s22), 1  ;;  %vm1539_vm5 = vcmask 130144   ;;  %vm1732_vm6 = vcmask 162944  }
   0xe   : > { %v520_v28 = vld [vmem:[%s4605_s1 + $0xd0] sm:$0x3]  ;;  %v523_v29 = vld [vmem:[%s4605_s1 + $0xe8] sm:$0x3]  ;;  %v522_v30 = vld [vmem:[%s4605_s1 + $0xe0] sm:$0xff]  ;;  %s3209_s19 = smul.u32 432, %s4612_s22 }
   0xf   : > { %575 = vperm.xlu1 %3228, %v499_v5   ;;  %570 = vperm.xlu0 %3227, %v498_v6   ;;  %v525_v31 = vld [vmem:[%s4605_s1 + $0xf8] sm:$0xff]  ;;  %v524_v32 = vld [vmem:[%s4605_s1 + $0xf0] sm:$0xff]  ;;  %v527_v33 = vld [vmem:[%s4605_s1 + $0x108] sm:$0xff]  ;;  %vm1925_vm7 = vcmask 195744   ;;  %vm2119_vm8 = vcmask 228544   ;;  %vm2312_vm9 = vcmask 261344  }
  0x10   : > { %v526_v34 = vld [vmem:[%s4605_s1 + $0x100] sm:$0x3]  ;;  %v529_v35 = vld [vmem:[%s4605_s1 + $0x118] sm:$0x3]  ;;  %v528_v36 = vld [vmem:[%s4605_s1 + $0x110] sm:$0xff]  ;;  %s3464_s24 = scalar_lea.vmem %s4604_s0, %s3209_s19  ;;  %vm2505_vm10 = vcmask 294144  }
  0x11   : > { %v531_v37 = vld [vmem:[%s4605_s1 + $0x128] sm:$0xff]  ;;  %v530_v38 = vld [vmem:[%s4605_s1 + $0x120] sm:$0xff]  ;;  %v533_v39 = vld [vmem:[%s4605_s1 + $0x138] sm:$0xff]  ;;  %vm2606_vm11 = vcmask 293888   ;;  %s3143_s19 = sshll.u32 %s4612_s22, 8  ;;  %s3119_s25 = sshll.u32 %s4612_s22, 1 }
  0x12   : > { %v532_v40 = vld [vmem:[%s4605_s1 + $0x130] sm:$0x3]  ;;  %v535_v41 = vld [vmem:[%s4605_s1 + $0x148] sm:$0x3]  ;;  %v534_v42 = vld [vmem:[%s4605_s1 + $0x140] sm:$0xff]  ;;  %s262_s28 = scalar_lea.vmem %s4610_s6, %s3119_s25  ;;  %vm2921_vm12 = vcmask 24576  }
  0x13   : > { %585 = vperm.xlu1 %3228, %v501_v7   ;;  %580 = vperm.xlu0 %3227, %v500_v8   ;;  %v537_v43 = vld [vmem:[%s4605_s1 + $0x158] sm:$0xff]  ;;  %v536_v44 = vld [vmem:[%s4605_s1 + $0x150] sm:$0xff]  ;;  %v539_v45 = vld [vmem:[%s4605_s1 + $0x168] sm:$0xff] }
  0x14   : > { %v538_v46 = vld [vmem:[%s4605_s1 + $0x160] sm:$0x3]  ;;  %v541_v47 = vld [vmem:[%s4605_s1 + $0x178] sm:$0x3]  ;;  %v540_v48 = vld [vmem:[%s4605_s1 + $0x170] sm:$0xff] }
  0x15   : > { %v543_v49 = vld [vmem:[%s4605_s1 + $0x188] sm:$0xff]  ;;  %v542_v50 = vld [vmem:[%s4605_s1 + $0x180] sm:$0xff]  ;;  %v545_v51 = vld [vmem:[%s4605_s1 + $0x198] sm:$0xff] }
  0x16   : > { %v544_v52 = vld [vmem:[%s4605_s1 + $0x190] sm:$0x3]  ;;  %v547_v53 = vld [vmem:[%s4605_s1 + $0x1a8] sm:$0x3]  ;;  %v546_v54 = vld [vmem:[%s4605_s1 + $0x1a0] sm:$0xff] }
  0x17   : > { %595 = vperm.xlu1 %3228, %v503_v9   ;;  %590 = vperm.xlu0 %3227, %v502_v10   ;;  %v266_v55 = vld [vmem:[%s3464_s24 + $0x10] sm:$0x3]  ;;  %v3470_v56 = vld [vmem:[%s4607_s3] ss:$0 sm:$0xff]  ;;  %v267_v60 = vld [vmem:[%s3464_s24 + $0x18] sm:$0xff] }
  0x18   : > { %v264_v57 = vld [vmem:[%s3464_s24] sm:$0xff]  ;;  %v327_v58 = vmul.f32 %v3470_v56, %v266_v55  ;;  %v265_v62 = vld [vmem:[%s3464_s24 + $0x8] sm:$0xff]  ;;  %v328_v63 = vmul.f32 %v3470_v56, %v267_v60 }
  0x19   : > { %v325_v59 = vmul.f32 %v3470_v56, %v264_v57  ;;  %v3479_v61 = vld [vmem:[%s4608_s4] ss:$0 sm:$0xff]  ;;  %v326_v2 = vmul.f32 %v3470_v56, %v265_v62  ;;  %v269_v3 = vld [vmem:[%s3464_s24 + $0x28] sm:$0x3]  ;;  %v279_v62 = vld [vmem:[%s3464_s24 + $0x78] sm:$0xff] }
  0x1a   : > { %v388_v0 = vadd.f32 %v3479_v61, %v327_v58  ;;  %v268_v4 = vld [vmem:[%s3464_s24 + $0x20] sm:$0xff]  ;;  %v389_v5 = vadd.f32 %v3479_v61, %v328_v63  ;;  %v330_v6 = vmul.f32 %v3470_v56, %v269_v3 }
  0x1b   : > { %605 = vperm.xlu1 %3228, %v505_v11   ;;  %600 = vperm.xlu0 %3227, %v504_v12   ;;  %v386_v1 = vadd.f32 %v3479_v61, %v325_v59  ;;  %v329_v7 = vmul.f32 %v3470_v56, %v268_v4  ;;  %v387_v10 = vadd.f32 %v3479_v61, %v326_v2  ;;  %v271_v11 = vld [vmem:[%s3464_s24 + $0x38] sm:$0xff]  ;;  %v270_v12 = vld [vmem:[%s3464_s24 + $0x30] sm:$0xff] }
  0x1c   : > { %v442_v8 = vmax.f32 %v388_v0, 0.0 }
  0x1d   : > { %v440_v9 = vmax.f32 %v386_v1, 0.0  ;;  %v278_v1 = vld [vmem:[%s3464_s24 + $0x70] sm:$0x3] }
  0x1f   : > { %615 = vperm.xlu1 %3228, %v507_v13   ;;  %610 = vperm.xlu0 %3227, %v506_v14  }
  0x23   : > { %625 = vperm.xlu1 %3228, %v509_v15   ;;  %620 = vperm.xlu0 %3227, %v508_v16   ;;  %v443_v15 = vmax.f32 %v389_v5, 0.0  ;;  %v391_v16 = vadd.f32 %v3479_v61, %v330_v6 }
  0x27   : > { %635 = vperm.xlu1 %3228, %v511_v17   ;;  %630 = vperm.xlu0 %3227, %v510_v18   ;;  %v390_v17 = vadd.f32 %v3479_v61, %v329_v7  ;;  %v332_v18 = vmul.f32 %v3470_v56, %v271_v11 }
  0x2b   : > { %645 = vperm.xlu1 %3228, %v513_v19   ;;  %640 = vperm.xlu0 %3227, %v512_v20  }
  0x2f   : > { %655 = vperm.xlu1 %3228, %v515_v21   ;;  %650 = vperm.xlu0 %3227, %v514_v22   ;;  %v441_v21 = vmax.f32 %v387_v10, 0.0  ;;  %v331_v22 = vmul.f32 %v3470_v56, %v270_v12 }
  0x33   : > { %665 = vperm.xlu1 %3228, %v517_v23   ;;  %660 = vperm.xlu0 %3227, %v516_v24   ;;  %v273_v23 = vld [vmem:[%s3464_s24 + $0x48] sm:$0xff]  ;;  %v272_v24 = vld [vmem:[%s3464_s24 + $0x40] sm:$0x3] }
  0x37   : > { %675 = vperm.xlu1 %3228, %v519_v25   ;;  %670 = vperm.xlu0 %3227, %v518_v26  }
  0x3b   : > { %685 = vperm.xlu1 %3228, %v521_v27   ;;  %680 = vperm.xlu0 %3227, %v520_v28   ;;  %v445_v27 = vmax.f32 %v391_v16, 0.0  ;;  %v444_v28 = vmax.f32 %v390_v17, 0.0  ;;  %v280_v17 = vld [vmem:[%s3464_s24 + $0x80] sm:$0xff] }
  0x3f   : > { %695 = vperm.xlu1 %3228, %v523_v29   ;;  %690 = vperm.xlu0 %3227, %v522_v30   ;;  %v393_v29 = vadd.f32 %v3479_v61, %v332_v18  ;;  %v334_v30 = vmul.f32 %v3470_v56, %v273_v23 }
  0x43   : > { %705 = vperm.xlu1 %3228, %v525_v31   ;;  %700 = vperm.xlu0 %3227, %v524_v32  }
  0x47   : > { %715 = vperm.xlu1 %3228, %v527_v33   ;;  %710 = vperm.xlu0 %3227, %v526_v34   ;;  %v392_v33 = vadd.f32 %v3479_v61, %v331_v22  ;;  %v333_v34 = vmul.f32 %v3470_v56, %v272_v24 }
  0x4b   : > { %725 = vperm.xlu1 %3228, %v529_v35   ;;  %720 = vperm.xlu0 %3227, %v528_v36   ;;  %v275_v35 = vld [vmem:[%s3464_s24 + $0x58] sm:$0x3]  ;;  %v274_v36 = vld [vmem:[%s3464_s24 + $0x50] sm:$0xff] }
  0x4f   : > { %735 = vperm.xlu1 %3228, %v531_v37   ;;  %730 = vperm.xlu0 %3227, %v530_v38  }
  0x53   : > { %745 = vperm.xlu1 %3228, %v533_v39   ;;  %740 = vperm.xlu0 %3227, %v532_v40   ;;  %v447_v39 = vmax.f32 %v393_v29, 0.0  ;;  %v395_v40 = vadd.f32 %v3479_v61, %v334_v30  ;;  %v283_v29 = vld [vmem:[%s3464_s24 + $0x98] sm:$0xff]  ;;  %v282_v30 = vld [vmem:[%s3464_s24 + $0x90] sm:$0xff] }
  0x57   : > { %755 = vperm.xlu1 %3228, %v535_v41   ;;  %750 = vperm.xlu0 %3227, %v534_v42   ;;  %v336_v41 = vmul.f32 %v3470_v56, %v275_v35  ;;  %v335_v42 = vmul.f32 %v3470_v56, %v274_v36 }
  0x59   : > { %v396_v60 = vadd.f32 %v3479_v61, %v335_v42 }
  0x5b   : > { %765 = vperm.xlu1 %3228, %v537_v43   ;;  %760 = vperm.xlu0 %3227, %v536_v44   ;;  %v450_v12 = vmax.f32 %v396_v60, 0.0 }
  0x5f   : > { %775 = vperm.xlu1 %3228, %v539_v45   ;;  %770 = vperm.xlu0 %3227, %v538_v46   ;;  %v446_v45 = vmax.f32 %v392_v33, 0.0  ;;  %v394_v46 = vadd.f32 %v3479_v61, %v333_v34 }
  0x61   : > { %v448_v59 = vmax.f32 %v394_v46, 0.0 }
  0x63   : > { %785 = vperm.xlu1 %3228, %v541_v47   ;;  %780 = vperm.xlu0 %3227, %v540_v48   ;;  %v277_v47 = vld [vmem:[%s3464_s24 + $0x68] sm:$0xff]  ;;  %v276_v48 = vld [vmem:[%s3464_s24 + $0x60] sm:$0xff] }
  0x64   : > { %v337_v55 = vmul.f32 %v3470_v56, %v276_v48 }
  0x67   : > { %795 = vperm.xlu1 %3228, %v543_v49   ;;  %790 = vperm.xlu0 %3227, %v542_v50  }
  0x6b   : > { %805 = vperm.xlu1 %3228, %v545_v51   ;;  %800 = vperm.xlu0 %3227, %v544_v52   ;;  %v449_v52 = vmax.f32 %v395_v40, 0.0 }
  0x6f   : > { %815 = vperm.xlu1 %3228, %v547_v53   ;;  %810 = vperm.xlu0 %3227, %v546_v54   ;;  %v397_v53 = vadd.f32 %v3479_v61, %v336_v41  ;;  %v338_v54 = vmul.f32 %v3470_v56, %v277_v47 }
  0x71   : > { %v451_v6 = vmax.f32 %v397_v53, 0.0  ;;  %v399_v7 = vadd.f32 %v3479_v61, %v338_v54 }
  0x86   : > { %v561_v13 = vpop.permute.xlu1 %560  ;;  %v551_v14 = vpop.permute.xlu0 %550 }
  0x87   : > { %v820_v19 = vmul.f32 %v561_v13, %v442_v8  ;;  %v818_v20 = vmul.f32 %v551_v14, %v440_v9  ;;  %v398_v8 = vadd.f32 %v3479_v61, %v337_v55  ;;  %v340_v9 = vmul.f32 %v3470_v56, %v279_v62  ;;  %v281_v14 = vld [vmem:[%s3464_s24 + $0x88] sm:$0x3] }
  0x88   : > { %v339_v13 = vmul.f32 %v3470_v56, %v278_v1  ;;  %v342_v24 = vmul.f32 %v3470_v56, %v281_v14 }
  0x89   : > { %876 = vst.msk [vmem:[#allocation2 + $0x10] sm:$0x3] %vm875_vm0, %v820_v19  ;;  %v452_v22 = vmax.f32 %v398_v8, 0.0  ;;  %v401_v23 = vadd.f32 %v3479_v61, %v340_v9 }
  0x8a   : > { %873 = vst.msk [vmem:[#allocation2] sm:$0xff] %vm872_vm1, %v818_v20  ;;  %v566_v25 = vpop.permute.xlu1 %565  ;;  %v556_v26 = vpop.permute.xlu0 %555 }
  0x8b   : > { %v821_v31 = vmul.f32 %v566_v25, %v443_v15  ;;  %v819_v32 = vmul.f32 %v556_v26, %v441_v21  ;;  %v453_v21 = vmax.f32 %v399_v7, 0.0  ;;  %v455_v36 = vmax.f32 %v401_v23, 0.0 }
  0x8d   : > { %877 = vst.msk [vmem:[#allocation2 + $0x18] sm:$0xff] %vm872_vm1, %v821_v31  ;;  %874 = vst.msk [vmem:[#allocation2 + $0x8] sm:$0xff] %vm872_vm1, %v819_v32 }
  0x8e   : > { %v576_v37 = vpop.permute.xlu1 %575  ;;  %v571_v38 = vpop.permute.xlu0 %570 }
  0x8f   : > { %v823_v43 = vmul.f32 %v576_v37, %v445_v27  ;;  %v822_v44 = vmul.f32 %v571_v38, %v444_v28  ;;  %v400_v27 = vadd.f32 %v3479_v61, %v339_v13  ;;  %v341_v28 = vmul.f32 %v3470_v56, %v280_v17  ;;  %v288_v13 = vld [vmem:[%s3464_s24 + $0xc0] sm:$0xff] }
  0x90   : > { %v403_v37 = vadd.f32 %v3479_v61, %v342_v24  ;;  %v344_v38 = vmul.f32 %v3470_v56, %v283_v29  ;;  %v349_v23 = vmul.f32 %v3470_v56, %v288_v13  ;;  %v290_v29 = vld [vmem:[%s3464_s24 + $0xd0] sm:$0x3] }
  0x91   : > { %v928_v49 = vld [vmem:[#allocation2] sm:$0xff]  ;;  %879 = vst.msk [vmem:[#allocation2 + $0x28] sm:$0x3] %vm875_vm0, %v823_v43  ;;  %v454_v42 = vmax.f32 %v400_v27, 0.0  ;;  %v402_v43 = vadd.f32 %v3479_v61, %v341_v28  ;;  %v291_v28 = vld [vmem:[%s3464_s24 + $0xd8] sm:$0xff] }
  0x92   : > { %878 = vst.msk [vmem:[#allocation2 + $0x20] sm:$0xff] %vm872_vm1, %v822_v44  ;;  %960 = vst.msk [vmem:[#allocation3] sm:$0xff] %vm872_vm1, %v928_v49  ;;  %v586_v50 = vpop.permute.xlu1 %585  ;;  %v581_v51 = vpop.permute.xlu0 %580  ;;  %v285_v44 = vld [vmem:[%s3464_s24 + $0xa8] sm:$0xff] }
  0x93   : > { %v825_v57 = vmul.f32 %v586_v50, %v447_v39  ;;  %v824_v58 = vmul.f32 %v581_v51, %v446_v45  ;;  %v343_v39 = vmul.f32 %v3470_v56, %v282_v30  ;;  %v284_v45 = vld [vmem:[%s3464_s24 + $0xa0] sm:$0x3]  ;;  %v405_v50 = vadd.f32 %v3479_v61, %v344_v38 }
  0x94   : > { %v993_v63 = vld [vmem:[#allocation2 + $0x9] sm:$0xff]  ;;  %v992_v0 = vld [vmem:[#allocation2 + $0x1] sm:$0xff]  ;;  %v3529_v3 = vld [vmem:[#allocation2 + $0x18] sm:$0xff]  ;;  %v345_v53 = vmul.f32 %v3470_v56, %v284_v45  ;;  %v352_v38 = vmul.f32 %v3470_v56, %v291_v28 }
  0x95   : > { %881 = vst.msk [vmem:[#allocation2 + $0x38] sm:$0xff] %vm872_vm1, %v825_v57  ;;  %880 = vst.msk [vmem:[#allocation2 + $0x30] sm:$0xff] %vm872_vm1, %v824_v58  ;;  %1058 = vrot.lane.b32.xlu1 %v993_v63, %s3241_s29  ;;  %1056 = vrot.lane.b32.xlu0 %v992_v0, %s3241_s29  ;;  %v929_v2 = vld [vmem:[#allocation2 + $0x8] sm:$0xff]  ;;  %v404_v51 = vadd.f32 %v3479_v61, %v343_v39  ;;  %v457_v57 = vmax.f32 %v403_v37, 0.0  ;;  %v456_v58 = vmax.f32 %v402_v43, 0.0  ;;  %v286_v63 = vld [vmem:[%s3464_s24 + $0xb0] sm:$0xff] }
  0x96   : > { %v596_v4 = vpop.permute.xlu1 %595  ;;  %v591_v5 = vpop.permute.xlu0 %590  ;;  %961 = vst.msk [vmem:[#allocation3 + $0x8] sm:$0xff] %vm872_vm1, %v929_v2  ;;  %962 = vst.msk [vmem:[#allocation3 + $0x10] sm:$0xff] %vm872_vm1, %v3529_v3  ;;  %v406_v7 = vadd.f32 %v3479_v61, %v345_v53  ;;  %v410_v37 = vadd.f32 %v3479_v61, %v349_v23  ;;  %v351_v39 = vmul.f32 %v3470_v56, %v290_v29 }
  0x97   : > { %v827_v10 = vmul.f32 %v596_v4, %v449_v52  ;;  %v826_v11 = vmul.f32 %v591_v5, %v448_v59  ;;  %v346_v52 = vmul.f32 %v3470_v56, %v285_v44  ;;  %v287_v59 = vld [vmem:[%s3464_s24 + $0xb8] sm:$0x3]  ;;  %v459_v4 = vmax.f32 %v405_v50, 0.0  ;;  %v293_v44 = vld [vmem:[%s3464_s24 + $0xe8] sm:$0x3] }
  0x98   : > { %v458_v5 = vmax.f32 %v404_v51, 0.0  ;;  %v464_v53 = vmax.f32 %v410_v37, 0.0 }
  0x99   : > { %v995_v15 = vld [vmem:[#allocation2 + $0x21] sm:$0xff]  ;;  %v994_v16 = vld [vmem:[#allocation2 + $0x19] sm:$0xff]  ;;  %883 = vst.msk [vmem:[#allocation2 + $0x48] sm:$0xff] %vm872_vm1, %v827_v10  ;;  %v348_v10 = vmul.f32 %v3470_v56, %v287_v59  ;;  %v354_v59 = vmul.f32 %v3470_v56, %v293_v44 }
  0x9a   : > { %882 = vst.msk [vmem:[#allocation2 + $0x40] sm:$0x3] %vm875_vm0, %v826_v11  ;;  %1062 = vrot.lane.b32.xlu1 %v995_v15, %s3241_s29  ;;  %1060 = vrot.lane.b32.xlu0 %v994_v16, %s3241_s29  ;;  %v3544_v18 = vld [vmem:[#allocation2 + $0x20] sm:$0xff]  ;;  %v606_v19 = vpop.permute.xlu1 %605  ;;  %v601_v20 = vpop.permute.xlu0 %600  ;;  %v347_v11 = vmul.f32 %v3470_v56, %v286_v63  ;;  %v294_v63 = vld [vmem:[%s3464_s24 + $0xf0] sm:$0xff] }
  0x9b   : > { %963 = vst.msk [vmem:[#allocation3 + $0x18] sm:$0xff] %vm872_vm1, %v3544_v18  ;;  %v829_v25 = vmul.f32 %v606_v19, %v451_v6  ;;  %v828_v26 = vmul.f32 %v601_v20, %v450_v12  ;;  %v407_v6 = vadd.f32 %v3479_v61, %v346_v52  ;;  %v289_v12 = vld [vmem:[%s3464_s24 + $0xc8] sm:$0xff]  ;;  %v415_v13 = vadd.f32 %v3479_v61, %v354_v59 }
  0x9c   : > { %v996_v31 = vld [vmem:[#allocation2 + $0x31] sm:$0xff]  ;;  %v408_v27 = vadd.f32 %v3479_v61, %v347_v11 }
  0x9d   : > { %v3554_v32 = vld [vmem:[#allocation2 + $0x30] sm:$0xff]  ;;  %885 = vst.msk [vmem:[#allocation2 + $0x58] sm:$0x3] %vm875_vm0, %v829_v25  ;;  %v3561_v33 = vld [vmem:[#allocation2 + $0x38] sm:$0xff]  ;;  %v461_v20 = vmax.f32 %v407_v6, 0.0 }
  0x9e   : > { %884 = vst.msk [vmem:[#allocation2 + $0x50] sm:$0xff] %vm872_vm1, %v828_v26  ;;  %1064 = vrot.lane.b32.xlu0 %v996_v31, %s3241_s29  ;;  %964 = vst.msk [vmem:[#allocation3 + $0x20] sm:$0xff] %vm872_vm1, %v3554_v32  ;;  %v616_v34 = vpop.permute.xlu1 %615  ;;  %v611_v35 = vpop.permute.xlu0 %610  ;;  %v409_v26 = vadd.f32 %v3479_v61, %v348_v10  ;;  %v462_v43 = vmax.f32 %v408_v27, 0.0  ;;  %v355_v10 = vmul.f32 %v3470_v56, %v294_v63 }
  0x9f   : > { %965 = vst.msk [vmem:[#allocation3 + $0x28] sm:$0xff] %vm872_vm1, %v3561_v33  ;;  %v831_v40 = vmul.f32 %v616_v34, %v453_v21  ;;  %v830_v41 = vmul.f32 %v611_v35, %v452_v22  ;;  %v460_v21 = vmax.f32 %v406_v7, 0.0  ;;  %v350_v22 = vmul.f32 %v3470_v56, %v289_v12 }
  0xa0   : > { %v3571_v47 = vld [vmem:[#allocation2 + $0x48] sm:$0xff] }
  0xa1   : > { %v997_v46 = vld [vmem:[#allocation2 + $0x39] sm:$0xff]  ;;  %887 = vst.msk [vmem:[#allocation2 + $0x68] sm:$0xff] %vm872_vm1, %v831_v40  ;;  %886 = vst.msk [vmem:[#allocation2 + $0x60] sm:$0xff] %vm872_vm1, %v830_v41 }
  0xa2   : > { %1066 = vrot.lane.b32.xlu1 %v997_v46, %s3241_s29  ;;  %966 = vst.msk [vmem:[#allocation3 + $0x30] sm:$0xff] %vm872_vm1, %v3571_v47  ;;  %v626_v48 = vpop.permute.xlu1 %625  ;;  %v621_v49 = vpop.permute.xlu0 %620 }
  0xa3   : > { %v833_v54 = vmul.f32 %v626_v48, %v455_v36  ;;  %v832_v55 = vmul.f32 %v621_v49, %v454_v42  ;;  %v411_v36 = vadd.f32 %v3479_v61, %v350_v22  ;;  %v463_v42 = vmax.f32 %v409_v26, 0.0  ;;  %v292_v48 = vld [vmem:[%s3464_s24 + $0xe0] sm:$0xff] }
  0xa5   : > { %v999_v60 = vld [vmem:[#allocation2 + $0x51] sm:$0xff]  ;;  %v998_v62 = vld [vmem:[#allocation2 + $0x49] sm:$0xff]  ;;  %889 = vst.msk [vmem:[#allocation2 + $0x78] sm:$0xff] %vm872_vm1, %v833_v54  ;;  %v465_v52 = vmax.f32 %v411_v36, 0.0  ;;  %v413_v54 = vadd.f32 %v3479_v61, %v352_v38 }
  0xa6   : > { %888 = vst.msk [vmem:[#allocation2 + $0x70] sm:$0x3] %vm875_vm0, %v832_v55  ;;  %1070 = vrot.lane.b32.xlu1 %v999_v60, %s3241_s29  ;;  %1068 = vrot.lane.b32.xlu0 %v998_v62, %s3241_s29  ;;  %v3588_v0 = vld [vmem:[#allocation2 + $0x50] sm:$0xff]  ;;  %v636_v1 = vpop.permute.xlu1 %635  ;;  %v631_v2 = vpop.permute.xlu0 %630  ;;  %v412_v55 = vadd.f32 %v3479_v61, %v351_v39  ;;  %v353_v60 = vmul.f32 %v3470_v56, %v292_v48  ;;  %v295_v62 = vld [vmem:[%s3464_s24 + $0xf8] sm:$0xff] }
  0xa7   : > { %967 = vst.msk [vmem:[#allocation3 + $0x38] sm:$0xff] %vm872_vm1, %v3588_v0  ;;  %v835_v8 = vmul.f32 %v636_v1, %v457_v57  ;;  %v834_v9 = vmul.f32 %v631_v2, %v456_v58  ;;  %v467_v7 = vmax.f32 %v413_v54, 0.0  ;;  %v298_v38 = vld [vmem:[%s3464_s24 + $0x110] sm:$0xff] }
  0xa8   : > { %v1000_v14 = vld [vmem:[#allocation2 + $0x61] sm:$0xff] }
  0xa9   : > { %v3598_v15 = vld [vmem:[#allocation2 + $0x60] sm:$0xff]  ;;  %891 = vst.msk [vmem:[#allocation2 + $0x88] sm:$0x3] %vm875_vm0, %v835_v8  ;;  %v3605_v16 = vld [vmem:[#allocation2 + $0x68] sm:$0xff]  ;;  %v466_v8 = vmax.f32 %v412_v55, 0.0 }
  0xaa   : > { %890 = vst.msk [vmem:[#allocation2 + $0x80] sm:$0xff] %vm872_vm1, %v834_v9  ;;  %1072 = vrot.lane.b32.xlu0 %v1000_v14, %s3241_s29  ;;  %968 = vst.msk [vmem:[#allocation3 + $0x40] sm:$0xff] %vm872_vm1, %v3598_v15  ;;  %v646_v17 = vpop.permute.xlu1 %645  ;;  %v641_v19 = vpop.permute.xlu0 %640  ;;  %v356_v9 = vmul.f32 %v3470_v56, %v295_v62  ;;  %v414_v14 = vadd.f32 %v3479_v61, %v353_v60 }
  0xab   : > { %969 = vst.msk [vmem:[#allocation3 + $0x48] sm:$0xff] %vm872_vm1, %v3605_v16  ;;  %v837_v24 = vmul.f32 %v646_v17, %v459_v4  ;;  %v836_v25 = vmul.f32 %v641_v19, %v458_v5  ;;  %v297_v17 = vld [vmem:[%s3464_s24 + $0x108] sm:$0xff]  ;;  %v296_v19 = vld [vmem:[%s3464_s24 + $0x100] sm:$0x3] }
  0xac   : > { %v3615_v31 = vld [vmem:[#allocation2 + $0x78] sm:$0xff]  ;;  %v358_v26 = vmul.f32 %v3470_v56, %v297_v17  ;;  %v357_v27 = vmul.f32 %v3470_v56, %v296_v19 }
  0xad   : > { %v1001_v30 = vld [vmem:[#allocation2 + $0x69] sm:$0xff]  ;;  %893 = vst.msk [vmem:[#allocation2 + $0x98] sm:$0xff] %vm872_vm1, %v837_v24  ;;  %892 = vst.msk [vmem:[#allocation2 + $0x90] sm:$0xff] %vm872_vm1, %v836_v25  ;;  %v417_v24 = vadd.f32 %v3479_v61, %v356_v9  ;;  %v416_v25 = vadd.f32 %v3479_v61, %v355_v10  ;;  %v303_v9 = vld [vmem:[%s3464_s24 + $0x138] sm:$0xff] }
  0xae   : > { %1074 = vrot.lane.b32.xlu1 %v1001_v30, %s3241_s29  ;;  %970 = vst.msk [vmem:[#allocation3 + $0x50] sm:$0xff] %vm872_vm1, %v3615_v31  ;;  %v656_v34 = vpop.permute.xlu1 %655  ;;  %v651_v35 = vpop.permute.xlu0 %650  ;;  %v469_v30 = vmax.f32 %v415_v13, 0.0  ;;  %v419_v44 = vadd.f32 %v3479_v61, %v358_v26  ;;  %v302_v10 = vld [vmem:[%s3464_s24 + $0x130] sm:$0x3] }
  0xaf   : > { %v839_v40 = vmul.f32 %v656_v34, %v461_v20  ;;  %v838_v41 = vmul.f32 %v651_v35, %v460_v21  ;;  %v468_v34 = vmax.f32 %v414_v14, 0.0  ;;  %v299_v35 = vld [vmem:[%s3464_s24 + $0x118] sm:$0x3] }
  0xb0   : > { %v473_v60 = vmax.f32 %v419_v44, 0.0 }
  0xb1   : > { %v1003_v45 = vld [vmem:[#allocation2 + $0x81] sm:$0xff]  ;;  %v1002_v46 = vld [vmem:[#allocation2 + $0x79] sm:$0xff]  ;;  %895 = vst.msk [vmem:[#allocation2 + $0xa8] sm:$0xff] %vm872_vm1, %v839_v40 }
  0xb2   : > { %894 = vst.msk [vmem:[#allocation2 + $0xa0] sm:$0x3] %vm875_vm0, %v838_v41  ;;  %1078 = vrot.lane.b32.xlu1 %v1003_v45, %s3241_s29  ;;  %1076 = vrot.lane.b32.xlu0 %v1002_v46, %s3241_s29  ;;  %v3632_v49 = vld [vmem:[#allocation2 + $0x80] sm:$0xff]  ;;  %v666_v50 = vpop.permute.xlu1 %665  ;;  %v661_v51 = vpop.permute.xlu0 %660  ;;  %v418_v45 = vadd.f32 %v3479_v61, %v357_v27  ;;  %v305_v27 = vld [vmem:[%s3464_s24 + $0x148] sm:$0x3] }
  0xb3   : > { %971 = vst.msk [vmem:[#allocation3 + $0x58] sm:$0xff] %vm872_vm1, %v3632_v49  ;;  %v841_v57 = vmul.f32 %v666_v50, %v463_v42  ;;  %v840_v58 = vmul.f32 %v661_v51, %v462_v43  ;;  %v471_v42 = vmax.f32 %v417_v24, 0.0  ;;  %v470_v43 = vmax.f32 %v416_v25, 0.0 }
  0xb4   : > { %v1004_v1 = vld [vmem:[#allocation2 + $0x91] sm:$0xff]  ;;  %v360_v50 = vmul.f32 %v3470_v56, %v299_v35  ;;  %v359_v51 = vmul.f32 %v3470_v56, %v298_v38  ;;  %v472_v62 = vmax.f32 %v418_v45, 0.0  ;;  %v366_v44 = vmul.f32 %v3470_v56, %v305_v27 }
  0xb5   : > { %v3642_v2 = vld [vmem:[#allocation2 + $0x90] sm:$0xff]  ;;  %897 = vst.msk [vmem:[#allocation2 + $0xb8] sm:$0x3] %vm875_vm0, %v841_v57  ;;  %v3649_v4 = vld [vmem:[#allocation2 + $0x98] sm:$0xff] }
  0xb6   : > { %896 = vst.msk [vmem:[#allocation2 + $0xb0] sm:$0xff] %vm872_vm1, %v840_v58  ;;  %1080 = vrot.lane.b32.xlu0 %v1004_v1, %s3241_s29  ;;  %972 = vst.msk [vmem:[#allocation3 + $0x60] sm:$0xff] %vm872_vm1, %v3642_v2  ;;  %v676_v5 = vpop.permute.xlu1 %675  ;;  %v671_v6 = vpop.permute.xlu0 %670 }
  0xb7   : > { %973 = vst.msk [vmem:[#allocation3 + $0x68] sm:$0xff] %vm872_vm1, %v3649_v4  ;;  %v843_v11 = vmul.f32 %v676_v5, %v465_v52  ;;  %v842_v12 = vmul.f32 %v671_v6, %v464_v53  ;;  %v301_v52 = vld [vmem:[%s3464_s24 + $0x128] sm:$0xff]  ;;  %v300_v53 = vld [vmem:[%s3464_s24 + $0x120] sm:$0xff] }
  0xb8   : > { %v3659_v21 = vld [vmem:[#allocation2 + $0xa8] sm:$0xff]  ;;  %v362_v63 = vmul.f32 %v3470_v56, %v301_v52  ;;  %v361_v1 = vmul.f32 %v3470_v56, %v300_v53 }
  0xb9   : > { %v1005_v20 = vld [vmem:[#allocation2 + $0x99] sm:$0xff]  ;;  %899 = vst.msk [vmem:[#allocation2 + $0xc8] sm:$0xff] %vm872_vm1, %v843_v11  ;;  %898 = vst.msk [vmem:[#allocation2 + $0xc0] sm:$0xff] %vm872_vm1, %v842_v12 }
  0xba   : > { %1082 = vrot.lane.b32.xlu1 %v1005_v20, %s3241_s29  ;;  %974 = vst.msk [vmem:[#allocation3 + $0x70] sm:$0xff] %vm872_vm1, %v3659_v21  ;;  %v686_v22 = vpop.permute.xlu1 %685  ;;  %v681_v23 = vpop.permute.xlu0 %680  ;;  %v423_v17 = vadd.f32 %v3479_v61, %v362_v63  ;;  %v422_v19 = vadd.f32 %v3479_v61, %v361_v1  ;;  %v364_v20 = vmul.f32 %v3470_v56, %v303_v9 }
  0xbb   : > { %v845_v28 = vmul.f32 %v686_v22, %v467_v7  ;;  %v844_v29 = vmul.f32 %v681_v23, %v466_v8  ;;  %v421_v7 = vadd.f32 %v3479_v61, %v360_v50  ;;  %v420_v8 = vadd.f32 %v3479_v61, %v359_v51 }
  0xbc   : > { %v363_v22 = vmul.f32 %v3470_v56, %v302_v10  ;;  %v476_v38 = vmax.f32 %v422_v19, 0.0 }
  0xbd   : > { %v1007_v36 = vld [vmem:[#allocation2 + $0xb1] sm:$0xff]  ;;  %v1006_v37 = vld [vmem:[#allocation2 + $0xa9] sm:$0xff]  ;;  %901 = vst.msk [vmem:[#allocation2 + $0xd8] sm:$0xff] %vm872_vm1, %v845_v28  ;;  %v475_v25 = vmax.f32 %v421_v7, 0.0  ;;  %v474_v26 = vmax.f32 %v420_v8, 0.0 }
  0xbe   : > { %900 = vst.msk [vmem:[#allocation2 + $0xd0] sm:$0x3] %vm875_vm0, %v844_v29  ;;  %1086 = vrot.lane.b32.xlu1 %v1007_v36, %s3241_s29  ;;  %1084 = vrot.lane.b32.xlu0 %v1006_v37, %s3241_s29  ;;  %v3676_v39 = vld [vmem:[#allocation2 + $0xb0] sm:$0xff]  ;;  %v696_v40 = vpop.permute.xlu1 %695  ;;  %v691_v41 = vpop.permute.xlu0 %690  ;;  %v477_v37 = vmax.f32 %v423_v17, 0.0  ;;  %v309_v7 = vld [vmem:[%s3464_s24 + $0x168] sm:$0xff] }
  0xbf   : > { %975 = vst.msk [vmem:[#allocation3 + $0x78] sm:$0xff] %vm872_vm1, %v3676_v39  ;;  %v847_v46 = vmul.f32 %v696_v40, %v469_v30  ;;  %v846_v48 = vmul.f32 %v691_v41, %v468_v34  ;;  %v304_v30 = vld [vmem:[%s3464_s24 + $0x140] sm:$0xff]  ;;  %v425_v40 = vadd.f32 %v3479_v61, %v364_v20  ;;  %v424_v41 = vadd.f32 %v3479_v61, %v363_v22 }
  0xc0   : > { %v1008_v54 = vld [vmem:[#allocation2 + $0xc1] sm:$0xff]  ;;  %v365_v45 = vmul.f32 %v3470_v56, %v304_v30  ;;  %v370_v19 = vmul.f32 %v3470_v56, %v309_v7 }
  0xc1   : > { %v3686_v55 = vld [vmem:[#allocation2 + $0xc0] sm:$0xff]  ;;  %903 = vst.msk [vmem:[#allocation2 + $0xe8] sm:$0x3] %vm875_vm0, %v847_v46  ;;  %v3693_v57 = vld [vmem:[#allocation2 + $0xc8] sm:$0xff]  ;;  %v307_v46 = vld [vmem:[%s3464_s24 + $0x158] sm:$0xff] }
  0xc2   : > { %902 = vst.msk [vmem:[#allocation2 + $0xe0] sm:$0xff] %vm872_vm1, %v846_v48  ;;  %1088 = vrot.lane.b32.xlu0 %v1008_v54, %s3241_s29  ;;  %976 = vst.msk [vmem:[#allocation3 + $0x80] sm:$0xff] %vm872_vm1, %v3686_v55  ;;  %v706_v58 = vpop.permute.xlu1 %705  ;;  %v701_v59 = vpop.permute.xlu0 %700  ;;  %v306_v48 = vld [vmem:[%s3464_s24 + $0x150] sm:$0xff]  ;;  %v308_v8 = vld [vmem:[%s3464_s24 + $0x160] sm:$0x3] }
  0xc3   : > { %977 = vst.msk [vmem:[#allocation3 + $0x88] sm:$0xff] %vm872_vm1, %v3693_v57  ;;  %v849_v5 = vmul.f32 %v706_v58, %v471_v42  ;;  %v848_v6 = vmul.f32 %v701_v59, %v470_v43  ;;  %v479_v58 = vmax.f32 %v425_v40, 0.0  ;;  %v478_v59 = vmax.f32 %v424_v41, 0.0 }
  0xc4   : > { %v3703_v12 = vld [vmem:[#allocation2 + $0xd8] sm:$0xff]  ;;  %v369_v20 = vmul.f32 %v3470_v56, %v308_v8  ;;  %v431_v40 = vadd.f32 %v3479_v61, %v370_v19 }
  0xc5   : > { %v1009_v11 = vld [vmem:[#allocation2 + $0xc9] sm:$0xff]  ;;  %905 = vst.msk [vmem:[#allocation2 + $0xf8] sm:$0xff] %vm872_vm1, %v849_v5  ;;  %904 = vst.msk [vmem:[#allocation2 + $0xf0] sm:$0xff] %vm872_vm1, %v848_v6  ;;  %v427_v5 = vadd.f32 %v3479_v61, %v366_v44  ;;  %v426_v6 = vadd.f32 %v3479_v61, %v365_v45 }
  0xc6   : > { %1090 = vrot.lane.b32.xlu1 %v1009_v11, %s3241_s29  ;;  %978 = vst.msk [vmem:[#allocation3 + $0x90] sm:$0xff] %vm872_vm1, %v3703_v12  ;;  %v716_v13 = vpop.permute.xlu1 %715  ;;  %v711_v14 = vpop.permute.xlu0 %710  ;;  %v430_v41 = vadd.f32 %v3479_v61, %v369_v20 }
  0xc7   : > { %v851_v23 = vmul.f32 %v716_v13, %v473_v60  ;;  %v850_v24 = vmul.f32 %v711_v14, %v472_v62  ;;  %v368_v60 = vmul.f32 %v3470_v56, %v307_v46  ;;  %v367_v62 = vmul.f32 %v3470_v56, %v306_v48  ;;  %v313_v46 = vld [vmem:[%s3464_s24 + $0x188] sm:$0xff]  ;;  %v312_v48 = vld [vmem:[%s3464_s24 + $0x180] sm:$0xff] }
  0xc9   : > { %v1011_v28 = vld [vmem:[#allocation2 + $0xe1] sm:$0xff]  ;;  %v1010_v29 = vld [vmem:[#allocation2 + $0xd9] sm:$0xff]  ;;  %907 = vst.msk [vmem:[#allocation2 + $0x108] sm:$0xff] %vm872_vm1, %v851_v23  ;;  %v429_v14 = vadd.f32 %v3479_v61, %v368_v60  ;;  %v428_v17 = vadd.f32 %v3479_v61, %v367_v62  ;;  %v485_v60 = vmax.f32 %v431_v40, 0.0  ;;  %v484_v62 = vmax.f32 %v430_v41, 0.0 }
  0xca   : > { %906 = vst.msk [vmem:[#allocation2 + $0x100] sm:$0x3] %vm875_vm0, %v850_v24  ;;  %1094 = vrot.lane.b32.xlu1 %v1011_v28, %s3241_s29  ;;  %1092 = vrot.lane.b32.xlu0 %v1010_v29, %s3241_s29  ;;  %v3720_v34 = vld [vmem:[#allocation2 + $0xe0] sm:$0xff]  ;;  %v726_v35 = vpop.permute.xlu1 %725  ;;  %v721_v36 = vpop.permute.xlu0 %720  ;;  %v481_v24 = vmax.f32 %v427_v5, 0.0  ;;  %v310_v29 = vld [vmem:[%s3464_s24 + $0x170] sm:$0xff] }
  0xcb   : > { %979 = vst.msk [vmem:[#allocation3 + $0x98] sm:$0xff] %vm872_vm1, %v3720_v34  ;;  %v853_v42 = vmul.f32 %v726_v35, %v475_v25  ;;  %v852_v43 = vmul.f32 %v721_v36, %v474_v26  ;;  %v480_v25 = vmax.f32 %v426_v6, 0.0  ;;  %v311_v26 = vld [vmem:[%s3464_s24 + $0x178] sm:$0x3]  ;;  %v371_v45 = vmul.f32 %v3470_v56, %v310_v29  ;;  %v317_v29 = vld [vmem:[%s3464_s24 + $0x1a8] sm:$0x3] }
  0xcc   : > { %v1012_v50 = vld [vmem:[#allocation2 + $0xf1] sm:$0xff]  ;;  %v372_v44 = vmul.f32 %v3470_v56, %v311_v26 }
  0xcd   : > { %v3730_v51 = vld [vmem:[#allocation2 + $0xf0] sm:$0xff]  ;;  %909 = vst.msk [vmem:[#allocation2 + $0x118] sm:$0x3] %vm875_vm0, %v853_v42  ;;  %v3737_v52 = vld [vmem:[#allocation2 + $0xf8] sm:$0xff]  ;;  %v432_v8 = vadd.f32 %v3479_v61, %v371_v45 }
  0xce   : > { %908 = vst.msk [vmem:[#allocation2 + $0x110] sm:$0xff] %vm872_vm1, %v852_v43  ;;  %1096 = vrot.lane.b32.xlu0 %v1012_v50, %s3241_s29  ;;  %980 = vst.msk [vmem:[#allocation3 + $0xa0] sm:$0xff] %vm872_vm1, %v3730_v51  ;;  %v736_v53 = vpop.permute.xlu1 %735  ;;  %v731_v54 = vpop.permute.xlu0 %730  ;;  %v433_v7 = vadd.f32 %v3479_v61, %v372_v44 }
  0xcf   : > { %981 = vst.msk [vmem:[#allocation3 + $0xa8] sm:$0xff] %vm872_vm1, %v3737_v52  ;;  %v855_v63 = vmul.f32 %v736_v53, %v477_v37  ;;  %v854_v1 = vmul.f32 %v731_v54, %v476_v38  ;;  %v483_v37 = vmax.f32 %v429_v14, 0.0  ;;  %v482_v38 = vmax.f32 %v428_v17, 0.0 }
  0xd0   : > { %v3747_v10 = vld [vmem:[#allocation2 + $0x108] sm:$0xff] }
  0xd1   : > { %v1013_v9 = vld [vmem:[#allocation2 + $0xf9] sm:$0xff]  ;;  %911 = vst.msk [vmem:[#allocation2 + $0x128] sm:$0xff] %vm872_vm1, %v855_v63  ;;  %910 = vst.msk [vmem:[#allocation2 + $0x120] sm:$0xff] %vm872_vm1, %v854_v1  ;;  %v374_v63 = vmul.f32 %v3470_v56, %v313_v46  ;;  %v373_v1 = vmul.f32 %v3470_v56, %v312_v48 }
  0xd2   : > { %1098 = vrot.lane.b32.xlu1 %v1013_v9, %s3241_s29  ;;  %982 = vst.msk [vmem:[#allocation3 + $0xb0] sm:$0xff] %vm872_vm1, %v3747_v10  ;;  %v746_v11 = vpop.permute.xlu1 %745  ;;  %v741_v13 = vpop.permute.xlu0 %740  ;;  %v315_v9 = vld [vmem:[%s3464_s24 + $0x198] sm:$0xff] }
  0xd3   : > { %v857_v22 = vmul.f32 %v746_v11, %v479_v58  ;;  %v856_v23 = vmul.f32 %v741_v13, %v478_v59  ;;  %v314_v11 = vld [vmem:[%s3464_s24 + $0x190] sm:$0x3]  ;;  %v435_v20 = vadd.f32 %v3479_v61, %v374_v63 }
  0xd5   : > { %v1015_v27 = vld [vmem:[#allocation2 + $0x111] sm:$0xff]  ;;  %v1014_v28 = vld [vmem:[#allocation2 + $0x109] sm:$0xff]  ;;  %913 = vst.msk [vmem:[#allocation2 + $0x138] sm:$0xff] %vm872_vm1, %v857_v22  ;;  %v434_v22 = vadd.f32 %v3479_v61, %v373_v1 }
  0xd6   : > { %912 = vst.msk [vmem:[#allocation2 + $0x130] sm:$0x3] %vm875_vm0, %v856_v23  ;;  %1102 = vrot.lane.b32.xlu1 %v1015_v27, %s3241_s29  ;;  %1100 = vrot.lane.b32.xlu0 %v1014_v28, %s3241_s29  ;;  %v3764_v30 = vld [vmem:[#allocation2 + $0x110] sm:$0xff]  ;;  %v756_v35 = vpop.permute.xlu1 %755  ;;  %v751_v36 = vpop.permute.xlu0 %750  ;;  %v376_v23 = vmul.f32 %v3470_v56, %v315_v9  ;;  %v487_v27 = vmax.f32 %v433_v7, 0.0  ;;  %v486_v28 = vmax.f32 %v432_v8, 0.0 }
  0xd7   : > { %983 = vst.msk [vmem:[#allocation3 + $0xb8] sm:$0xff] %vm872_vm1, %v3764_v30  ;;  %v859_v42 = vmul.f32 %v756_v35, %v481_v24  ;;  %v858_v43 = vmul.f32 %v751_v36, %v480_v25  ;;  %v375_v24 = vmul.f32 %v3470_v56, %v314_v11 }
  0xd8   : > { %v1016_v50 = vld [vmem:[#allocation2 + $0x121] sm:$0xff]  ;;  %v437_v44 = vadd.f32 %v3479_v61, %v376_v23 }
  0xd9   : > { %v3774_v53 = vld [vmem:[#allocation2 + $0x120] sm:$0xff]  ;;  %915 = vst.msk [vmem:[#allocation2 + $0x148] sm:$0x3] %vm875_vm0, %v859_v42  ;;  %v3781_v54 = vld [vmem:[#allocation2 + $0x128] sm:$0xff]  ;;  %v489_v42 = vmax.f32 %v435_v20, 0.0  ;;  %v436_v45 = vadd.f32 %v3479_v61, %v375_v24 }
  0xda   : > { %914 = vst.msk [vmem:[#allocation2 + $0x140] sm:$0xff] %vm872_vm1, %v858_v43  ;;  %1104 = vrot.lane.b32.xlu0 %v1016_v50, %s3241_s29  ;;  %984 = vst.msk [vmem:[#allocation3 + $0xc0] sm:$0xff] %vm872_vm1, %v3774_v53  ;;  %v766_v58 = vpop.permute.xlu1 %765  ;;  %v761_v59 = vpop.permute.xlu0 %760  ;;  %v488_v43 = vmax.f32 %v434_v22, 0.0  ;;  %v378_v50 = vmul.f32 %v3470_v56, %v317_v29 }
  0xdb   : > { %985 = vst.msk [vmem:[#allocation3 + $0xc8] sm:$0xff] %vm872_vm1, %v3781_v54  ;;  %v861_v5 = vmul.f32 %v766_v58, %v483_v37  ;;  %v860_v6 = vmul.f32 %v761_v59, %v482_v38  ;;  %v316_v37 = vld [vmem:[%s3464_s24 + $0x1a0] sm:$0xff]  ;;  %s4407_s24 = scalar_lea.vmem %s4609_s5, %s3143_s19 }
  0xdc   : > { %v954_v14 = vld [vmem:[#allocation2 + $0x138] sm:$0xff]  ;;  %v377_v58 = vmul.f32 %v3470_v56, %v316_v37  ;;  %v439_v56 = vadd.f32 %v3479_v61, %v378_v50  ;;  %v3830_v37 = vld [vmem:[#allocation2 + $0x22] sm:$0xff] }
  0xdd   : > { %v1017_v13 = vld [vmem:[#allocation2 + $0x129] sm:$0xff]  ;;  %917 = vst.msk [vmem:[#allocation2 + $0x158] sm:$0xff] %vm872_vm1, %v861_v5  ;;  %916 = vst.msk [vmem:[#allocation2 + $0x150] sm:$0xff] %vm872_vm1, %v860_v6  ;;  %v491_v5 = vmax.f32 %v437_v44, 0.0  ;;  %v490_v6 = vmax.f32 %v436_v45, 0.0 }
  0xde   : > { %1106 = vrot.lane.b32.xlu1 %v1017_v13, %s3241_s29  ;;  %986 = vst.msk [vmem:[#allocation3 + $0xd0] sm:$0xff] %vm872_vm1, %v954_v14  ;;  %v776_v17 = vpop.permute.xlu1 %775  ;;  %v771_v19 = vpop.permute.xlu0 %770  ;;  %v438_v9 = vadd.f32 %v3479_v61, %v377_v58  ;;  %v493_v22 = vmax.f32 %v439_v56, 0.0  ;;  %v3854_v44 = vld [vmem:[#allocation2 + $0x6a] sm:$0xff]  ;;  %v3856_v45 = vld [vmem:[#allocation2 + $0x62] sm:$0xff] }
  0xdf   : > { %v863_v25 = vmul.f32 %v776_v17, %v485_v60  ;;  %v862_v26 = vmul.f32 %v771_v19, %v484_v62 }
  0xe0   : > { %v492_v23 = vmax.f32 %v438_v9, 0.0  ;;  %v3900_v9 = vld [vmem:[#allocation2 + $0xe2] sm:$0xff] }
  0xe1   : > { %v1019_v35 = vld [vmem:[#allocation2 + $0x141] sm:$0xff]  ;;  %v1018_v36 = vld [vmem:[#allocation2 + $0x139] sm:$0xff]  ;;  %919 = vst.msk [vmem:[#allocation2 + $0x168] sm:$0xff] %vm872_vm1, %v863_v25 }
  0xe2   : > { %918 = vst.msk [vmem:[#allocation2 + $0x160] sm:$0x3] %vm875_vm0, %v862_v26  ;;  %1110 = vrot.lane.b32.xlu1 %v1019_v35, %s3241_s29  ;;  %1108 = vrot.lane.b32.xlu0 %v1018_v36, %s3241_s29  ;;  %v955_v38 = vld [vmem:[#allocation2 + $0x140] sm:$0xff]  ;;  %v786_v40 = vpop.permute.xlu1 %785  ;;  %v781_v41 = vpop.permute.xlu0 %780  ;;  %v1186_v35 = vld [vmem:[#allocation2 + $0xa] sm:$0xff] }
  0xe3   : > { %987 = vst.msk [vmem:[#allocation3 + $0xd8] sm:$0xff] %vm872_vm1, %v955_v38  ;;  %v865_v46 = vmul.f32 %v786_v40, %v487_v27  ;;  %v864_v48 = vmul.f32 %v781_v41, %v486_v28  ;;  %v1185_v36 = vld [vmem:[#allocation2 + $0x2] sm:$0xff]  ;;  %v3832_v38 = vld [vmem:[#allocation2 + $0x1a] sm:$0xff]  ;;  %v3840_v41 = vld [vmem:[#allocation2 + $0x32] sm:$0xff] }
  0xe4   : > { %v1020_v59 = vld [vmem:[#allocation2 + $0x151] sm:$0xff]  ;;  %v3838_v40 = vld [vmem:[#allocation2 + $0x3a] sm:$0xff] }
  0xe5   : > { %v956_v60 = vld [vmem:[#allocation2 + $0x150] sm:$0xff]  ;;  %921 = vst.msk [vmem:[#allocation2 + $0x178] sm:$0x3] %vm875_vm0, %v865_v46  ;;  %v957_v62 = vld [vmem:[#allocation2 + $0x158] sm:$0xff]  ;;  %v3862_v46 = vld [vmem:[#allocation2 + $0x82] sm:$0xff] }
  0xe6   : > { %920 = vst.msk [vmem:[#allocation2 + $0x170] sm:$0xff] %vm872_vm1, %v864_v48  ;;  %1112 = vrot.lane.b32.xlu0 %v1020_v59, %s3241_s29  ;;  %988 = vst.msk [vmem:[#allocation3 + $0xe0] sm:$0xff] %vm872_vm1, %v956_v60  ;;  %v796_v63 = vpop.permute.xlu1 %795  ;;  %v791_v1 = vpop.permute.xlu0 %790  ;;  %v3864_v48 = vld [vmem:[#allocation2 + $0x7a] sm:$0xff]  ;;  %v3874_v60 = vld [vmem:[#allocation2 + $0x92] sm:$0xff] }
  0xe7   : > { %989 = vst.msk [vmem:[#allocation3 + $0xe8] sm:$0xff] %vm872_vm1, %v957_v62  ;;  %v867_v7 = vmul.f32 %v796_v63, %v489_v42  ;;  %v866_v8 = vmul.f32 %v791_v1, %v488_v43  ;;  %v3846_v42 = vld [vmem:[#allocation2 + $0x52] sm:$0xff]  ;;  %v3848_v43 = vld [vmem:[#allocation2 + $0x4a] sm:$0xff]  ;;  %v3872_v59 = vld [vmem:[#allocation2 + $0x9a] sm:$0xff] }
  0xe8   : > { %v958_v13 = vld [vmem:[#allocation2 + $0x168] sm:$0xff]  ;;  %v3882_v1 = vld [vmem:[#allocation2 + $0xb2] sm:$0xff] }
  0xe9   : > { %v1021_v11 = vld [vmem:[#allocation2 + $0x159] sm:$0xff]  ;;  %923 = vst.msk [vmem:[#allocation2 + $0x188] sm:$0xff] %vm872_vm1, %v867_v7  ;;  %922 = vst.msk [vmem:[#allocation2 + $0x180] sm:$0xff] %vm872_vm1, %v866_v8  ;;  %v3891_v7 = vld [vmem:[#allocation2 + $0xca] sm:$0xff] }
  0xea   : > { %1114 = vrot.lane.b32.xlu1 %v1021_v11, %s3241_s29  ;;  %990 = vst.msk [vmem:[#allocation3 + $0xf0] sm:$0xff] %vm872_vm1, %v958_v13  ;;  %v806_v14 = vpop.permute.xlu1 %805  ;;  %v801_v17 = vpop.permute.xlu0 %800  ;;  %v3893_v8 = vld [vmem:[#allocation2 + $0xc2] sm:$0xff]  ;;  %v3902_v11 = vld [vmem:[#allocation2 + $0xda] sm:$0xff] }
  0xeb   : > { %v869_v19 = vmul.f32 %v806_v14, %v491_v5  ;;  %v868_v20 = vmul.f32 %v801_v17, %v490_v6  ;;  %v3884_v5 = vld [vmem:[#allocation2 + $0xaa] sm:$0xff]  ;;  %v1206_v17 = vld [vmem:[#allocation2 + $0xfa] sm:$0xff] }
  0xed   : > { %v1023_v24 = vld [vmem:[#allocation2 + $0x171] sm:$0xff]  ;;  %v1022_v25 = vld [vmem:[#allocation2 + $0x169] sm:$0xff]  ;;  %925 = vst.msk [vmem:[#allocation2 + $0x198] sm:$0xff] %vm872_vm1, %v869_v19 }
  0xee   : > { %924 = vst.msk [vmem:[#allocation2 + $0x190] sm:$0x3] %vm875_vm0, %v868_v20  ;;  %1118 = vrot.lane.b32.xlu1 %v1023_v24, %s3241_s29  ;;  %1116 = vrot.lane.b32.xlu0 %v1022_v25, %s3241_s29  ;;  %v959_v61 = vld [vmem:[#allocation2 + $0x170] sm:$0xff]  ;;  %v816_v26 = vpop.permute.xlu1 %815  ;;  %v811_v27 = vpop.permute.xlu0 %810 }
  0xef   : > { %991 = vst.msk [vmem:[#allocation3 + $0xf8] sm:$0xff] %vm872_vm1, %v959_v61  ;;  %v871_v28 = vmul.f32 %v816_v26, %v493_v22  ;;  %v870_v29 = vmul.f32 %v811_v27, %v492_v23  ;;  %v1205_v19 = vld [vmem:[#allocation2 + $0xf2] sm:$0xff]  ;;  %v1207_v23 = vld [vmem:[#allocation2 + $0x10a] sm:$0xff]  ;;  %v1209_v61 = vld [vmem:[#allocation2 + $0x122] sm:$0xff] }
  0xf0   : > { %v1208_v22 = vld [vmem:[#allocation2 + $0x112] sm:$0xff]  ;;  %v1210_v25 = vld [vmem:[#allocation2 + $0x12a] sm:$0xff] }
  0xf1   : > { %927 = vst.msk [vmem:[#allocation2 + $0x1a8] sm:$0x3] %vm875_vm0, %v871_v28  ;;  %v1212_v28 = vld [vmem:[#allocation2 + $0x142] sm:$0xff] }
  0xf2   : > { %926 = vst.msk [vmem:[#allocation2 + $0x1a0] sm:$0xff] %vm872_vm1, %v870_v29  ;;  %1251 = vrot.lane.b32.xlu1 %v1186_v35, %s3242_s30  ;;  %1249 = vrot.lane.b32.xlu0 %v1185_v36, %s3242_s30  ;;  %v1211_v29 = vld [vmem:[#allocation2 + $0x13a] sm:$0xff] }
  0xf3   : > { %v1214_v36 = vld [vmem:[#allocation2 + $0x15a] sm:$0xff] }
  0xf6   : > { %1255 = vrot.lane.b32.xlu1 %v3830_v37, %s3242_s30  ;;  %1253 = vrot.lane.b32.xlu0 %v3832_v38, %s3242_s30 }
  0xfa   : > { %1259 = vrot.lane.b32.xlu1 %v3838_v40, %s3242_s30  ;;  %1257 = vrot.lane.b32.xlu0 %v3840_v41, %s3242_s30 }
  0xfe   : > { %1263 = vrot.lane.b32.xlu1 %v3846_v42, %s3242_s30  ;;  %1261 = vrot.lane.b32.xlu0 %v3848_v43, %s3242_s30 }
 0x102   : > { %1267 = vrot.lane.b32.xlu1 %v3854_v44, %s3242_s30  ;;  %1265 = vrot.lane.b32.xlu0 %v3856_v45, %s3242_s30 }
 0x106   : > { %1271 = vrot.lane.b32.xlu1 %v3862_v46, %s3242_s30  ;;  %1269 = vrot.lane.b32.xlu0 %v3864_v48, %s3242_s30 }
 0x107   : > { %v1059_v50 = vpop.permute.xlu1 %1058  ;;  %v1057_v58 = vpop.permute.xlu0 %1056 }
 0x108   : > { %1154 = vst.msk [vmem:[#allocation3 + $0x8] sm:$0xff] %vm1152_vm2, %v1059_v50  ;;  %1153 = vst.msk [vmem:[#allocation3] sm:$0xff] %vm1152_vm2, %v1057_v58  ;;  %v1213_v50 = vld [vmem:[#allocation2 + $0x152] sm:$0xff] }
 0x10a   : > { %1275 = vrot.lane.b32.xlu1 %v3872_v59, %s3242_s30  ;;  %1273 = vrot.lane.b32.xlu0 %v3874_v60, %s3242_s30 }
 0x10c   : > { %v1063_v62 = vpop.permute.xlu1 %1062  ;;  %v1061_v63 = vpop.permute.xlu0 %1060 }
 0x10d   : > { %1156 = vst.msk [vmem:[#allocation3 + $0x18] sm:$0xff] %vm1152_vm2, %v1063_v62  ;;  %1155 = vst.msk [vmem:[#allocation3 + $0x10] sm:$0xff] %vm1152_vm2, %v1061_v63  ;;  %v1216_v62 = vld [vmem:[#allocation2 + $0x172] sm:$0xff]  ;;  %v1215_v63 = vld [vmem:[#allocation2 + $0x16a] sm:$0xff] }
 0x10e   : > { %1279 = vrot.lane.b32.xlu1 %v3882_v1, %s3242_s30  ;;  %1277 = vrot.lane.b32.xlu0 %v3884_v5, %s3242_s30 }
 0x110   : > { %v1065_v6 = vpop.permute.xlu0 %1064 }
 0x111   : > { %1157 = vst.msk [vmem:[#allocation3 + $0x20] sm:$0xff] %vm1152_vm2, %v1065_v6 }
 0x112   : > { %1283 = vrot.lane.b32.xlu1 %v3891_v7, %s3242_s30  ;;  %1281 = vrot.lane.b32.xlu0 %v3893_v8, %s3242_s30 }
 0x114   : > { %v1067_v56 = vpop.permute.xlu1 %1066 }
 0x115   : > { %1158 = vst.msk [vmem:[#allocation3 + $0x28] sm:$0xff] %vm1152_vm2, %v1067_v56 }
 0x116   : > { %1287 = vrot.lane.b32.xlu1 %v3900_v9, %s3242_s30  ;;  %1285 = vrot.lane.b32.xlu0 %v3902_v11, %s3242_s30 }
 0x118   : > { %v1071_v13 = vpop.permute.xlu1 %1070  ;;  %v1069_v14 = vpop.permute.xlu0 %1068 }
 0x119   : > { %1160 = vst.msk [vmem:[#allocation3 + $0x38] sm:$0xff] %vm1152_vm2, %v1071_v13  ;;  %1159 = vst.msk [vmem:[#allocation3 + $0x30] sm:$0xff] %vm1152_vm2, %v1069_v14 }
 0x11a   : > { %1291 = vrot.lane.b32.xlu1 %v1206_v17, %s3242_s30  ;;  %1289 = vrot.lane.b32.xlu0 %v1205_v19, %s3242_s30 }
 0x11c   : > { %v1073_v20 = vpop.permute.xlu0 %1072 }
 0x11d   : > { %1161 = vst.msk [vmem:[#allocation3 + $0x40] sm:$0xff] %vm1152_vm2, %v1073_v20  ;;  %v1573_v20 = vld [vmem:[#allocation2 + $0x21] sm:$0xff] }
 0x11e   : > { %1295 = vrot.lane.b32.xlu1 %v1208_v22, %s3242_s30  ;;  %1293 = vrot.lane.b32.xlu0 %v1207_v23, %s3242_s30  ;;  %v1572_v22 = vld [vmem:[#allocation2 + $0x19] sm:$0xff] }
 0x120   : > { %v1075_v24 = vpop.permute.xlu1 %1074 }
 0x121   : > { %1162 = vst.msk [vmem:[#allocation3 + $0x48] sm:$0xff] %vm1152_vm2, %v1075_v24 }
 0x122   : > { %1299 = vrot.lane.b32.xlu1 %v1210_v25, %s3242_s30  ;;  %1297 = vrot.lane.b32.xlu0 %v1209_v61, %s3242_s30  ;;  %v1575_v25 = vld [vmem:[#allocation2 + $0x39] sm:$0xff]  ;;  %v1574_v61 = vld [vmem:[#allocation2 + $0x31] sm:$0xff] }
 0x124   : > { %v1079_v26 = vpop.permute.xlu1 %1078  ;;  %v1077_v27 = vpop.permute.xlu0 %1076 }
 0x125   : > { %1164 = vst.msk [vmem:[#allocation3 + $0x58] sm:$0xff] %vm1152_vm2, %v1079_v26  ;;  %1163 = vst.msk [vmem:[#allocation3 + $0x50] sm:$0xff] %vm1152_vm2, %v1077_v27 }
 0x126   : > { %1303 = vrot.lane.b32.xlu1 %v1212_v28, %s3242_s30  ;;  %1301 = vrot.lane.b32.xlu0 %v1211_v29, %s3242_s30 }
 0x128   : > { %v1081_v35 = vpop.permute.xlu0 %1080 }
 0x129   : > { %1165 = vst.msk [vmem:[#allocation3 + $0x60] sm:$0xff] %vm1152_vm2, %v1081_v35 }
 0x12a   : > { %1307 = vrot.lane.b32.xlu1 %v1214_v36, %s3242_s30  ;;  %1305 = vrot.lane.b32.xlu0 %v1213_v50, %s3242_s30  ;;  %v2154_v36 = vld [vmem:[#allocation2 + $0x49] sm:$0xff] }
 0x12b   : > { %v3231_v50 = vld [vmem:[%s4606_s2 + $0x10] ss:$0 sps:$4 sm:$0x33]  }
 0x12c   : > { %v1083_v58 = vpop.permute.xlu1 %1082 }
 0x12d   : > { %1166 = vst.msk [vmem:[#allocation3 + $0x68] sm:$0xff] %vm1152_vm2, %v1083_v58 }
 0x12e   : > { %1311 = vrot.lane.b32.xlu1 %v1216_v62, %s3242_s30  ;;  %1309 = vrot.lane.b32.xlu0 %v1215_v63, %s3242_s30  ;;  %v2657_v63 = vsel %vm2655_vm4, %v3231_v50, 0 }
 0x130   : > { %v1087_v6 = vpop.permute.xlu1 %1086  ;;  %v1085_v56 = vpop.permute.xlu0 %1084 }
 0x131   : > { %1168 = vst.msk [vmem:[#allocation3 + $0x78] sm:$0xff] %vm1152_vm2, %v1087_v6  ;;  %1167 = vst.msk [vmem:[#allocation3 + $0x70] sm:$0xff] %vm1152_vm2, %v1085_v56 }
 0x132   : > { %1445 = vrot.lane.b32.xlu1 %v3544_v18, %s3243_s7  ;;  %1443 = vrot.lane.b32.xlu0 %v3529_v3, %s3243_s7 }
 0x134   : > { %v1089_v13 = vpop.permute.xlu0 %1088 }
 0x135   : > { %1169 = vst.msk [vmem:[#allocation3 + $0x80] sm:$0xff] %vm1152_vm2, %v1089_v13 }
 0x136   : > { %1449 = vrot.lane.b32.xlu1 %v3561_v33, %s3243_s7  ;;  %1447 = vrot.lane.b32.xlu0 %v3554_v32, %s3243_s7 }
 0x138   : > { %v1091_v14 = vpop.permute.xlu1 %1090 }
 0x139   : > { %1170 = vst.msk [vmem:[#allocation3 + $0x88] sm:$0xff] %vm1152_vm2, %v1091_v14 }
 0x13a   : > { %1453 = vrot.lane.b32.xlu1 %v3588_v0, %s3243_s7  ;;  %1451 = vrot.lane.b32.xlu0 %v3571_v47, %s3243_s7 }
 0x13c   : > { %v1095_v18 = vpop.permute.xlu1 %1094  ;;  %v1093_v3 = vpop.permute.xlu0 %1092 }
 0x13d   : > { %1172 = vst.msk [vmem:[#allocation3 + $0x98] sm:$0xff] %vm1152_vm2, %v1095_v18  ;;  %1171 = vst.msk [vmem:[#allocation3 + $0x90] sm:$0xff] %vm1152_vm2, %v1093_v3  ;;  %v1579_v18 = vld [vmem:[#allocation2 + $0x69] sm:$0xff]  ;;  %v1578_v3 = vld [vmem:[#allocation2 + $0x61] sm:$0xff] }
 0x13e   : > { %1457 = vrot.lane.b32.xlu1 %v3605_v16, %s3243_s7  ;;  %1455 = vrot.lane.b32.xlu0 %v3598_v15, %s3243_s7 }
 0x140   : > { %v1097_v17 = vpop.permute.xlu0 %1096 }
 0x141   : > { %1173 = vst.msk [vmem:[#allocation3 + $0xa0] sm:$0xff] %vm1152_vm2, %v1097_v17 }
 0x142   : > { %1461 = vrot.lane.b32.xlu1 %v3632_v49, %s3243_s7  ;;  %1459 = vrot.lane.b32.xlu0 %v3615_v31, %s3243_s7 }
 0x144   : > { %v1099_v19 = vpop.permute.xlu1 %1098 }
 0x145   : > { %1174 = vst.msk [vmem:[#allocation3 + $0xa8] sm:$0xff] %vm1152_vm2, %v1099_v19 }
 0x146   : > { %1638 = vrot.lane.b32.xlu1 %v1573_v20, %s3244_s8  ;;  %1636 = vrot.lane.b32.xlu0 %v1572_v22, %s3244_s8 }
 0x148   : > { %v1103_v23 = vpop.permute.xlu1 %1102  ;;  %v1101_v24 = vpop.permute.xlu0 %1100 }
 0x149   : > { %1176 = vst.msk [vmem:[#allocation3 + $0xb8] sm:$0xff] %vm1152_vm2, %v1103_v23  ;;  %1175 = vst.msk [vmem:[#allocation3 + $0xb0] sm:$0xff] %vm1152_vm2, %v1101_v24 }
 0x14a   : > { %1642 = vrot.lane.b32.xlu1 %v1575_v25, %s3244_s8  ;;  %1640 = vrot.lane.b32.xlu0 %v1574_v61, %s3244_s8 }
 0x14c   : > { %v1105_v26 = vpop.permute.xlu0 %1104 }
 0x14d   : > { %1177 = vst.msk [vmem:[#allocation3 + $0xc0] sm:$0xff] %vm1152_vm2, %v1105_v26  ;;  %v2158_v26 = vld [vmem:[#allocation2 + $0x79] sm:$0xff] }
 0x14e   : > { %1831 = vrot.lane.b32.xlu1 %v3830_v37, %s3245_s9  ;;  %1829 = vrot.lane.b32.xlu0 %v3832_v38, %s3245_s9  ;;  %v3229_v38 = vld [vmem:[%s4606_s2] sm:$0xff]  }
 0x14f   : > { %3163 = vmatprep.subr.bf16.mxu0 %v3229_v38  ;;  %3201 = vmatprep.subr.bf16.mxu1 %v3229_v38 }
 0x150   : > { %v1107_v27 = vpop.permute.xlu1 %1106  ;;  %3164 = vmatpush3.bf16.msra.mxu0 %v3229_v38  ;;  %3204 = vmatpush3.bf16.msra.mxu1 %v3229_v38 }
 0x151   : > { %1178 = vst.msk [vmem:[#allocation3 + $0xc8] sm:$0xff] %vm1152_vm2, %v1107_v27 }
 0x152   : > { %1835 = vrot.lane.b32.xlu1 %v3838_v40, %s3245_s9  ;;  %1833 = vrot.lane.b32.xlu0 %v3840_v41, %s3245_s9 }
 0x154   : > { %v1111_v28 = vpop.permute.xlu1 %1110  ;;  %v1109_v29 = vpop.permute.xlu0 %1108 }
 0x155   : > { %1180 = vst.msk [vmem:[#allocation3 + $0xd8] sm:$0xff] %vm1152_vm2, %v1111_v28  ;;  %1179 = vst.msk [vmem:[#allocation3 + $0xd0] sm:$0xff] %vm1152_vm2, %v1109_v29 }
 0x156   : > { %2025 = vrot.lane.b32.xlu1 %v3561_v33, %s3246_s10  ;;  %2023 = vrot.lane.b32.xlu0 %v3554_v32, %s3246_s10  ;;  %v3230_v32 = vld [vmem:[%s4606_s2 + $0x8] sm:$0xff]  }
 0x157   : > { %3165 = vmatprep.subr.bf16.mxu0 %v3230_v32  ;;  %3202 = vmatprep.subr.bf16.mxu1 %v3230_v32 }
 0x158   : > { %v1113_v37 = vpop.permute.xlu0 %1112  ;;  %3166 = vmatpush3.bf16.msra.mxu0 %v3230_v32  ;;  %3205 = vmatpush3.bf16.msra.mxu1 %v3230_v32 }
 0x159   : > { %1181 = vst.msk [vmem:[#allocation3 + $0xe0] sm:$0xff] %vm1152_vm2, %v1113_v37  ;;  %3207 = vmatprep.subr.msk.bf16.mxu0 %vm2655_vm4, %v3231_v50  ;;  %3208 = vmatprep.subr.msk.bf16.mxu1 %vm2655_vm4, %v3231_v50 }
 0x15a   : > { %2029 = vrot.lane.b32.xlu1 %v3588_v0, %s3246_s10  ;;  %2027 = vrot.lane.b32.xlu0 %v3571_v47, %s3246_s10  ;;  %v2155_v0 = vld [vmem:[#allocation2 + $0x51] sm:$0xff] }
 0x15c   : > { %v1115_v35 = vpop.permute.xlu1 %1114  ;;  %3168 = vmatpush3.bf16.msra.mxu0 %v2657_v63  ;;  %3206 = vmatpush3.bf16.msra.mxu1 %v2657_v63 }
 0x15d   : > { %1182 = vst.msk [vmem:[#allocation3 + $0xe8] sm:$0xff] %vm1152_vm2, %v1115_v35 }
 0x15e   : > { %2218 = vrot.lane.b32.xlu1 %v1575_v25, %s3247_s13  ;;  %2216 = vrot.lane.b32.xlu0 %v1574_v61, %s3247_s13 }
 0x160   : > { %v1119_v33 = vpop.permute.xlu1 %1118  ;;  %v1117_v47 = vpop.permute.xlu0 %1116 }
 0x161   : > { %1184 = vst.msk [vmem:[#allocation3 + $0xf8] sm:$0xff] %vm1152_vm2, %v1119_v33  ;;  %1183 = vst.msk [vmem:[#allocation3 + $0xf0] sm:$0xff] %vm1152_vm2, %v1117_v47  ;;  %v1583_v33 = vld [vmem:[#allocation2 + $0x99] sm:$0xff]  ;;  %v1582_v47 = vld [vmem:[#allocation2 + $0x91] sm:$0xff] }
 0x162   : > { %2222 = vrot.lane.b32.xlu1 %v2155_v0, %s3247_s13  ;;  %2220 = vrot.lane.b32.xlu0 %v2154_v36, %s3247_s13 }
 0x164   : > { %v1252_v58 = vpop.permute.xlu1 %1251  ;;  %v1250_v62 = vpop.permute.xlu0 %1249 }
 0x165   : > { %1347 = vst.msk [vmem:[#allocation3 + $0x8] sm:$0xff] %vm1345_vm3, %v1252_v58  ;;  %1346 = vst.msk [vmem:[#allocation3] sm:$0xff] %vm1345_vm3, %v1250_v62 }
 0x166   : > { %2411 = vrot.lane.b32.xlu1 %v3838_v40, %s3248_s18  ;;  %2409 = vrot.lane.b32.xlu0 %v3840_v41, %s3248_s18 }
 0x168   : > { %v1256_v6 = vpop.permute.xlu1 %1255  ;;  %v1254_v56 = vpop.permute.xlu0 %1253 }
 0x169   : > { %1349 = vst.msk [vmem:[#allocation3 + $0x18] sm:$0xff] %vm1345_vm3, %v1256_v6  ;;  %1348 = vst.msk [vmem:[#allocation3 + $0x10] sm:$0xff] %vm1345_vm3, %v1254_v56 }
 0x16a   : > { %2415 = vrot.lane.b32.xlu1 %v3846_v42, %s3248_s18  ;;  %2413 = vrot.lane.b32.xlu0 %v3848_v43, %s3248_s18 }
 0x16c   : > { %v1260_v13 = vpop.permute.xlu1 %1259  ;;  %v1258_v14 = vpop.permute.xlu0 %1257 }
 0x16d   : > { %1351 = vst.msk [vmem:[#allocation3 + $0x28] sm:$0xff] %vm1345_vm3, %v1260_v13  ;;  %1350 = vst.msk [vmem:[#allocation3 + $0x20] sm:$0xff] %vm1345_vm3, %v1258_v14  ;;  %v2163_v13 = vld [vmem:[#allocation2 + $0xb1] sm:$0xff]  ;;  %v2162_v14 = vld [vmem:[#allocation2 + $0xa9] sm:$0xff] }
 0x16e   : > { %1646 = vrot.lane.b32.xlu1 %v2155_v0, %s3244_s8  ;;  %1644 = vrot.lane.b32.xlu0 %v2154_v36, %s3244_s8 }
 0x170   : > { %v1264_v40 = vpop.permute.xlu1 %1263  ;;  %v1262_v41 = vpop.permute.xlu0 %1261 }
 0x171   : > { %1353 = vst.msk [vmem:[#allocation3 + $0x38] sm:$0xff] %vm1345_vm3, %v1264_v40  ;;  %1352 = vst.msk [vmem:[#allocation3 + $0x30] sm:$0xff] %vm1345_vm3, %v1262_v41 }
 0x172   : > { %1650 = vrot.lane.b32.xlu1 %v1579_v18, %s3244_s8  ;;  %1648 = vrot.lane.b32.xlu0 %v1578_v3, %s3244_s8 }
 0x174   : > { %v1268_v17 = vpop.permute.xlu1 %1267  ;;  %v1266_v19 = vpop.permute.xlu0 %1265 }
 0x175   : > { %1355 = vst.msk [vmem:[#allocation3 + $0x48] sm:$0xff] %vm1345_vm3, %v1268_v17  ;;  %1354 = vst.msk [vmem:[#allocation3 + $0x40] sm:$0xff] %vm1345_vm3, %v1266_v19 }
 0x176   : > { %1839 = vrot.lane.b32.xlu1 %v3846_v42, %s3245_s9  ;;  %1837 = vrot.lane.b32.xlu0 %v3848_v43, %s3245_s9 }
 0x178   : > { %v1272_v20 = vpop.permute.xlu1 %1271  ;;  %v1270_v22 = vpop.permute.xlu0 %1269 }
 0x179   : > { %1357 = vst.msk [vmem:[#allocation3 + $0x58] sm:$0xff] %vm1345_vm3, %v1272_v20  ;;  %1356 = vst.msk [vmem:[#allocation3 + $0x50] sm:$0xff] %vm1345_vm3, %v1270_v22 }
 0x17a   : > { %1843 = vrot.lane.b32.xlu1 %v3854_v44, %s3245_s9  ;;  %1841 = vrot.lane.b32.xlu0 %v3856_v45, %s3245_s9 }
 0x17c   : > { %v1276_v23 = vpop.permute.xlu1 %1275  ;;  %v1274_v24 = vpop.permute.xlu0 %1273 }
 0x17d   : > { %1359 = vst.msk [vmem:[#allocation3 + $0x68] sm:$0xff] %vm1345_vm3, %v1276_v23  ;;  %1358 = vst.msk [vmem:[#allocation3 + $0x60] sm:$0xff] %vm1345_vm3, %v1274_v24  ;;  %v1587_v23 = vld [vmem:[#allocation2 + $0xc9] sm:$0xff]  ;;  %v1586_v24 = vld [vmem:[#allocation2 + $0xc1] sm:$0xff] }
 0x17e   : > { %2033 = vrot.lane.b32.xlu1 %v3605_v16, %s3246_s10  ;;  %2031 = vrot.lane.b32.xlu0 %v3598_v15, %s3246_s10 }
 0x180   : > { %v1280_v42 = vpop.permute.xlu1 %1279  ;;  %v1278_v43 = vpop.permute.xlu0 %1277 }
 0x181   : > { %1361 = vst.msk [vmem:[#allocation3 + $0x78] sm:$0xff] %vm1345_vm3, %v1280_v42  ;;  %1360 = vst.msk [vmem:[#allocation3 + $0x70] sm:$0xff] %vm1345_vm3, %v1278_v43 }
 0x182   : > { %2037 = vrot.lane.b32.xlu1 %v3632_v49, %s3246_s10  ;;  %2035 = vrot.lane.b32.xlu0 %v3615_v31, %s3246_s10  ;;  %v2159_v49 = vld [vmem:[#allocation2 + $0x81] sm:$0xff] }
 0x184   : > { %v1284_v25 = vpop.permute.xlu1 %1283  ;;  %v1282_v61 = vpop.permute.xlu0 %1281 }
 0x185   : > { %1363 = vst.msk [vmem:[#allocation3 + $0x88] sm:$0xff] %vm1345_vm3, %v1284_v25  ;;  %1362 = vst.msk [vmem:[#allocation3 + $0x80] sm:$0xff] %vm1345_vm3, %v1282_v61 }
 0x186   : > { %2226 = vrot.lane.b32.xlu1 %v1579_v18, %s3247_s13  ;;  %2224 = vrot.lane.b32.xlu0 %v1578_v3, %s3247_s13 }
 0x188   : > { %v1288_v15 = vpop.permute.xlu1 %1287  ;;  %v1286_v16 = vpop.permute.xlu0 %1285 }
 0x189   : > { %1365 = vst.msk [vmem:[#allocation3 + $0x98] sm:$0xff] %vm1345_vm3, %v1288_v15  ;;  %1364 = vst.msk [vmem:[#allocation3 + $0x90] sm:$0xff] %vm1345_vm3, %v1286_v16 }
 0x18a   : > { %2230 = vrot.lane.b32.xlu1 %v2159_v49, %s3247_s13  ;;  %2228 = vrot.lane.b32.xlu0 %v2158_v26, %s3247_s13 }
 0x18c   : > { %v1292_v31 = vpop.permute.xlu1 %1291  ;;  %v1290_v27 = vpop.permute.xlu0 %1289 }
 0x18d   : > { %1367 = vst.msk [vmem:[#allocation3 + $0xa8] sm:$0xff] %vm1345_vm3, %v1292_v31  ;;  %1366 = vst.msk [vmem:[#allocation3 + $0xa0] sm:$0xff] %vm1345_vm3, %v1290_v27 }
 0x18e   : > { %2419 = vrot.lane.b32.xlu1 %v3854_v44, %s3248_s18  ;;  %2417 = vrot.lane.b32.xlu0 %v3856_v45, %s3248_s18 }
 0x190   : > { %v1296_v28 = vpop.permute.xlu1 %1295  ;;  %v1294_v29 = vpop.permute.xlu0 %1293 }
 0x191   : > { %1369 = vst.msk [vmem:[#allocation3 + $0xb8] sm:$0xff] %vm1345_vm3, %v1296_v28  ;;  %1368 = vst.msk [vmem:[#allocation3 + $0xb0] sm:$0xff] %vm1345_vm3, %v1294_v29 }
 0x192   : > { %2423 = vrot.lane.b32.xlu1 %v3862_v46, %s3248_s18  ;;  %2421 = vrot.lane.b32.xlu0 %v3864_v48, %s3248_s18 }
 0x194   : > { %v1300_v37 = vpop.permute.xlu1 %1299  ;;  %v1298_v38 = vpop.permute.xlu0 %1297 }
 0x195   : > { %1371 = vst.msk [vmem:[#allocation3 + $0xc8] sm:$0xff] %vm1345_vm3, %v1300_v37  ;;  %1370 = vst.msk [vmem:[#allocation3 + $0xc0] sm:$0xff] %vm1345_vm3, %v1298_v38  ;;  %v2167_v38 = vld [vmem:[#allocation2 + $0xe1] sm:$0xff] }
 0x196   : > { %1465 = vrot.lane.b32.xlu1 %v3649_v4, %s3243_s7  ;;  %1463 = vrot.lane.b32.xlu0 %v3642_v2, %s3243_s7 }
 0x198   : > { %v1304_v44 = vpop.permute.xlu1 %1303  ;;  %v1302_v45 = vpop.permute.xlu0 %1301 }
 0x199   : > { %1373 = vst.msk [vmem:[#allocation3 + $0xd8] sm:$0xff] %vm1345_vm3, %v1304_v44  ;;  %1372 = vst.msk [vmem:[#allocation3 + $0xd0] sm:$0xff] %vm1345_vm3, %v1302_v45  ;;  %v2166_v44 = vld [vmem:[#allocation2 + $0xd9] sm:$0xff] }
 0x19a   : > { %1654 = vrot.lane.b32.xlu1 %v2159_v49, %s3244_s8  ;;  %1652 = vrot.lane.b32.xlu0 %v2158_v26, %s3244_s8 }
 0x19c   : > { %v1308_v35 = vpop.permute.xlu1 %1307  ;;  %v1306_v32 = vpop.permute.xlu0 %1305 }
 0x19d   : > { %1375 = vst.msk [vmem:[#allocation3 + $0xe8] sm:$0xff] %vm1345_vm3, %v1308_v35  ;;  %1374 = vst.msk [vmem:[#allocation3 + $0xe0] sm:$0xff] %vm1345_vm3, %v1306_v32 }
 0x19e   : > { %1658 = vrot.lane.b32.xlu1 %v1583_v33, %s3244_s8  ;;  %1656 = vrot.lane.b32.xlu0 %v1582_v47, %s3244_s8 }
 0x1a0   : > { %v1312_v0 = vpop.permute.xlu1 %1311  ;;  %v1310_v36 = vpop.permute.xlu0 %1309 }
 0x1a1   : > { %1377 = vst.msk [vmem:[#allocation3 + $0xf8] sm:$0xff] %vm1345_vm3, %v1312_v0  ;;  %1376 = vst.msk [vmem:[#allocation3 + $0xf0] sm:$0xff] %vm1345_vm3, %v1310_v36 }
 0x1a2   : > { %1847 = vrot.lane.b32.xlu1 %v3862_v46, %s3245_s9  ;;  %1845 = vrot.lane.b32.xlu0 %v3864_v48, %s3245_s9 }
 0x1a4   : > { %v1446_v50 = vpop.permute.xlu1 %1445  ;;  %v1444_v58 = vpop.permute.xlu0 %1443 }
 0x1a5   : > { %1541 = vst.msk [vmem:[#allocation3 + $0x8] sm:$0xff] %vm1539_vm5, %v1446_v50  ;;  %1540 = vst.msk [vmem:[#allocation3] sm:$0xff] %vm1539_vm5, %v1444_v58  ;;  %v1591_v50 = vld [vmem:[#allocation2 + $0xf9] sm:$0xff]  ;;  %v1590_v58 = vld [vmem:[#allocation2 + $0xf1] sm:$0xff] }
 0x1a6   : > { %1851 = vrot.lane.b32.xlu1 %v3872_v59, %s3245_s9  ;;  %1849 = vrot.lane.b32.xlu0 %v3874_v60, %s3245_s9 }
 0x1a8   : > { %v1450_v62 = vpop.permute.xlu1 %1449  ;;  %v1448_v63 = vpop.permute.xlu0 %1447 }
 0x1a9   : > { %1543 = vst.msk [vmem:[#allocation3 + $0x18] sm:$0xff] %vm1539_vm5, %v1450_v62  ;;  %1542 = vst.msk [vmem:[#allocation3 + $0x10] sm:$0xff] %vm1539_vm5, %v1448_v63 }
 0x1aa   : > { %2041 = vrot.lane.b32.xlu1 %v3649_v4, %s3246_s10  ;;  %2039 = vrot.lane.b32.xlu0 %v3642_v2, %s3246_s10 }
 0x1ac   : > { %v1454_v46 = vpop.permute.xlu1 %1453  ;;  %v1452_v48 = vpop.permute.xlu0 %1451 }
 0x1ad   : > { %1545 = vst.msk [vmem:[#allocation3 + $0x28] sm:$0xff] %vm1539_vm5, %v1454_v46  ;;  %1544 = vst.msk [vmem:[#allocation3 + $0x20] sm:$0xff] %vm1539_vm5, %v1452_v48  ;;  %v1782_v46 = vld [vmem:[#allocation2 + $0xe2] sm:$0xff]  ;;  %v1781_v48 = vld [vmem:[#allocation2 + $0xda] sm:$0xff] }
 0x1ae   : > { %2045 = vrot.lane.b32.xlu1 %v3676_v39, %s3246_s10  ;;  %2043 = vrot.lane.b32.xlu0 %v3659_v21, %s3246_s10 }
 0x1b0   : > { %v1458_v6 = vpop.permute.xlu1 %1457  ;;  %v1456_v56 = vpop.permute.xlu0 %1455 }
 0x1b1   : > { %1547 = vst.msk [vmem:[#allocation3 + $0x38] sm:$0xff] %vm1539_vm5, %v1458_v6  ;;  %1546 = vst.msk [vmem:[#allocation3 + $0x30] sm:$0xff] %vm1539_vm5, %v1456_v56 }
 0x1b2   : > { %2234 = vrot.lane.b32.xlu1 %v1583_v33, %s3247_s13  ;;  %2232 = vrot.lane.b32.xlu0 %v1582_v47, %s3247_s13 }
 0x1b4   : > { %v1462_v2 = vpop.permute.xlu1 %1461  ;;  %v1460_v4 = vpop.permute.xlu0 %1459 }
 0x1b5   : > { %1549 = vst.msk [vmem:[#allocation3 + $0x48] sm:$0xff] %vm1539_vm5, %v1462_v2  ;;  %1548 = vst.msk [vmem:[#allocation3 + $0x40] sm:$0xff] %vm1539_vm5, %v1460_v4  ;;  %v1784_v2 = vld [vmem:[#allocation2 + $0xfa] sm:$0xff]  ;;  %v1783_v4 = vld [vmem:[#allocation2 + $0xf2] sm:$0xff] }
 0x1b6   : > { %2238 = vrot.lane.b32.xlu1 %v2163_v13, %s3247_s13  ;;  %2236 = vrot.lane.b32.xlu0 %v2162_v14, %s3247_s13 }
 0x1b8   : > { %v1639_v40 = vpop.permute.xlu1 %1638  ;;  %v1637_v41 = vpop.permute.xlu0 %1636 }
 0x1b9   : > { %1734 = vst.msk [vmem:[#allocation3 + $0x8] sm:$0xff] %vm1732_vm6, %v1639_v40  ;;  %1733 = vst.msk [vmem:[#allocation3] sm:$0xff] %vm1732_vm6, %v1637_v41 }
 0x1ba   : > { %2427 = vrot.lane.b32.xlu1 %v3872_v59, %s3248_s18  ;;  %2425 = vrot.lane.b32.xlu0 %v3874_v60, %s3248_s18 }
 0x1bc   : > { %v1643_v18 = vpop.permute.xlu1 %1642  ;;  %v1641_v3 = vpop.permute.xlu0 %1640 }
 0x1bd   : > { %1736 = vst.msk [vmem:[#allocation3 + $0x18] sm:$0xff] %vm1732_vm6, %v1643_v18  ;;  %1735 = vst.msk [vmem:[#allocation3 + $0x10] sm:$0xff] %vm1732_vm6, %v1641_v3 }
 0x1be   : > { %2431 = vrot.lane.b32.xlu1 %v3882_v1, %s3248_s18  ;;  %2429 = vrot.lane.b32.xlu0 %v3884_v5, %s3248_s18 }
 0x1c0   : > { %v1832_v17 = vpop.permute.xlu1 %1831  ;;  %v1830_v19 = vpop.permute.xlu0 %1829 }
 0x1c1   : > { %1927 = vst.msk [vmem:[#allocation3 + $0x8] sm:$0xff] %vm1925_vm7, %v1832_v17  ;;  %1926 = vst.msk [vmem:[#allocation3] sm:$0xff] %vm1925_vm7, %v1830_v19 }
 0x1c2   : > { %1469 = vrot.lane.b32.xlu1 %v3676_v39, %s3243_s7  ;;  %1467 = vrot.lane.b32.xlu0 %v3659_v21, %s3243_s7 }
 0x1c4   : > { %v1836_v59 = vpop.permute.xlu1 %1835  ;;  %v1834_v60 = vpop.permute.xlu0 %1833 }
 0x1c5   : > { %1929 = vst.msk [vmem:[#allocation3 + $0x18] sm:$0xff] %vm1925_vm7, %v1836_v59  ;;  %1928 = vst.msk [vmem:[#allocation3 + $0x10] sm:$0xff] %vm1925_vm7, %v1834_v60 }
 0x1c6   : > { %1473 = vrot.lane.b32.xlu1 %v3693_v57, %s3243_s7  ;;  %1471 = vrot.lane.b32.xlu0 %v3686_v55, %s3243_s7 }
 0x1c8   : > { %v2026_v20 = vpop.permute.xlu1 %2025  ;;  %v2024_v22 = vpop.permute.xlu0 %2023 }
 0x1c9   : > { %2121 = vst.msk [vmem:[#allocation3 + $0x8] sm:$0xff] %vm2119_vm8, %v2026_v20  ;;  %2120 = vst.msk [vmem:[#allocation3] sm:$0xff] %vm2119_vm8, %v2024_v22 }
 0x1ca   : > { %1662 = vrot.lane.b32.xlu1 %v2163_v13, %s3244_s8  ;;  %1660 = vrot.lane.b32.xlu0 %v2162_v14, %s3244_s8 }
 0x1cc   : > { %v2030_v21 = vpop.permute.xlu1 %2029  ;;  %v2028_v39 = vpop.permute.xlu0 %2027 }
 0x1cd   : > { %2123 = vst.msk [vmem:[#allocation3 + $0x18] sm:$0xff] %vm2119_vm8, %v2030_v21  ;;  %2122 = vst.msk [vmem:[#allocation3 + $0x10] sm:$0xff] %vm2119_vm8, %v2028_v39  ;;  %v2171_v21 = vld [vmem:[#allocation2 + $0x111] sm:$0xff]  ;;  %v2170_v39 = vld [vmem:[#allocation2 + $0x109] sm:$0xff] }
 0x1ce   : > { %1666 = vrot.lane.b32.xlu1 %v1587_v23, %s3244_s8  ;;  %1664 = vrot.lane.b32.xlu0 %v1586_v24, %s3244_s8 }
 0x1d0   : > { %v2219_v42 = vpop.permute.xlu1 %2218  ;;  %v2217_v43 = vpop.permute.xlu0 %2216 }
 0x1d1   : > { %2314 = vst.msk [vmem:[#allocation3 + $0x8] sm:$0xff] %vm2312_vm9, %v2219_v42  ;;  %2313 = vst.msk [vmem:[#allocation3] sm:$0xff] %vm2312_vm9, %v2217_v43 }
 0x1d2   : > { %1855 = vrot.lane.b32.xlu1 %v3882_v1, %s3245_s9  ;;  %1853 = vrot.lane.b32.xlu0 %v3884_v5, %s3245_s9 }
 0x1d4   : > { %v2223_v25 = vpop.permute.xlu1 %2222  ;;  %v2221_v61 = vpop.permute.xlu0 %2220 }
 0x1d5   : > { %2316 = vst.msk [vmem:[#allocation3 + $0x18] sm:$0xff] %vm2312_vm9, %v2223_v25  ;;  %2315 = vst.msk [vmem:[#allocation3 + $0x10] sm:$0xff] %vm2312_vm9, %v2221_v61  ;;  %v2364_v25 = vld [vmem:[#allocation2 + $0x112] sm:$0xff]  ;;  %v2363_v61 = vld [vmem:[#allocation2 + $0x10a] sm:$0xff] }
 0x1d6   : > { %1859 = vrot.lane.b32.xlu1 %v3891_v7, %s3245_s9  ;;  %1857 = vrot.lane.b32.xlu0 %v3893_v8, %s3245_s9 }
 0x1d8   : > { %v2412_v15 = vpop.permute.xlu1 %2411  ;;  %v2410_v16 = vpop.permute.xlu0 %2409 }
 0x1d9   : > { %2507 = vst.msk [vmem:[#allocation3 + $0x8] sm:$0xff] %vm2505_vm10, %v2412_v15  ;;  %2506 = vst.msk [vmem:[#allocation3] sm:$0xff] %vm2505_vm10, %v2410_v16 }
 0x1da   : > { %2049 = vrot.lane.b32.xlu1 %v3693_v57, %s3246_s10  ;;  %2047 = vrot.lane.b32.xlu0 %v3686_v55, %s3246_s10 }
 0x1dc   : > { %v2416_v1 = vpop.permute.xlu1 %2415  ;;  %v2414_v5 = vpop.permute.xlu0 %2413 }
 0x1dd   : > { %2509 = vst.msk [vmem:[#allocation3 + $0x18] sm:$0xff] %vm2505_vm10, %v2416_v1  ;;  %2508 = vst.msk [vmem:[#allocation3 + $0x10] sm:$0xff] %vm2505_vm10, %v2414_v5 }
 0x1de   : > { %2053 = vrot.lane.b32.xlu1 %v3720_v34, %s3246_s10  ;;  %2051 = vrot.lane.b32.xlu0 %v3703_v12, %s3246_s10 }
 0x1e0   : > { %v1647_v49 = vpop.permute.xlu1 %1646  ;;  %v1645_v26 = vpop.permute.xlu0 %1644  ;;  %v2538_v31 = vld [vmem:[#allocation3] sm:$0xff]  ;;  %v2539_v27 = vld [vmem:[#allocation3 + $0x8] sm:$0xff] }
 0x1e1   : > { %1738 = vst.msk [vmem:[#allocation3 + $0x28] sm:$0xff] %vm1732_vm6, %v1647_v49  ;;  %1737 = vst.msk [vmem:[#allocation3 + $0x20] sm:$0xff] %vm1732_vm6, %v1645_v26  ;;  %v2570_v55 = vpack.c.bf16 %v2539_v27, %v2538_v31  ;;  %v1594_v31 = vld [vmem:[#allocation2 + $0x121] sm:$0xff] }
 0x1e2   : > { %2242 = vrot.lane.b32.xlu1 %v1587_v23, %s3247_s13  ;;  %2240 = vrot.lane.b32.xlu0 %v1586_v24, %s3247_s13 }
 0x1e3   : > { %3169 = vmatprep.mubr.msk.bf16.mxu0 %vm2606_vm11, %v2570_v55 }
 0x1e4   : > { %v1651_v57 = vpop.permute.xlu1 %1650  ;;  %v1649_v28 = vpop.permute.xlu0 %1648  ;;  %v2540_v29 = vld [vmem:[#allocation3 + $0x10] sm:$0xff]  ;;  %v2541_v37 = vld [vmem:[#allocation3 + $0x18] sm:$0xff] }
 0x1e5   : > { %1740 = vst.msk [vmem:[#allocation3 + $0x38] sm:$0xff] %vm1732_vm6, %v1651_v57  ;;  %1739 = vst.msk [vmem:[#allocation3 + $0x30] sm:$0xff] %vm1732_vm6, %v1649_v28  ;;  %v2571_v45 = vpack.c.bf16 %v2541_v37, %v2540_v29  ;;  %v1788_v37 = vld [vmem:[#allocation2 + $0x12a] sm:$0xff] }
 0x1e6   : > { %2246 = vrot.lane.b32.xlu1 %v2167_v38, %s3247_s13  ;;  %2244 = vrot.lane.b32.xlu0 %v2166_v44, %s3247_s13 }
 0x1e7   : > { %3170 = vmatmul.mubr.msk.bf16.vlgmr.msra.gmra.mrb[0].mxu0 %vm2606_vm11, %v2571_v45 }
 0x1e8   : > { %v1840_v35 = vpop.permute.xlu1 %1839  ;;  %v1838_v32 = vpop.permute.xlu0 %1837 }
 0x1e9   : > { %1931 = vst.msk [vmem:[#allocation3 + $0x28] sm:$0xff] %vm1925_vm7, %v1840_v35  ;;  %1930 = vst.msk [vmem:[#allocation3 + $0x20] sm:$0xff] %vm1925_vm7, %v1838_v32 }
 0x1ea   : > { %2435 = vrot.lane.b32.xlu1 %v3891_v7, %s3248_s18  ;;  %2433 = vrot.lane.b32.xlu0 %v3893_v8, %s3248_s18 }
 0x1ec   : > { %v1844_v33 = vpop.permute.xlu1 %1843  ;;  %v1842_v47 = vpop.permute.xlu0 %1841 }
 0x1ed   : > { %1933 = vst.msk [vmem:[#allocation3 + $0x38] sm:$0xff] %vm1925_vm7, %v1844_v33  ;;  %1932 = vst.msk [vmem:[#allocation3 + $0x30] sm:$0xff] %vm1925_vm7, %v1842_v47  ;;  %v1980_v47 = vld [vmem:[#allocation2 + $0x128] sm:$0xff] }
 0x1ee   : > { %2439 = vrot.lane.b32.xlu1 %v3900_v9, %s3248_s18  ;;  %2437 = vrot.lane.b32.xlu0 %v3902_v11, %s3248_s18 }
 0x1f0   : > { %v2034_v0 = vpop.permute.xlu1 %2033  ;;  %v2032_v36 = vpop.permute.xlu0 %2031 }
 0x1f1   : > { %2125 = vst.msk [vmem:[#allocation3 + $0x28] sm:$0xff] %vm2119_vm8, %v2034_v0  ;;  %2124 = vst.msk [vmem:[#allocation3 + $0x20] sm:$0xff] %vm2119_vm8, %v2032_v36  ;;  %v1979_v0 = vld [vmem:[#allocation2 + $0x120] sm:$0xff] }
 0x1f2   : > { %1477 = vrot.lane.b32.xlu1 %v3720_v34, %s3243_s7  ;;  %1475 = vrot.lane.b32.xlu0 %v3703_v12, %s3243_s7 }
 0x1f4   : > { %v2038_v7 = vpop.permute.xlu1 %2037  ;;  %v2036_v8 = vpop.permute.xlu0 %2035 }
 0x1f5   : > { %2127 = vst.msk [vmem:[#allocation3 + $0x38] sm:$0xff] %vm2119_vm8, %v2038_v7  ;;  %2126 = vst.msk [vmem:[#allocation3 + $0x30] sm:$0xff] %vm2119_vm8, %v2036_v8 }
 0x1f6   : > { %1481 = vrot.lane.b32.xlu1 %v3737_v52, %s3243_s7  ;;  %1479 = vrot.lane.b32.xlu0 %v3730_v51, %s3243_s7 }
 0x1f8   : > { %v2227_v9 = vpop.permute.xlu1 %2226  ;;  %v2225_v11 = vpop.permute.xlu0 %2224 }
 0x1f9   : > { %2318 = vst.msk [vmem:[#allocation3 + $0x28] sm:$0xff] %vm2312_vm9, %v2227_v9  ;;  %2317 = vst.msk [vmem:[#allocation3 + $0x20] sm:$0xff] %vm2312_vm9, %v2225_v11  ;;  %v1982_v9 = vld [vmem:[#allocation2 + $0x140] sm:$0xff]  ;;  %v1981_v11 = vld [vmem:[#allocation2 + $0x138] sm:$0xff] }
 0x1fa   : > { %1670 = vrot.lane.b32.xlu1 %v2167_v38, %s3244_s8  ;;  %1668 = vrot.lane.b32.xlu0 %v2166_v44, %s3244_s8  ;;  %v1787_v38 = vld [vmem:[#allocation2 + $0x122] sm:$0xff] }
 0x1fc   : > { %v2231_v12 = vpop.permute.xlu1 %2230  ;;  %v2229_v34 = vpop.permute.xlu0 %2228 }
 0x1fd   : > { %2320 = vst.msk [vmem:[#allocation3 + $0x38] sm:$0xff] %vm2312_vm9, %v2231_v12  ;;  %2319 = vst.msk [vmem:[#allocation3 + $0x30] sm:$0xff] %vm2312_vm9, %v2229_v34 }
 0x1fe   : > { %1674 = vrot.lane.b32.xlu1 %v1591_v50, %s3244_s8  ;;  %1672 = vrot.lane.b32.xlu0 %v1590_v58, %s3244_s8 }
 0x200   : > { %v2420_v62 = vpop.permute.xlu1 %2419  ;;  %v2418_v63 = vpop.permute.xlu0 %2417 }
 0x201   : > { %2511 = vst.msk [vmem:[#allocation3 + $0x28] sm:$0xff] %vm2505_vm10, %v2420_v62  ;;  %2510 = vst.msk [vmem:[#allocation3 + $0x20] sm:$0xff] %vm2505_vm10, %v2418_v63  ;;  %v2175_v62 = vld [vmem:[#allocation2 + $0x141] sm:$0xff]  ;;  %v2174_v63 = vld [vmem:[#allocation2 + $0x139] sm:$0xff] }
 0x202   : > { %1863 = vrot.lane.b32.xlu1 %v1782_v46, %s3245_s9  ;;  %1861 = vrot.lane.b32.xlu0 %v1781_v48, %s3245_s9 }
 0x204   : > { %v2424_v6 = vpop.permute.xlu1 %2423  ;;  %v2422_v56 = vpop.permute.xlu0 %2421 }
 0x205   : > { %2513 = vst.msk [vmem:[#allocation3 + $0x38] sm:$0xff] %vm2505_vm10, %v2424_v6  ;;  %2512 = vst.msk [vmem:[#allocation3 + $0x30] sm:$0xff] %vm2505_vm10, %v2422_v56 }
 0x206   : > { %1867 = vrot.lane.b32.xlu1 %v1784_v2, %s3245_s9  ;;  %1865 = vrot.lane.b32.xlu0 %v1783_v4, %s3245_s9 }
 0x208   : > { %v1466_v13 = vpop.permute.xlu1 %1465  ;;  %v1464_v14 = vpop.permute.xlu0 %1463  ;;  %v2542_v40 = vld [vmem:[#allocation3 + $0x20] sm:$0xff]  ;;  %v2543_v41 = vld [vmem:[#allocation3 + $0x28] sm:$0xff] }
 0x209   : > { %1551 = vst.msk [vmem:[#allocation3 + $0x58] sm:$0xff] %vm1539_vm5, %v1466_v13  ;;  %1550 = vst.msk [vmem:[#allocation3 + $0x50] sm:$0xff] %vm1539_vm5, %v1464_v14  ;;  %v2572_v18 = vpack.c.bf16 %v2543_v41, %v2542_v40 }
 0x20a   : > { %2057 = vrot.lane.b32.xlu1 %v3737_v52, %s3246_s10  ;;  %2055 = vrot.lane.b32.xlu0 %v3730_v51, %s3246_s10 }
 0x20b   : > { %3173 = vmatprep.mubr.msk.bf16.mxu0 %vm2606_vm11, %v2572_v18  ;;  %v1406_v18 = vld [vmem:[#allocation2 + $0x158] sm:$0xff] }
 0x20c   : > { %v1655_v3 = vpop.permute.xlu1 %1654  ;;  %v1653_v17 = vpop.permute.xlu0 %1652  ;;  %v2544_v19 = vld [vmem:[#allocation3 + $0x30] sm:$0xff]  ;;  %v2545_v59 = vld [vmem:[#allocation3 + $0x38] sm:$0xff] }
 0x20d   : > { %1742 = vst.msk [vmem:[#allocation3 + $0x48] sm:$0xff] %vm1732_vm6, %v1655_v3  ;;  %1741 = vst.msk [vmem:[#allocation3 + $0x40] sm:$0xff] %vm1732_vm6, %v1653_v17  ;;  %v2573_v60 = vpack.c.bf16 %v2545_v59, %v2544_v19  ;;  %v1405_v3 = vld [vmem:[#allocation2 + $0x150] sm:$0xff] }
 0x20e   : > { %2061 = vrot.lane.b32.xlu1 %v3764_v30, %s3246_s10  ;;  %2059 = vrot.lane.b32.xlu0 %v3747_v10, %s3246_s10 }
 0x20f   : > { %3174 = vmatmul.mubr.msk.bf16.gmra.mrb[4].mxu0 %vm2606_vm11, %v2573_v60 }
 0x210   : > { %v1659_v51 = vpop.permute.xlu1 %1658  ;;  %v1657_v52 = vpop.permute.xlu0 %1656 }
 0x211   : > { %1744 = vst.msk [vmem:[#allocation3 + $0x58] sm:$0xff] %vm1732_vm6, %v1659_v51  ;;  %1743 = vst.msk [vmem:[#allocation3 + $0x50] sm:$0xff] %vm1732_vm6, %v1657_v52  ;;  %v1599_v51 = vld [vmem:[#allocation2 + $0x159] sm:$0xff]  ;;  %v1598_v52 = vld [vmem:[#allocation2 + $0x151] sm:$0xff] }
 0x212   : > { %2250 = vrot.lane.b32.xlu1 %v1591_v50, %s3247_s13  ;;  %2248 = vrot.lane.b32.xlu0 %v1590_v58, %s3247_s13 }
 0x214   : > { %v1848_v20 = vpop.permute.xlu1 %1847  ;;  %v1846_v22 = vpop.permute.xlu0 %1845 }
 0x215   : > { %1935 = vst.msk [vmem:[#allocation3 + $0x48] sm:$0xff] %vm1925_vm7, %v1848_v20  ;;  %1934 = vst.msk [vmem:[#allocation3 + $0x40] sm:$0xff] %vm1925_vm7, %v1846_v22 }
 0x216   : > { %2254 = vrot.lane.b32.xlu1 %v2171_v21, %s3247_s13  ;;  %2252 = vrot.lane.b32.xlu0 %v2170_v39, %s3247_s13 }
 0x218   : > { %v1852_v23 = vpop.permute.xlu1 %1851  ;;  %v1850_v24 = vpop.permute.xlu0 %1849 }
 0x219   : > { %1937 = vst.msk [vmem:[#allocation3 + $0x58] sm:$0xff] %vm1925_vm7, %v1852_v23  ;;  %1936 = vst.msk [vmem:[#allocation3 + $0x50] sm:$0xff] %vm1925_vm7, %v1850_v24 }
 0x21a   : > { %2443 = vrot.lane.b32.xlu1 %v1784_v2, %s3248_s18  ;;  %2441 = vrot.lane.b32.xlu0 %v1783_v4, %s3248_s18  ;;  %v2368_v2 = vld [vmem:[#allocation2 + $0x142] sm:$0xff]  ;;  %v2367_v4 = vld [vmem:[#allocation2 + $0x13a] sm:$0xff] }
 0x21c   : > { %v2042_v42 = vpop.permute.xlu1 %2041  ;;  %v2040_v43 = vpop.permute.xlu0 %2039 }
 0x21d   : > { %2129 = vst.msk [vmem:[#allocation3 + $0x48] sm:$0xff] %vm2119_vm8, %v2042_v42  ;;  %2128 = vst.msk [vmem:[#allocation3 + $0x40] sm:$0xff] %vm2119_vm8, %v2040_v43  ;;  %v1792_v42 = vld [vmem:[#allocation2 + $0x15a] sm:$0xff]  ;;  %v1791_v43 = vld [vmem:[#allocation2 + $0x152] sm:$0xff] }
 0x21e   : > { %2447 = vrot.lane.b32.xlu1 %v2364_v25, %s3248_s18  ;;  %2445 = vrot.lane.b32.xlu0 %v2363_v61, %s3248_s18 }
 0x220   : > { %v2046_v15 = vpop.permute.xlu1 %2045  ;;  %v2044_v16 = vpop.permute.xlu0 %2043 }
 0x221   : > { %2131 = vst.msk [vmem:[#allocation3 + $0x58] sm:$0xff] %vm2119_vm8, %v2046_v15  ;;  %2130 = vst.msk [vmem:[#allocation3 + $0x50] sm:$0xff] %vm2119_vm8, %v2044_v16 }
 0x222   : > { %1485 = vrot.lane.b32.xlu1 %v3764_v30, %s3243_s7  ;;  %1483 = vrot.lane.b32.xlu0 %v3747_v10, %s3243_s7 }
 0x224   : > { %v2235_v1 = vpop.permute.xlu1 %2234  ;;  %v2233_v5 = vpop.permute.xlu0 %2232 }
 0x225   : > { %2322 = vst.msk [vmem:[#allocation3 + $0x48] sm:$0xff] %vm2312_vm9, %v2235_v1  ;;  %2321 = vst.msk [vmem:[#allocation3 + $0x40] sm:$0xff] %vm2312_vm9, %v2233_v5 }
 0x226   : > { %1489 = vrot.lane.b32.xlu1 %v3781_v54, %s3243_s7  ;;  %1487 = vrot.lane.b32.xlu0 %v3774_v53, %s3243_s7  ;;  %v1595_v54 = vld [vmem:[#allocation2 + $0x129] sm:$0xff] }
 0x228   : > { %v2239_v49 = vpop.permute.xlu1 %2238  ;;  %v2237_v26 = vpop.permute.xlu0 %2236 }
 0x229   : > { %2324 = vst.msk [vmem:[#allocation3 + $0x58] sm:$0xff] %vm2312_vm9, %v2239_v49  ;;  %2323 = vst.msk [vmem:[#allocation3 + $0x50] sm:$0xff] %vm2312_vm9, %v2237_v26 }
 0x22a   : > { %1678 = vrot.lane.b32.xlu1 %v2171_v21, %s3244_s8  ;;  %1676 = vrot.lane.b32.xlu0 %v2170_v39, %s3244_s8 }
 0x22c   : > { %v2428_v10 = vpop.permute.xlu1 %2427  ;;  %v2426_v30 = vpop.permute.xlu0 %2425 }
 0x22d   : > { %2515 = vst.msk [vmem:[#allocation3 + $0x48] sm:$0xff] %vm2505_vm10, %v2428_v10  ;;  %2514 = vst.msk [vmem:[#allocation3 + $0x40] sm:$0xff] %vm2505_vm10, %v2426_v30  ;;  %v1986_v10 = vld [vmem:[#allocation2 + $0x170] sm:$0xff]  ;;  %v1985_v30 = vld [vmem:[#allocation2 + $0x168] sm:$0xff] }
 0x22e   : > { %1682 = vrot.lane.b32.xlu1 %v1595_v54, %s3244_s8  ;;  %1680 = vrot.lane.b32.xlu0 %v1594_v31, %s3244_s8 }
 0x230   : > { %v2432_v53 = vpop.permute.xlu1 %2431  ;;  %v2430_v27 = vpop.permute.xlu0 %2429 }
 0x231   : > { %2517 = vst.msk [vmem:[#allocation3 + $0x58] sm:$0xff] %vm2505_vm10, %v2432_v53  ;;  %2516 = vst.msk [vmem:[#allocation3 + $0x50] sm:$0xff] %vm2505_vm10, %v2430_v27 }
 0x232   : > { %1871 = vrot.lane.b32.xlu1 %v2364_v25, %s3245_s9  ;;  %1869 = vrot.lane.b32.xlu0 %v2363_v61, %s3245_s9 }
 0x234   : > { %v1470_v55 = vpop.permute.xlu1 %1469  ;;  %v1468_v57 = vpop.permute.xlu0 %1467  ;;  %v2546_v28 = vld [vmem:[#allocation3 + $0x40] sm:$0xff]  ;;  %v2547_v29 = vld [vmem:[#allocation3 + $0x48] sm:$0xff] }
 0x235   : > { %1553 = vst.msk [vmem:[#allocation3 + $0x68] sm:$0xff] %vm1539_vm5, %v1470_v55  ;;  %1552 = vst.msk [vmem:[#allocation3 + $0x60] sm:$0xff] %vm1539_vm5, %v1468_v57  ;;  %v2574_v44 = vpack.c.bf16 %v2547_v29, %v2546_v28  ;;  %v2179_v55 = vld [vmem:[#allocation2 + $0x171] sm:$0xff]  ;;  %v2178_v57 = vld [vmem:[#allocation2 + $0x169] sm:$0xff] }
 0x236   : > { %1875 = vrot.lane.b32.xlu1 %v1788_v37, %s3245_s9  ;;  %1873 = vrot.lane.b32.xlu0 %v1787_v38, %s3245_s9 }
 0x237   : > { %3177 = vmatprep.mubr.msk.bf16.mxu0 %vm2606_vm11, %v2574_v44  ;;  %v2372_v44 = vld [vmem:[#allocation2 + $0x172] sm:$0xff] }
 0x238   : > { %v1474_v45 = vpop.permute.xlu1 %1473  ;;  %v1472_v35 = vpop.permute.xlu0 %1471  ;;  %v2548_v32 = vld [vmem:[#allocation3 + $0x50] sm:$0xff]  ;;  %v2549_v33 = vld [vmem:[#allocation3 + $0x58] sm:$0xff] }
 0x239   : > { %1555 = vst.msk [vmem:[#allocation3 + $0x78] sm:$0xff] %vm1539_vm5, %v1474_v45  ;;  %1554 = vst.msk [vmem:[#allocation3 + $0x70] sm:$0xff] %vm1539_vm5, %v1472_v35  ;;  %v2575_v36 = vpack.c.bf16 %v2549_v33, %v2548_v32  ;;  %v2371_v45 = vld [vmem:[#allocation2 + $0x16a] sm:$0xff] }
 0x23a   : > { %2065 = vrot.lane.b32.xlu1 %v1980_v47, %s3246_s10  ;;  %2063 = vrot.lane.b32.xlu0 %v1979_v0, %s3246_s10  ;;  %v1410_v0 = vld [vmem:[#allocation2 + $0x188] sm:$0xff] }
 0x23b   : > { %3178 = vmatmul.mubr.msk.bf16.gmra.mrb[8].mxu0 %vm2606_vm11, %v2575_v36  ;;  %v1409_v36 = vld [vmem:[#allocation2 + $0x180] sm:$0xff] }
 0x23c   : > { %v1663_v7 = vpop.permute.xlu1 %1662  ;;  %v1661_v8 = vpop.permute.xlu0 %1660 }
 0x23d   : > { %1746 = vst.msk [vmem:[#allocation3 + $0x68] sm:$0xff] %vm1732_vm6, %v1663_v7  ;;  %1745 = vst.msk [vmem:[#allocation3 + $0x60] sm:$0xff] %vm1732_vm6, %v1661_v8 }
 0x23e   : > { %2069 = vrot.lane.b32.xlu1 %v1982_v9, %s3246_s10  ;;  %2067 = vrot.lane.b32.xlu0 %v1981_v11, %s3246_s10 }
 0x240   : > { %v1667_v12 = vpop.permute.xlu1 %1666  ;;  %v1665_v34 = vpop.permute.xlu0 %1664 }
 0x241   : > { %1748 = vst.msk [vmem:[#allocation3 + $0x78] sm:$0xff] %vm1732_vm6, %v1667_v12  ;;  %1747 = vst.msk [vmem:[#allocation3 + $0x70] sm:$0xff] %vm1732_vm6, %v1665_v34  ;;  %v1603_v12 = vld [vmem:[#allocation2 + $0x189] sm:$0xff]  ;;  %v1602_v34 = vld [vmem:[#allocation2 + $0x181] sm:$0xff] }
 0x242   : > { %2258 = vrot.lane.b32.xlu1 %v1595_v54, %s3247_s13  ;;  %2256 = vrot.lane.b32.xlu0 %v1594_v31, %s3247_s13 }
 0x244   : > { %v1856_v50 = vpop.permute.xlu1 %1855  ;;  %v1854_v58 = vpop.permute.xlu0 %1853 }
 0x245   : > { %1939 = vst.msk [vmem:[#allocation3 + $0x68] sm:$0xff] %vm1925_vm7, %v1856_v50  ;;  %1938 = vst.msk [vmem:[#allocation3 + $0x60] sm:$0xff] %vm1925_vm7, %v1854_v58 }
 0x246   : > { %2262 = vrot.lane.b32.xlu1 %v2175_v62, %s3247_s13  ;;  %2260 = vrot.lane.b32.xlu0 %v2174_v63, %s3247_s13 }
 0x248   : > { %v1860_v46 = vpop.permute.xlu1 %1859  ;;  %v1858_v48 = vpop.permute.xlu0 %1857 }
 0x249   : > { %1941 = vst.msk [vmem:[#allocation3 + $0x78] sm:$0xff] %vm1925_vm7, %v1860_v46  ;;  %1940 = vst.msk [vmem:[#allocation3 + $0x70] sm:$0xff] %vm1925_vm7, %v1858_v48 }
 0x24a   : > { %2451 = vrot.lane.b32.xlu1 %v1788_v37, %s3248_s18  ;;  %2449 = vrot.lane.b32.xlu0 %v1787_v38, %s3248_s18 }
 0x24c   : > { %v2050_v6 = vpop.permute.xlu1 %2049  ;;  %v2048_v56 = vpop.permute.xlu0 %2047 }
 0x24d   : > { %2133 = vst.msk [vmem:[#allocation3 + $0x68] sm:$0xff] %vm2119_vm8, %v2050_v6  ;;  %2132 = vst.msk [vmem:[#allocation3 + $0x60] sm:$0xff] %vm2119_vm8, %v2048_v56  ;;  %v1796_v6 = vld [vmem:[#allocation2 + $0x18a] sm:$0xff]  ;;  %v1795_v56 = vld [vmem:[#allocation2 + $0x182] sm:$0xff] }
 0x24e   : > { %2455 = vrot.lane.b32.xlu1 %v2368_v2, %s3248_s18  ;;  %2453 = vrot.lane.b32.xlu0 %v2367_v4, %s3248_s18 }
 0x250   : > { %v2054_v13 = vpop.permute.xlu1 %2053  ;;  %v2052_v14 = vpop.permute.xlu0 %2051 }
 0x251   : > { %2135 = vst.msk [vmem:[#allocation3 + $0x78] sm:$0xff] %vm2119_vm8, %v2054_v13  ;;  %2134 = vst.msk [vmem:[#allocation3 + $0x70] sm:$0xff] %vm2119_vm8, %v2052_v14 }
 0x252   : > { %1493 = vrot.lane.b32.xlu1 %v1982_v9, %s3243_s7  ;;  %1491 = vrot.lane.b32.xlu0 %v1981_v11, %s3243_s7 }
 0x254   : > { %v2243_v40 = vpop.permute.xlu1 %2242  ;;  %v2241_v41 = vpop.permute.xlu0 %2240 }
 0x255   : > { %2326 = vst.msk [vmem:[#allocation3 + $0x68] sm:$0xff] %vm2312_vm9, %v2243_v40  ;;  %2325 = vst.msk [vmem:[#allocation3 + $0x60] sm:$0xff] %vm2312_vm9, %v2241_v41 }
 0x256   : > { %1497 = vrot.lane.b32.xlu1 %v1406_v18, %s3243_s7  ;;  %1495 = vrot.lane.b32.xlu0 %v1405_v3, %s3243_s7 }
 0x258   : > { %v2247_v17 = vpop.permute.xlu1 %2246  ;;  %v2245_v19 = vpop.permute.xlu0 %2244 }
 0x259   : > { %2328 = vst.msk [vmem:[#allocation3 + $0x78] sm:$0xff] %vm2312_vm9, %v2247_v17  ;;  %2327 = vst.msk [vmem:[#allocation3 + $0x70] sm:$0xff] %vm2312_vm9, %v2245_v19  ;;  %v1990_v17 = vld [vmem:[#allocation2 + $0x1a0] sm:$0xff]  ;;  %v1989_v19 = vld [vmem:[#allocation2 + $0x198] sm:$0xff] }
 0x25a   : > { %1686 = vrot.lane.b32.xlu1 %v2175_v62, %s3244_s8  ;;  %1684 = vrot.lane.b32.xlu0 %v2174_v63, %s3244_s8 }
 0x25c   : > { %v2436_v59 = vpop.permute.xlu1 %2435  ;;  %v2434_v60 = vpop.permute.xlu0 %2433 }
 0x25d   : > { %2519 = vst.msk [vmem:[#allocation3 + $0x68] sm:$0xff] %vm2505_vm10, %v2436_v59  ;;  %2518 = vst.msk [vmem:[#allocation3 + $0x60] sm:$0xff] %vm2505_vm10, %v2434_v60 }
 0x25e   : > { %1690 = vrot.lane.b32.xlu1 %v1599_v51, %s3244_s8  ;;  %1688 = vrot.lane.b32.xlu0 %v1598_v52, %s3244_s8 }
 0x260   : > { %v2440_v20 = vpop.permute.xlu1 %2439  ;;  %v2438_v22 = vpop.permute.xlu0 %2437 }
 0x261   : > { %2521 = vst.msk [vmem:[#allocation3 + $0x78] sm:$0xff] %vm2505_vm10, %v2440_v20  ;;  %2520 = vst.msk [vmem:[#allocation3 + $0x70] sm:$0xff] %vm2505_vm10, %v2438_v22  ;;  %v2183_v20 = vld [vmem:[#allocation2 + $0x1a1] sm:$0xff]  ;;  %v2182_v22 = vld [vmem:[#allocation2 + $0x199] sm:$0xff] }
 0x262   : > { %1879 = vrot.lane.b32.xlu1 %v2368_v2, %s3245_s9  ;;  %1877 = vrot.lane.b32.xlu0 %v2367_v4, %s3245_s9 }
 0x264   : > { %v1478_v21 = vpop.permute.xlu1 %1477  ;;  %v1476_v39 = vpop.permute.xlu0 %1475  ;;  %v2550_v23 = vld [vmem:[#allocation3 + $0x60] sm:$0xff]  ;;  %v2551_v24 = vld [vmem:[#allocation3 + $0x68] sm:$0xff] }
 0x265   : > { %1557 = vst.msk [vmem:[#allocation3 + $0x88] sm:$0xff] %vm1539_vm5, %v1478_v21  ;;  %1556 = vst.msk [vmem:[#allocation3 + $0x80] sm:$0xff] %vm1539_vm5, %v1476_v39  ;;  %v2576_v25 = vpack.c.bf16 %v2551_v24, %v2550_v23 }
 0x266   : > { %1883 = vrot.lane.b32.xlu1 %v1792_v42, %s3245_s9  ;;  %1881 = vrot.lane.b32.xlu0 %v1791_v43, %s3245_s9 }
 0x267   : > { %3181 = vmatprep.mubr.msk.bf16.mxu0 %vm2606_vm11, %v2576_v25 }
 0x268   : > { %v1482_v61 = vpop.permute.xlu1 %1481  ;;  %v1480_v15 = vpop.permute.xlu0 %1479  ;;  %v2552_v16 = vld [vmem:[#allocation3 + $0x70] sm:$0xff]  ;;  %v2553_v1 = vld [vmem:[#allocation3 + $0x78] sm:$0xff] }
 0x269   : > { %1559 = vst.msk [vmem:[#allocation3 + $0x98] sm:$0xff] %vm1539_vm5, %v1482_v61  ;;  %1558 = vst.msk [vmem:[#allocation3 + $0x90] sm:$0xff] %vm1539_vm5, %v1480_v15  ;;  %v2577_v5 = vpack.c.bf16 %v2553_v1, %v2552_v16 }
 0x26a   : > { %2073 = vrot.lane.b32.xlu1 %v1406_v18, %s3246_s10  ;;  %2071 = vrot.lane.b32.xlu0 %v1405_v3, %s3246_s10 }
 0x26b   : > { %3182 = vmatmul.mubr.msk.bf16.gmra.mrb[12].mxu0 %vm2606_vm11, %v2577_v5 }
 0x26c   : > { %v1671_v49 = vpop.permute.xlu1 %1670  ;;  %v1669_v26 = vpop.permute.xlu0 %1668 }
 0x26d   : > { %1750 = vst.msk [vmem:[#allocation3 + $0x88] sm:$0xff] %vm1732_vm6, %v1671_v49  ;;  %1749 = vst.msk [vmem:[#allocation3 + $0x80] sm:$0xff] %vm1732_vm6, %v1669_v26 }
 0x26e   : > { %2077 = vrot.lane.b32.xlu1 %v1986_v10, %s3246_s10  ;;  %2075 = vrot.lane.b32.xlu0 %v1985_v30, %s3246_s10 }
 0x270   : > { %v1675_v54 = vpop.permute.xlu1 %1674  ;;  %v1673_v31 = vpop.permute.xlu0 %1672 }
 0x271   : > { %1752 = vst.msk [vmem:[#allocation3 + $0x98] sm:$0xff] %vm1732_vm6, %v1675_v54  ;;  %1751 = vst.msk [vmem:[#allocation3 + $0x90] sm:$0xff] %vm1732_vm6, %v1673_v31 }
 0x272   : > { %2266 = vrot.lane.b32.xlu1 %v1599_v51, %s3247_s13  ;;  %2264 = vrot.lane.b32.xlu0 %v1598_v52, %s3247_s13 }
 0x274   : > { %v1864_v53 = vpop.permute.xlu1 %1863  ;;  %v1862_v27 = vpop.permute.xlu0 %1861 }
 0x275   : > { %1943 = vst.msk [vmem:[#allocation3 + $0x88] sm:$0xff] %vm1925_vm7, %v1864_v53  ;;  %1942 = vst.msk [vmem:[#allocation3 + $0x80] sm:$0xff] %vm1925_vm7, %v1862_v27 }
 0x276   : > { %2270 = vrot.lane.b32.xlu1 %v2179_v55, %s3247_s13  ;;  %2268 = vrot.lane.b32.xlu0 %v2178_v57, %s3247_s13 }
 0x278   : > { %v1868_v28 = vpop.permute.xlu1 %1867  ;;  %v1866_v29 = vpop.permute.xlu0 %1865 }
 0x279   : > { %1945 = vst.msk [vmem:[#allocation3 + $0x98] sm:$0xff] %vm1925_vm7, %v1868_v28  ;;  %1944 = vst.msk [vmem:[#allocation3 + $0x90] sm:$0xff] %vm1925_vm7, %v1866_v29 }
 0x27a   : > { %2459 = vrot.lane.b32.xlu1 %v1792_v42, %s3248_s18  ;;  %2457 = vrot.lane.b32.xlu0 %v1791_v43, %s3248_s18  ;;  %v2376_v42 = vld [vmem:[#allocation2 + $0x1a2] sm:$0xff]  ;;  %v2375_v43 = vld [vmem:[#allocation2 + $0x19a] sm:$0xff] }
 0x27c   : > { %v2058_v37 = vpop.permute.xlu1 %2057  ;;  %v2056_v38 = vpop.permute.xlu0 %2055 }
 0x27d   : > { %2137 = vst.msk [vmem:[#allocation3 + $0x88] sm:$0xff] %vm2119_vm8, %v2058_v37  ;;  %2136 = vst.msk [vmem:[#allocation3 + $0x80] sm:$0xff] %vm2119_vm8, %v2056_v38 }
 0x27e   : > { %2463 = vrot.lane.b32.xlu1 %v2372_v44, %s3248_s18  ;;  %2461 = vrot.lane.b32.xlu0 %v2371_v45, %s3248_s18 }
 0x280   : > { %v2062_v35 = vpop.permute.xlu1 %2061  ;;  %v2060_v32 = vpop.permute.xlu0 %2059 }
 0x281   : > { %2139 = vst.msk [vmem:[#allocation3 + $0x98] sm:$0xff] %vm2119_vm8, %v2062_v35  ;;  %2138 = vst.msk [vmem:[#allocation3 + $0x90] sm:$0xff] %vm2119_vm8, %v2060_v32 }
 0x282   : > { %1501 = vrot.lane.b32.xlu1 %v1986_v10, %s3243_s7  ;;  %1499 = vrot.lane.b32.xlu0 %v1985_v30, %s3243_s7 }
 0x284   : > { %v2251_v33 = vpop.permute.xlu1 %2250  ;;  %v2249_v47 = vpop.permute.xlu0 %2248 }
 0x285   : > { %2330 = vst.msk [vmem:[#allocation3 + $0x88] sm:$0xff] %vm2312_vm9, %v2251_v33  ;;  %2329 = vst.msk [vmem:[#allocation3 + $0x80] sm:$0xff] %vm2312_vm9, %v2249_v47 }
 0x286   : > { %1505 = vrot.lane.b32.xlu1 %v1410_v0, %s3243_s7  ;;  %1503 = vrot.lane.b32.xlu0 %v1409_v36, %s3243_s7 }
 0x288   : > { %v2255_v7 = vpop.permute.xlu1 %2254  ;;  %v2253_v8 = vpop.permute.xlu0 %2252 }
 0x289   : > { %2332 = vst.msk [vmem:[#allocation3 + $0x98] sm:$0xff] %vm2312_vm9, %v2255_v7  ;;  %2331 = vst.msk [vmem:[#allocation3 + $0x90] sm:$0xff] %vm2312_vm9, %v2253_v8 }
 0x28a   : > { %1694 = vrot.lane.b32.xlu1 %v2179_v55, %s3244_s8  ;;  %1692 = vrot.lane.b32.xlu0 %v2178_v57, %s3244_s8 }
 0x28c   : > { %v2444_v9 = vpop.permute.xlu1 %2443  ;;  %v2442_v11 = vpop.permute.xlu0 %2441 }
 0x28d   : > { %2523 = vst.msk [vmem:[#allocation3 + $0x88] sm:$0xff] %vm2505_vm10, %v2444_v9  ;;  %2522 = vst.msk [vmem:[#allocation3 + $0x80] sm:$0xff] %vm2505_vm10, %v2442_v11 }
 0x28e   : > { %1698 = vrot.lane.b32.xlu1 %v1603_v12, %s3244_s8  ;;  %1696 = vrot.lane.b32.xlu0 %v1602_v34, %s3244_s8 }
 0x290   : > { %v2448_v50 = vpop.permute.xlu1 %2447  ;;  %v2446_v58 = vpop.permute.xlu0 %2445 }
 0x291   : > { %2525 = vst.msk [vmem:[#allocation3 + $0x98] sm:$0xff] %vm2505_vm10, %v2448_v50  ;;  %2524 = vst.msk [vmem:[#allocation3 + $0x90] sm:$0xff] %vm2505_vm10, %v2446_v58 }
 0x292   : > { %1887 = vrot.lane.b32.xlu1 %v2372_v44, %s3245_s9  ;;  %1885 = vrot.lane.b32.xlu0 %v2371_v45, %s3245_s9 }
 0x294   : > { %v1486_v62 = vpop.permute.xlu1 %1485  ;;  %v1484_v63 = vpop.permute.xlu0 %1483  ;;  %v2554_v46 = vld [vmem:[#allocation3 + $0x80] sm:$0xff]  ;;  %v2555_v48 = vld [vmem:[#allocation3 + $0x88] sm:$0xff] }
 0x295   : > { %1561 = vst.msk [vmem:[#allocation3 + $0xa8] sm:$0xff] %vm1539_vm5, %v1486_v62  ;;  %1560 = vst.msk [vmem:[#allocation3 + $0xa0] sm:$0xff] %vm1539_vm5, %v1484_v63  ;;  %v2578_v2 = vpack.c.bf16 %v2555_v48, %v2554_v46 }
 0x296   : > { %1891 = vrot.lane.b32.xlu1 %v1796_v6, %s3245_s9  ;;  %1889 = vrot.lane.b32.xlu0 %v1795_v56, %s3245_s9 }
 0x297   : > { %3185 = vmatprep.mubr.msk.bf16.mxu1 %vm2606_vm11, %v2578_v2 }
 0x298   : > { %v1490_v4 = vpop.permute.xlu1 %1489  ;;  %v1488_v13 = vpop.permute.xlu0 %1487  ;;  %v2556_v14 = vld [vmem:[#allocation3 + $0x90] sm:$0xff]  ;;  %v2557_v40 = vld [vmem:[#allocation3 + $0x98] sm:$0xff] }
 0x299   : > { %1563 = vst.msk [vmem:[#allocation3 + $0xb8] sm:$0xff] %vm1539_vm5, %v1490_v4  ;;  %1562 = vst.msk [vmem:[#allocation3 + $0xb0] sm:$0xff] %vm1539_vm5, %v1488_v13  ;;  %v2579_v41 = vpack.c.bf16 %v2557_v40, %v2556_v14 }
 0x29a   : > { %2081 = vrot.lane.b32.xlu1 %v1410_v0, %s3246_s10  ;;  %2079 = vrot.lane.b32.xlu0 %v1409_v36, %s3246_s10 }
 0x29b   : > { %3186 = vmatmul.mubr.msk.bf16.vlgmr.msra.gmra.mrb[0].mxu1 %vm2606_vm11, %v2579_v41 }
 0x29c   : > { %v1679_v18 = vpop.permute.xlu1 %1678  ;;  %v1677_v3 = vpop.permute.xlu0 %1676 }
 0x29d   : > { %1754 = vst.msk [vmem:[#allocation3 + $0xa8] sm:$0xff] %vm1732_vm6, %v1679_v18  ;;  %1753 = vst.msk [vmem:[#allocation3 + $0xa0] sm:$0xff] %vm1732_vm6, %v1677_v3 }
 0x29e   : > { %2085 = vrot.lane.b32.xlu1 %v1990_v17, %s3246_s10  ;;  %2083 = vrot.lane.b32.xlu0 %v1989_v19, %s3246_s10 }
 0x2a0   : > { %v1683_v59 = vpop.permute.xlu1 %1682  ;;  %v1681_v60 = vpop.permute.xlu0 %1680 }
 0x2a1   : > { %1756 = vst.msk [vmem:[#allocation3 + $0xb8] sm:$0xff] %vm1732_vm6, %v1683_v59  ;;  %1755 = vst.msk [vmem:[#allocation3 + $0xb0] sm:$0xff] %vm1732_vm6, %v1681_v60 }
 0x2a2   : > { %2274 = vrot.lane.b32.xlu1 %v1603_v12, %s3247_s13  ;;  %2272 = vrot.lane.b32.xlu0 %v1602_v34, %s3247_s13 }
 0x2a4   : > { %v1872_v51 = vpop.permute.xlu1 %1871  ;;  %v1870_v52 = vpop.permute.xlu0 %1869 }
 0x2a5   : > { %1947 = vst.msk [vmem:[#allocation3 + $0xa8] sm:$0xff] %vm1925_vm7, %v1872_v51  ;;  %1946 = vst.msk [vmem:[#allocation3 + $0xa0] sm:$0xff] %vm1925_vm7, %v1870_v52 }
 0x2a6   : > { %2278 = vrot.lane.b32.xlu1 %v2183_v20, %s3247_s13  ;;  %2276 = vrot.lane.b32.xlu0 %v2182_v22, %s3247_s13 }
 0x2a8   : > { %v1876_v21 = vpop.permute.xlu1 %1875  ;;  %v1874_v39 = vpop.permute.xlu0 %1873 }
 0x2a9   : > { %1949 = vst.msk [vmem:[#allocation3 + $0xb8] sm:$0xff] %vm1925_vm7, %v1876_v21  ;;  %1948 = vst.msk [vmem:[#allocation3 + $0xb0] sm:$0xff] %vm1925_vm7, %v1874_v39 }
 0x2aa   : > { %2467 = vrot.lane.b32.xlu1 %v1796_v6, %s3248_s18  ;;  %2465 = vrot.lane.b32.xlu0 %v1795_v56, %s3248_s18 }
 0x2ac   : > { %v2066_v23 = vpop.permute.xlu1 %2065  ;;  %v2064_v24 = vpop.permute.xlu0 %2063 }
 0x2ad   : > { %2141 = vst.msk [vmem:[#allocation3 + $0xa8] sm:$0xff] %vm2119_vm8, %v2066_v23  ;;  %2140 = vst.msk [vmem:[#allocation3 + $0xa0] sm:$0xff] %vm2119_vm8, %v2064_v24 }
 0x2ae   : > { %2471 = vrot.lane.b32.xlu1 %v2376_v42, %s3248_s18  ;;  %2469 = vrot.lane.b32.xlu0 %v2375_v43, %s3248_s18 }
 0x2b0   : > { %v2070_v25 = vpop.permute.xlu1 %2069  ;;  %v2068_v61 = vpop.permute.xlu0 %2067 }
 0x2b1   : > { %2143 = vst.msk [vmem:[#allocation3 + $0xb8] sm:$0xff] %vm2119_vm8, %v2070_v25  ;;  %2142 = vst.msk [vmem:[#allocation3 + $0xb0] sm:$0xff] %vm2119_vm8, %v2068_v61 }
 0x2b4   : > { %v2259_v15 = vpop.permute.xlu1 %2258  ;;  %v2257_v16 = vpop.permute.xlu0 %2256 }
 0x2b5   : > { %2334 = vst.msk [vmem:[#allocation3 + $0xa8] sm:$0xff] %vm2312_vm9, %v2259_v15  ;;  %2333 = vst.msk [vmem:[#allocation3 + $0xa0] sm:$0xff] %vm2312_vm9, %v2257_v16 }
 0x2b8   : > { %v2263_v1 = vpop.permute.xlu1 %2262  ;;  %v2261_v5 = vpop.permute.xlu0 %2260 }
 0x2b9   : > { %2336 = vst.msk [vmem:[#allocation3 + $0xb8] sm:$0xff] %vm2312_vm9, %v2263_v1  ;;  %2335 = vst.msk [vmem:[#allocation3 + $0xb0] sm:$0xff] %vm2312_vm9, %v2261_v5 }
 0x2ba   : > { %v3171_v49 = vpop.f32.mrb[0].mxu0 }
 0x2bb   : > { %2822 = vst.msk [vmem:[%s4407_s24 + $0x10] sm:$0xff] %vm872_vm1, %v3171_v49  ;;  %v2693_v26 = vpop.f32.mrb[1].mxu0  ;;  %v2925_v27 = vmul.f32 %v3171_v49, %v3171_v49  ;;  %v2855_v44 = vsel %vm872_vm1, %v3171_v49, 0.0 }
 0x2bc   : > { %2820 = vst.msk [vmem:[%s4407_s24] sm:$0xff] %vm872_vm1, %v2693_v26  ;;  %v2452_v10 = vpop.permute.xlu1 %2451  ;;  %v2450_v30 = vpop.permute.xlu0 %2449  ;;  %v2923_v54 = vmul.f32 %v2693_v26, %v2693_v26  ;;  %v2852_v55 = vsel %vm872_vm1, %v2693_v26, 0.0 }
 0x2bd   : > { %2527 = vst.msk [vmem:[#allocation3 + $0xa8] sm:$0xff] %vm2505_vm10, %v2452_v10  ;;  %2526 = vst.msk [vmem:[#allocation3 + $0xa0] sm:$0xff] %vm2505_vm10, %v2450_v30  ;;  %v3172_v31 = vpop.f32.mrb[2].mxu0  ;;  %v2958_v0 = vsel %vm872_vm1, %v2925_v27, 0.0 }
 0x2be   : > { %2823 = vst.msk [vmem:[%s4407_s24 + $0x18] sm:$0xff] %vm872_vm1, %v3172_v31  ;;  %v2696_v53 = vpop.f32.mrb[3].mxu0  ;;  %v2955_v45 = vsel %vm872_vm1, %v2923_v54, 0.0  ;;  %v2926_v35 = vmul.f32 %v3172_v31, %v3172_v31  ;;  %v2857_v36 = vsel %vm872_vm1, %v3172_v31, 0.0 }
 0x2bf   : > { %2821 = vst.msk [vmem:[%s4407_s24 + $0x8] sm:$0xff] %vm872_vm1, %v2696_v53  ;;  %v2853_v57 = vsel %vm872_vm1, %v2696_v53, 0.0  ;;  %v2924_v28 = vmul.f32 %v2696_v53, %v2696_v53 }
 0x2c0   : > { %v2854_v29 = vadd.f32 %v2853_v57, %v2852_v55  ;;  %v2456_v37 = vpop.permute.xlu1 %2455  ;;  %v2454_v38 = vpop.permute.xlu0 %2453  ;;  %v2960_v50 = vsel %vm872_vm1, %v2926_v35, 0.0 }
 0x2c1   : > { %v2956_v32 = vsel %vm872_vm1, %v2924_v28, 0.0  ;;  %2529 = vst.msk [vmem:[#allocation3 + $0xb8] sm:$0xff] %vm2505_vm10, %v2456_v37  ;;  %2528 = vst.msk [vmem:[#allocation3 + $0xb0] sm:$0xff] %vm2505_vm10, %v2454_v38 }
 0x2c2   : > { %v2856_v33 = vadd.f32 %v2855_v44, %v2854_v29  ;;  %v2957_v47 = vadd.f32 %v2956_v32, %v2955_v45 }
 0x2c4   : > { %v2959_v7 = vadd.f32 %v2958_v0, %v2957_v47  ;;  %v1494_v8 = vpop.permute.xlu1 %1493  ;;  %v1492_v9 = vpop.permute.xlu0 %1491  ;;  %v2558_v11 = vld [vmem:[#allocation3 + $0xa0] sm:$0xff]  ;;  %v2559_v12 = vld [vmem:[#allocation3 + $0xa8] sm:$0xff]  ;;  %v2858_v34 = vadd.f32 %v2857_v36, %v2856_v33 }
 0x2c5   : > { %1565 = vst.msk [vmem:[#allocation3 + $0xc8] sm:$0xff] %vm1539_vm5, %v1494_v8  ;;  %1564 = vst.msk [vmem:[#allocation3 + $0xc0] sm:$0xff] %vm1539_vm5, %v1492_v9  ;;  %v2580_v58 = vpack.c.bf16 %v2559_v12, %v2558_v11 }
 0x2c6   : > { %v2961_v62 = vadd.f32 %v2960_v50, %v2959_v7 }
 0x2c7   : > { %3189 = vmatprep.mubr.msk.bf16.mxu1 %vm2606_vm11, %v2580_v58 }
 0x2c8   : > { %v1498_v63 = vpop.permute.xlu1 %1497  ;;  %v1496_v46 = vpop.permute.xlu0 %1495  ;;  %v2560_v48 = vld [vmem:[#allocation3 + $0xb0] sm:$0xff]  ;;  %v2561_v6 = vld [vmem:[#allocation3 + $0xb8] sm:$0xff] }
 0x2c9   : > { %1567 = vst.msk [vmem:[#allocation3 + $0xd8] sm:$0xff] %vm1539_vm5, %v1498_v63  ;;  %1566 = vst.msk [vmem:[#allocation3 + $0xd0] sm:$0xff] %vm1539_vm5, %v1496_v46  ;;  %v2581_v56 = vpack.c.bf16 %v2561_v6, %v2560_v48 }
 0x2cb   : > { %3190 = vmatmul.mubr.msk.bf16.gmra.mrb[4].mxu1 %vm2606_vm11, %v2581_v56 }
 0x2cc   : > { %v1687_v2 = vpop.permute.xlu1 %1686  ;;  %v1685_v4 = vpop.permute.xlu0 %1684 }
 0x2cd   : > { %1758 = vst.msk [vmem:[#allocation3 + $0xc8] sm:$0xff] %vm1732_vm6, %v1687_v2  ;;  %1757 = vst.msk [vmem:[#allocation3 + $0xc0] sm:$0xff] %vm1732_vm6, %v1685_v4 }
 0x2d0   : > { %v1691_v13 = vpop.permute.xlu1 %1690  ;;  %v1689_v14 = vpop.permute.xlu0 %1688 }
 0x2d1   : > { %1760 = vst.msk [vmem:[#allocation3 + $0xd8] sm:$0xff] %vm1732_vm6, %v1691_v13  ;;  %1759 = vst.msk [vmem:[#allocation3 + $0xd0] sm:$0xff] %vm1732_vm6, %v1689_v14 }
 0x2d4   : > { %v1880_v40 = vpop.permute.xlu1 %1879  ;;  %v1878_v41 = vpop.permute.xlu0 %1877 }
 0x2d5   : > { %1951 = vst.msk [vmem:[#allocation3 + $0xc8] sm:$0xff] %vm1925_vm7, %v1880_v40  ;;  %1950 = vst.msk [vmem:[#allocation3 + $0xc0] sm:$0xff] %vm1925_vm7, %v1878_v41 }
 0x2d8   : > { %v1884_v18 = vpop.permute.xlu1 %1883  ;;  %v1882_v3 = vpop.permute.xlu0 %1881 }
 0x2d9   : > { %1953 = vst.msk [vmem:[#allocation3 + $0xd8] sm:$0xff] %vm1925_vm7, %v1884_v18  ;;  %1952 = vst.msk [vmem:[#allocation3 + $0xd0] sm:$0xff] %vm1925_vm7, %v1882_v3 }
 0x2dc   : > { %v2074_v17 = vpop.permute.xlu1 %2073  ;;  %v2072_v19 = vpop.permute.xlu0 %2071 }
 0x2dd   : > { %2145 = vst.msk [vmem:[#allocation3 + $0xc8] sm:$0xff] %vm2119_vm8, %v2074_v17  ;;  %2144 = vst.msk [vmem:[#allocation3 + $0xc0] sm:$0xff] %vm2119_vm8, %v2072_v19 }
 0x2e0   : > { %v2078_v59 = vpop.permute.xlu1 %2077  ;;  %v2076_v60 = vpop.permute.xlu0 %2075 }
 0x2e1   : > { %2147 = vst.msk [vmem:[#allocation3 + $0xd8] sm:$0xff] %vm2119_vm8, %v2078_v59  ;;  %2146 = vst.msk [vmem:[#allocation3 + $0xd0] sm:$0xff] %vm2119_vm8, %v2076_v60 }
 0x2e2   : > { %v3175_v51 = vpop.f32.mrb[4].mxu0 }
 0x2e3   : > { %2826 = vst.msk [vmem:[%s4407_s24 + $0x30] sm:$0xff] %vm872_vm1, %v3175_v51  ;;  %v2709_v52 = vpop.f32.mrb[5].mxu0  ;;  %v2929_v25 = vmul.f32 %v3175_v51, %v3175_v51  ;;  %v2863_v26 = vsel %vm872_vm1, %v3175_v51, 0.0 }
 0x2e4   : > { %2824 = vst.msk [vmem:[%s4407_s24 + $0x20] sm:$0xff] %vm872_vm1, %v2709_v52  ;;  %v2859_v20 = vsel %vm872_vm1, %v2709_v52, 0.0  ;;  %v2927_v22 = vmul.f32 %v2709_v52, %v2709_v52  ;;  %v2267_v21 = vpop.permute.xlu1 %2266  ;;  %v2265_v39 = vpop.permute.xlu0 %2264 }
 0x2e5   : > { %v2860_v23 = vadd.f32 %v2859_v20, %v2858_v34  ;;  %2338 = vst.msk [vmem:[#allocation3 + $0xc8] sm:$0xff] %vm2312_vm9, %v2267_v21  ;;  %2337 = vst.msk [vmem:[#allocation3 + $0xc0] sm:$0xff] %vm2312_vm9, %v2265_v39  ;;  %v3176_v24 = vpop.f32.mrb[6].mxu0  ;;  %v2966_v53 = vsel %vm872_vm1, %v2929_v25, 0.0 }
 0x2e6   : > { %v2962_v42 = vsel %vm872_vm1, %v2927_v22, 0.0  ;;  %2827 = vst.msk [vmem:[%s4407_s24 + $0x38] sm:$0xff] %vm872_vm1, %v3176_v24  ;;  %v2712_v43 = vpop.f32.mrb[7].mxu0  ;;  %v2930_v10 = vmul.f32 %v3176_v24, %v3176_v24  ;;  %v2865_v27 = vsel %vm872_vm1, %v3176_v24, 0.0 }
 0x2e7   : > { %v2963_v61 = vadd.f32 %v2962_v42, %v2961_v62  ;;  %2825 = vst.msk [vmem:[%s4407_s24 + $0x28] sm:$0xff] %vm872_vm1, %v2712_v43  ;;  %v2861_v15 = vsel %vm872_vm1, %v2712_v43, 0.0  ;;  %v2928_v16 = vmul.f32 %v2712_v43, %v2712_v43 }
 0x2e8   : > { %v2862_v1 = vadd.f32 %v2861_v15, %v2860_v23  ;;  %v2271_v5 = vpop.permute.xlu1 %2270  ;;  %v2269_v49 = vpop.permute.xlu0 %2268  ;;  %v2968_v37 = vsel %vm872_vm1, %v2930_v10, 0.0 }
 0x2e9   : > { %v2964_v30 = vsel %vm872_vm1, %v2928_v16, 0.0  ;;  %2340 = vst.msk [vmem:[#allocation3 + $0xd8] sm:$0xff] %vm2312_vm9, %v2271_v5  ;;  %2339 = vst.msk [vmem:[#allocation3 + $0xd0] sm:$0xff] %vm2312_vm9, %v2269_v49 }
 0x2ea   : > { %v2864_v54 = vadd.f32 %v2863_v26, %v2862_v1  ;;  %v2965_v31 = vadd.f32 %v2964_v30, %v2963_v61 }
 0x2ec   : > { %v2967_v55 = vadd.f32 %v2966_v53, %v2965_v31  ;;  %v2460_v57 = vpop.permute.xlu1 %2459  ;;  %v2458_v28 = vpop.permute.xlu0 %2457  ;;  %v2866_v29 = vadd.f32 %v2865_v27, %v2864_v54 }
 0x2ed   : > { %2531 = vst.msk [vmem:[#allocation3 + $0xc8] sm:$0xff] %vm2505_vm10, %v2460_v57  ;;  %2530 = vst.msk [vmem:[#allocation3 + $0xc0] sm:$0xff] %vm2505_vm10, %v2458_v28 }
 0x2ee   : > { %v2969_v38 = vadd.f32 %v2968_v37, %v2967_v55 }
 0x2f0   : > { %v2464_v44 = vpop.permute.xlu1 %2463  ;;  %v2462_v45 = vpop.permute.xlu0 %2461 }
 0x2f1   : > { %2533 = vst.msk [vmem:[#allocation3 + $0xd8] sm:$0xff] %vm2505_vm10, %v2464_v44  ;;  %2532 = vst.msk [vmem:[#allocation3 + $0xd0] sm:$0xff] %vm2505_vm10, %v2462_v45 }
 0x2f4   : > { %v1502_v35 = vpop.permute.xlu1 %1501  ;;  %v1500_v32 = vpop.permute.xlu0 %1499  ;;  %v2562_v33 = vld [vmem:[#allocation3 + $0xc0] sm:$0xff]  ;;  %v2563_v47 = vld [vmem:[#allocation3 + $0xc8] sm:$0xff] }
 0x2f5   : > { %1569 = vst.msk [vmem:[#allocation3 + $0xe8] sm:$0xff] %vm1539_vm5, %v1502_v35  ;;  %1568 = vst.msk [vmem:[#allocation3 + $0xe0] sm:$0xff] %vm1539_vm5, %v1500_v32  ;;  %v2582_v0 = vpack.c.bf16 %v2563_v47, %v2562_v33 }
 0x2f7   : > { %3193 = vmatprep.mubr.msk.bf16.mxu1 %vm2606_vm11, %v2582_v0 }
 0x2f8   : > { %v1506_v36 = vpop.permute.xlu1 %1505  ;;  %v1504_v7 = vpop.permute.xlu0 %1503  ;;  %v2564_v8 = vld [vmem:[#allocation3 + $0xd0] sm:$0xff]  ;;  %v2565_v9 = vld [vmem:[#allocation3 + $0xd8] sm:$0xff] }
 0x2f9   : > { %1571 = vst.msk [vmem:[#allocation3 + $0xf8] sm:$0xff] %vm1539_vm5, %v1506_v36  ;;  %1570 = vst.msk [vmem:[#allocation3 + $0xf0] sm:$0xff] %vm1539_vm5, %v1504_v7  ;;  %v2583_v11 = vpack.c.bf16 %v2565_v9, %v2564_v8 }
 0x2fb   : > { %3194 = vmatmul.mubr.msk.bf16.gmra.mrb[8].mxu1 %vm2606_vm11, %v2583_v11 }
 0x2fc   : > { %v1695_v12 = vpop.permute.xlu1 %1694  ;;  %v1693_v34 = vpop.permute.xlu0 %1692 }
 0x2fd   : > { %1762 = vst.msk [vmem:[#allocation3 + $0xe8] sm:$0xff] %vm1732_vm6, %v1695_v12  ;;  %1761 = vst.msk [vmem:[#allocation3 + $0xe0] sm:$0xff] %vm1732_vm6, %v1693_v34 }
 0x300   : > { %v1699_v50 = vpop.permute.xlu1 %1698  ;;  %v1697_v58 = vpop.permute.xlu0 %1696 }
 0x301   : > { %1764 = vst.msk [vmem:[#allocation3 + $0xf8] sm:$0xff] %vm1732_vm6, %v1699_v50  ;;  %1763 = vst.msk [vmem:[#allocation3 + $0xf0] sm:$0xff] %vm1732_vm6, %v1697_v58 }
 0x304   : > { %v1888_v62 = vpop.permute.xlu1 %1887  ;;  %v1886_v63 = vpop.permute.xlu0 %1885 }
 0x305   : > { %1955 = vst.msk [vmem:[#allocation3 + $0xe8] sm:$0xff] %vm1925_vm7, %v1888_v62  ;;  %1954 = vst.msk [vmem:[#allocation3 + $0xe0] sm:$0xff] %vm1925_vm7, %v1886_v63 }
 0x308   : > { %v1892_v46 = vpop.permute.xlu1 %1891  ;;  %v1890_v48 = vpop.permute.xlu0 %1889 }
 0x309   : > { %1957 = vst.msk [vmem:[#allocation3 + $0xf8] sm:$0xff] %vm1925_vm7, %v1892_v46  ;;  %1956 = vst.msk [vmem:[#allocation3 + $0xf0] sm:$0xff] %vm1925_vm7, %v1890_v48 }
 0x30c   : > { %v2082_v6 = vpop.permute.xlu1 %2081  ;;  %v2080_v56 = vpop.permute.xlu0 %2079 }
 0x30d   : > { %2149 = vst.msk [vmem:[#allocation3 + $0xe8] sm:$0xff] %vm2119_vm8, %v2082_v6  ;;  %2148 = vst.msk [vmem:[#allocation3 + $0xe0] sm:$0xff] %vm2119_vm8, %v2080_v56 }
 0x30e   : > { %v3179_v2 = vpop.f32.mrb[8].mxu0 }
 0x30f   : > { %2830 = vst.msk [vmem:[%s4407_s24 + $0x50] sm:$0xff] %vm872_vm1, %v3179_v2  ;;  %v2725_v4 = vpop.f32.mrb[9].mxu0  ;;  %v2933_v59 = vmul.f32 %v3179_v2, %v3179_v2  ;;  %v2871_v39 = vsel %vm872_vm1, %v3179_v2, 0.0 }
 0x310   : > { %2828 = vst.msk [vmem:[%s4407_s24 + $0x40] sm:$0xff] %vm872_vm1, %v2725_v4  ;;  %v2867_v13 = vsel %vm872_vm1, %v2725_v4, 0.0  ;;  %v2931_v14 = vmul.f32 %v2725_v4, %v2725_v4  ;;  %v2086_v40 = vpop.permute.xlu1 %2085  ;;  %v2084_v41 = vpop.permute.xlu0 %2083 }
 0x311   : > { %v2868_v18 = vadd.f32 %v2867_v13, %v2866_v29  ;;  %2151 = vst.msk [vmem:[#allocation3 + $0xf8] sm:$0xff] %vm2119_vm8, %v2086_v40  ;;  %2150 = vst.msk [vmem:[#allocation3 + $0xf0] sm:$0xff] %vm2119_vm8, %v2084_v41  ;;  %v3180_v3 = vpop.f32.mrb[10].mxu0  ;;  %v2974_v25 = vsel %vm872_vm1, %v2933_v59, 0.0 }
 0x312   : > { %v2970_v17 = vsel %vm872_vm1, %v2931_v14, 0.0  ;;  %2831 = vst.msk [vmem:[%s4407_s24 + $0x58] sm:$0xff] %vm872_vm1, %v3180_v3  ;;  %v2728_v19 = vpop.f32.mrb[11].mxu0  ;;  %v2934_v23 = vmul.f32 %v3180_v3, %v3180_v3  ;;  %v2873_v61 = vsel %vm872_vm1, %v3180_v3, 0.0 }
 0x313   : > { %v2971_v60 = vadd.f32 %v2970_v17, %v2969_v38  ;;  %2829 = vst.msk [vmem:[%s4407_s24 + $0x48] sm:$0xff] %vm872_vm1, %v2728_v19  ;;  %v2869_v51 = vsel %vm872_vm1, %v2728_v19, 0.0  ;;  %v2932_v52 = vmul.f32 %v2728_v19, %v2728_v19 }
 0x314   : > { %v2870_v20 = vadd.f32 %v2869_v51, %v2868_v18  ;;  %v2275_v22 = vpop.permute.xlu1 %2274  ;;  %v2273_v21 = vpop.permute.xlu0 %2272  ;;  %v2976_v49 = vsel %vm872_vm1, %v2934_v23, 0.0 }
 0x315   : > { %v2972_v24 = vsel %vm872_vm1, %v2932_v52, 0.0  ;;  %2342 = vst.msk [vmem:[#allocation3 + $0xe8] sm:$0xff] %vm2312_vm9, %v2275_v22  ;;  %2341 = vst.msk [vmem:[#allocation3 + $0xe0] sm:$0xff] %vm2312_vm9, %v2273_v21 }
 0x316   : > { %v2872_v42 = vadd.f32 %v2871_v39, %v2870_v20  ;;  %v2973_v43 = vadd.f32 %v2972_v24, %v2971_v60 }
 0x318   : > { %v2975_v15 = vadd.f32 %v2974_v25, %v2973_v43  ;;  %v2279_v16 = vpop.permute.xlu1 %2278  ;;  %v2277_v1 = vpop.permute.xlu0 %2276  ;;  %v2874_v5 = vadd.f32 %v2873_v61, %v2872_v42 }
 0x319   : > { %2344 = vst.msk [vmem:[#allocation3 + $0xf8] sm:$0xff] %vm2312_vm9, %v2279_v16  ;;  %2343 = vst.msk [vmem:[#allocation3 + $0xf0] sm:$0xff] %vm2312_vm9, %v2277_v1 }
 0x31a   : > { %v2977_v26 = vadd.f32 %v2976_v49, %v2975_v15 }
 0x31c   : > { %v2468_v10 = vpop.permute.xlu1 %2467  ;;  %v2466_v30 = vpop.permute.xlu0 %2465 }
 0x31d   : > { %2535 = vst.msk [vmem:[#allocation3 + $0xe8] sm:$0xff] %vm2505_vm10, %v2468_v10  ;;  %2534 = vst.msk [vmem:[#allocation3 + $0xe0] sm:$0xff] %vm2505_vm10, %v2466_v30 }
 0x320   : > { %v2472_v54 = vpop.permute.xlu1 %2471  ;;  %v2470_v31 = vpop.permute.xlu0 %2469 }
 0x321   : > { %2537 = vst.msk [vmem:[#allocation3 + $0xf8] sm:$0xff] %vm2505_vm10, %v2472_v54  ;;  %2536 = vst.msk [vmem:[#allocation3 + $0xf0] sm:$0xff] %vm2505_vm10, %v2470_v31 }
 0x324   : > { %v2566_v53 = vld [vmem:[#allocation3 + $0xe0] sm:$0xff]  ;;  %v2567_v27 = vld [vmem:[#allocation3 + $0xe8] sm:$0xff] }
 0x325   : > { %v2584_v55 = vpack.c.bf16 %v2567_v27, %v2566_v53 }
 0x327   : > { %3197 = vmatprep.mubr.msk.bf16.mxu1 %vm2606_vm11, %v2584_v55 }
 0x328   : > { %v2568_v57 = vld [vmem:[#allocation3 + $0xf0] sm:$0xff]  ;;  %v2569_v28 = vld [vmem:[#allocation3 + $0xf8] sm:$0xff] }
 0x329   : > { %v2585_v29 = vpack.c.bf16 %v2569_v28, %v2568_v57 }
 0x32b   : > { %3198 = vmatmul.mubr.msk.bf16.gmra.mrb[12].mxu1 %vm2606_vm11, %v2585_v29 }
 0x33e   : > { %v3183_v37 = vpop.f32.mrb[12].mxu0 }
 0x33f   : > { %2834 = vst.msk [vmem:[%s4407_s24 + $0x70] sm:$0xff] %vm872_vm1, %v3183_v37  ;;  %v2741_v38 = vpop.f32.mrb[13].mxu0  ;;  %v2937_v47 = vmul.f32 %v3183_v37, %v3183_v37  ;;  %v2879_v11 = vsel %vm872_vm1, %v3183_v37, 0.0 }
 0x340   : > { %2832 = vst.msk [vmem:[%s4407_s24 + $0x60] sm:$0xff] %vm872_vm1, %v2741_v38  ;;  %v2875_v44 = vsel %vm872_vm1, %v2741_v38, 0.0  ;;  %v2935_v45 = vmul.f32 %v2741_v38, %v2741_v38  ;;  %v3184_v35 = vpop.f32.mrb[14].mxu0 }
 0x341   : > { %v2876_v32 = vadd.f32 %v2875_v44, %v2874_v5  ;;  %2835 = vst.msk [vmem:[%s4407_s24 + $0x78] sm:$0xff] %vm872_vm1, %v3184_v35  ;;  %v2744_v33 = vpop.f32.mrb[15].mxu0  ;;  %v2938_v12 = vmul.f32 %v3184_v35, %v3184_v35  ;;  %v2982_v62 = vsel %vm872_vm1, %v2937_v47, 0.0  ;;  %v2881_v63 = vsel %vm872_vm1, %v3184_v35, 0.0 }
 0x342   : > { %v2978_v0 = vsel %vm872_vm1, %v2935_v45, 0.0  ;;  %2833 = vst.msk [vmem:[%s4407_s24 + $0x68] sm:$0xff] %vm872_vm1, %v2744_v33  ;;  %v2877_v36 = vsel %vm872_vm1, %v2744_v33, 0.0  ;;  %v2936_v7 = vmul.f32 %v2744_v33, %v2744_v33 }
 0x343   : > { %v2979_v8 = vadd.f32 %v2978_v0, %v2977_v26  ;;  %v2878_v9 = vadd.f32 %v2877_v36, %v2876_v32  ;;  %v2984_v6 = vsel %vm872_vm1, %v2938_v12, 0.0 }
 0x344   : > { %v2980_v34 = vsel %vm872_vm1, %v2936_v7, 0.0 }
 0x345   : > { %v2880_v50 = vadd.f32 %v2879_v11, %v2878_v9  ;;  %v2981_v58 = vadd.f32 %v2980_v34, %v2979_v8 }
 0x347   : > { %v2983_v46 = vadd.f32 %v2982_v62, %v2981_v58  ;;  %v2882_v48 = vadd.f32 %v2881_v63, %v2880_v50 }
 0x349   : > { %v2985_v56 = vadd.f32 %v2984_v6, %v2983_v46 }
 0x36e   : > { %v3187_v2 = vpop.f32.mrb[0].mxu1 }
 0x36f   : > { %2838 = vst.msk [vmem:[%s4407_s24 + $0x90] sm:$0xff] %vm872_vm1, %v3187_v2  ;;  %v2757_v4 = vpop.f32.mrb[1].mxu1  ;;  %v2941_v3 = vmul.f32 %v3187_v2, %v3187_v2  ;;  %v2887_v52 = vsel %vm872_vm1, %v3187_v2, 0.0 }
 0x370   : > { %2836 = vst.msk [vmem:[%s4407_s24 + $0x80] sm:$0xff] %vm872_vm1, %v2757_v4  ;;  %v2883_v13 = vsel %vm872_vm1, %v2757_v4, 0.0  ;;  %v2939_v14 = vmul.f32 %v2757_v4, %v2757_v4  ;;  %v3188_v40 = vpop.f32.mrb[2].mxu1 }
 0x371   : > { %v2884_v41 = vadd.f32 %v2883_v13, %v2882_v48  ;;  %2839 = vst.msk [vmem:[%s4407_s24 + $0x98] sm:$0xff] %vm872_vm1, %v3188_v40  ;;  %v2760_v18 = vpop.f32.mrb[3].mxu1  ;;  %v2942_v20 = vmul.f32 %v3188_v40, %v3188_v40  ;;  %v2990_v23 = vsel %vm872_vm1, %v2941_v3, 0.0  ;;  %v2889_v24 = vsel %vm872_vm1, %v3188_v40, 0.0 }
 0x372   : > { %v2986_v17 = vsel %vm872_vm1, %v2939_v14, 0.0  ;;  %2837 = vst.msk [vmem:[%s4407_s24 + $0x88] sm:$0xff] %vm872_vm1, %v2760_v18  ;;  %v2885_v19 = vsel %vm872_vm1, %v2760_v18, 0.0  ;;  %v2940_v59 = vmul.f32 %v2760_v18, %v2760_v18 }
 0x373   : > { %v2987_v60 = vadd.f32 %v2986_v17, %v2985_v56  ;;  %v2886_v51 = vadd.f32 %v2885_v19, %v2884_v41  ;;  %v2992_v25 = vsel %vm872_vm1, %v2942_v20, 0.0 }
 0x374   : > { %v2988_v22 = vsel %vm872_vm1, %v2940_v59, 0.0 }
 0x375   : > { %v2888_v21 = vadd.f32 %v2887_v52, %v2886_v51  ;;  %v2989_v39 = vadd.f32 %v2988_v22, %v2987_v60 }
 0x377   : > { %v2991_v42 = vadd.f32 %v2990_v23, %v2989_v39  ;;  %v2890_v43 = vadd.f32 %v2889_v24, %v2888_v21 }
 0x379   : > { %v2993_v61 = vadd.f32 %v2992_v25, %v2991_v42 }
 0x39e   : > { %v3191_v15 = vpop.f32.mrb[4].mxu1 }
 0x39f   : > { %2842 = vst.msk [vmem:[%s4407_s24 + $0xb0] sm:$0xff] %vm872_vm1, %v3191_v15  ;;  %v2773_v16 = vpop.f32.mrb[5].mxu1  ;;  %v2945_v30 = vmul.f32 %v3191_v15, %v3191_v15  ;;  %v2895_v57 = vsel %vm872_vm1, %v3191_v15, 0.0 }
 0x3a0   : > { %2840 = vst.msk [vmem:[%s4407_s24 + $0xa0] sm:$0xff] %vm872_vm1, %v2773_v16  ;;  %v2891_v1 = vsel %vm872_vm1, %v2773_v16, 0.0  ;;  %v2943_v5 = vmul.f32 %v2773_v16, %v2773_v16  ;;  %v3192_v49 = vpop.f32.mrb[6].mxu1 }
 0x3a1   : > { %v2892_v26 = vadd.f32 %v2891_v1, %v2890_v43  ;;  %2843 = vst.msk [vmem:[%s4407_s24 + $0xb8] sm:$0xff] %vm872_vm1, %v3192_v49  ;;  %v2776_v10 = vpop.f32.mrb[7].mxu1  ;;  %v2946_v28 = vmul.f32 %v3192_v49, %v3192_v49  ;;  %v2998_v44 = vsel %vm872_vm1, %v2945_v30, 0.0  ;;  %v2897_v45 = vsel %vm872_vm1, %v3192_v49, 0.0 }
 0x3a2   : > { %v2994_v54 = vsel %vm872_vm1, %v2943_v5, 0.0  ;;  %2841 = vst.msk [vmem:[%s4407_s24 + $0xa8] sm:$0xff] %vm872_vm1, %v2776_v10  ;;  %v2893_v31 = vsel %vm872_vm1, %v2776_v10, 0.0  ;;  %v2944_v53 = vmul.f32 %v2776_v10, %v2776_v10 }
 0x3a3   : > { %v2995_v27 = vadd.f32 %v2994_v54, %v2993_v61  ;;  %v2894_v55 = vadd.f32 %v2893_v31, %v2892_v26  ;;  %v3000_v33 = vsel %vm872_vm1, %v2946_v28, 0.0 }
 0x3a4   : > { %v2996_v29 = vsel %vm872_vm1, %v2944_v53, 0.0 }
 0x3a5   : > { %v2896_v37 = vadd.f32 %v2895_v57, %v2894_v55  ;;  %v2997_v38 = vadd.f32 %v2996_v29, %v2995_v27 }
 0x3a7   : > { %v2999_v35 = vadd.f32 %v2998_v44, %v2997_v38  ;;  %v2898_v32 = vadd.f32 %v2897_v45, %v2896_v37 }
 0x3a9   : > { %v3001_v47 = vadd.f32 %v3000_v33, %v2999_v35 }
 0x3ce   : > { %v3195_v0 = vpop.f32.mrb[8].mxu1 }
 0x3cf   : > { %2846 = vst.msk [vmem:[%s4407_s24 + $0xd0] sm:$0xff] %vm872_vm1, %v3195_v0  ;;  %v2789_v36 = vpop.f32.mrb[9].mxu1  ;;  %v2949_v34 = vmul.f32 %v3195_v0, %v3195_v0  ;;  %v2903_v48 = vsel %vm872_vm1, %v3195_v0, 0.0 }
 0x3d0   : > { %2844 = vst.msk [vmem:[%s4407_s24 + $0xc0] sm:$0xff] %vm872_vm1, %v2789_v36  ;;  %v2899_v7 = vsel %vm872_vm1, %v2789_v36, 0.0  ;;  %v2947_v8 = vmul.f32 %v2789_v36, %v2789_v36  ;;  %v3196_v9 = vpop.f32.mrb[10].mxu1 }
 0x3d1   : > { %v2900_v11 = vadd.f32 %v2899_v7, %v2898_v32  ;;  %2847 = vst.msk [vmem:[%s4407_s24 + $0xd8] sm:$0xff] %vm872_vm1, %v3196_v9  ;;  %v2792_v12 = vpop.f32.mrb[11].mxu1  ;;  %v2950_v6 = vmul.f32 %v3196_v9, %v3196_v9  ;;  %v3006_v13 = vsel %vm872_vm1, %v2949_v34, 0.0  ;;  %v2905_v14 = vsel %vm872_vm1, %v3196_v9, 0.0 }
 0x3d2   : > { %v3002_v50 = vsel %vm872_vm1, %v2947_v8, 0.0  ;;  %2845 = vst.msk [vmem:[%s4407_s24 + $0xc8] sm:$0xff] %vm872_vm1, %v2792_v12  ;;  %v2901_v58 = vsel %vm872_vm1, %v2792_v12, 0.0  ;;  %v2948_v62 = vmul.f32 %v2792_v12, %v2792_v12 }
 0x3d3   : > { %v3003_v63 = vadd.f32 %v3002_v50, %v3001_v47  ;;  %v2902_v46 = vadd.f32 %v2901_v58, %v2900_v11  ;;  %v3008_v18 = vsel %vm872_vm1, %v2950_v6, 0.0 }
 0x3d4   : > { %v3004_v56 = vsel %vm872_vm1, %v2948_v62, 0.0 }
 0x3d5   : > { %v2904_v2 = vadd.f32 %v2903_v48, %v2902_v46  ;;  %v3005_v4 = vadd.f32 %v3004_v56, %v3003_v63 }
 0x3d7   : > { %v3007_v40 = vadd.f32 %v3006_v13, %v3005_v4  ;;  %v2906_v41 = vadd.f32 %v2905_v14, %v2904_v2 }
 0x3d9   : > { %v3009_v3 = vadd.f32 %v3008_v18, %v3007_v40 }
 0x3fe   : > { %v3199_v17 = vpop.f32.mrb[12].mxu1 }
 0x3ff   : > { %2850 = vst.msk [vmem:[%s4407_s24 + $0xf0] sm:$0xff] %vm872_vm1, %v3199_v17  ;;  %v2805_v19 = vpop.f32.mrb[13].mxu1  ;;  %v2953_v22 = vmul.f32 %v3199_v17, %v3199_v17  ;;  %v2911_v43 = vsel %vm872_vm1, %v3199_v17, 0.0 }
 0x400   : > { %2848 = vst.msk [vmem:[%s4407_s24 + $0xe0] sm:$0xff] %vm872_vm1, %v2805_v19  ;;  %v2907_v59 = vsel %vm872_vm1, %v2805_v19, 0.0  ;;  %v2951_v60 = vmul.f32 %v2805_v19, %v2805_v19  ;;  %v3200_v51 = vpop.f32.mrb[14].mxu1 }
 0x401   : > { %v2908_v52 = vadd.f32 %v2907_v59, %v2906_v41  ;;  %2851 = vst.msk [vmem:[%s4407_s24 + $0xf8] sm:$0xff] %vm872_vm1, %v3200_v51  ;;  %v2808_v20 = vpop.f32.mrb[15].mxu1  ;;  %v2954_v25 = vmul.f32 %v3200_v51, %v3200_v51  ;;  %v3014_v1 = vsel %vm872_vm1, %v2953_v22, 0.0  ;;  %v2913_v5 = vsel %vm872_vm1, %v3200_v51, 0.0 }
 0x402   : > { %v3010_v21 = vsel %vm872_vm1, %v2951_v60, 0.0  ;;  %2849 = vst.msk [vmem:[%s4407_s24 + $0xe8] sm:$0xff] %vm872_vm1, %v2808_v20  ;;  %v2909_v39 = vsel %vm872_vm1, %v2808_v20, 0.0  ;;  %v2952_v23 = vmul.f32 %v2808_v20, %v2808_v20 }
 0x403   : > { %v3011_v24 = vadd.f32 %v3010_v21, %v3009_v3  ;;  %v2910_v42 = vadd.f32 %v2909_v39, %v2908_v52  ;;  %v3016_v10 = vsel %vm872_vm1, %v2954_v25, 0.0 }
 0x404   : > { %v3012_v61 = vsel %vm872_vm1, %v2952_v23, 0.0 }
 0x405   : > { %v2912_v15 = vadd.f32 %v2911_v43, %v2910_v42  ;;  %v3013_v16 = vadd.f32 %v3012_v61, %v3011_v24 }
 0x407   : > { %v2914_v49 = vadd.f32 %v2913_v5, %v2912_v15  ;;  %v3015_v26 = vadd.f32 %v3014_v1, %v3013_v16 }
 0x409   : > { %v2915_v30 = vrot.slane %v2914_v49, 4  ;;  %v3017_v54 = vadd.f32 %v3016_v10, %v3015_v26 }
 0x40b   : > { %v2916_v31 = vadd.f32 %v2915_v30, %v2914_v49  ;;  %v3018_v53 = vrot.slane %v3017_v54, 4 }
 0x40d   : > { %v2917_v27 = vrot.slane %v2916_v31, 2  ;;  %v3019_v55 = vadd.f32 %v3018_v53, %v3017_v54 }
 0x40f   : > { %v2918_v57 = vadd.f32 %v2917_v27, %v2916_v31  ;;  %v3020_v28 = vrot.slane %v3019_v55, 2 }
 0x411   : > { %v2919_v29 = vrot.slane %v2918_v57, 1  ;;  %v3021_v37 = vadd.f32 %v3020_v28, %v3019_v55 }
 0x413   : > { %v2920_v38 = vadd.f32 %v2919_v29, %v2918_v57  ;;  %v3022_v44 = vrot.slane %v3021_v37, 1 }
 0x415   : > { %2922 = vst.msk [vmem:[%s262_s28] sm:$0x1] %vm2921_vm12, %v2920_v38  ;;  %v3023_v45 = vadd.f32 %v3022_v44, %v3021_v37 }
 0x417   : > { %3024 = vst.msk [vmem:[%s262_s28 + $0x1] sm:$0x1] %vm2921_vm12, %v3023_v45 }
 0x418 PF: > { %s17_s21 = sadd.s32 1, %s3238_s21  }
 0x419   : > { %p14_p4 = scmp.ge.s32.totalorder %s17_s21, 4  }
 0x41b   :  { %16 = sbr.rel (!%p14_p4) target bundleno = 1 (0x1), region = 84 }

</bundles_post_ra>
